<compile_context>
chip_gen: v6e
topology: v6e:2x2x1
jax: 0.10.0
libtpu: 0.0.40
codegen_flags: <defaults>
</compile_context>

<pallas_src>
import functools

import jax
import jax.numpy as jnp
from jax.experimental import pallas as pl
from jax.experimental.pallas import tpu as pltpu

DIM = 64
BN_EPS = 1e-5
VMEM_LIMIT_BYTES = 32 * 1024 * 1024   # explicit scoped-VMEM budget (safe on v5e/v6e/v7x)


def _round_up(x, m):
    return ((x + m - 1) // m) * m


# ------------------------------------------------------------------
# Pallas kernels
# ------------------------------------------------------------------
def _matmul_bias_act_kernel(x_ref, w_ref, b_ref, o_ref, acc_ref, *, act):
    k = pl.program_id(2)

    @pl.when(k == 0)
    def _():
        acc_ref[...] = jnp.zeros_like(acc_ref)

    acc_ref[...] += jnp.dot(x_ref[...], w_ref[...],
                            preferred_element_type=jnp.float32)

    @pl.when(k == pl.num_programs(2) - 1)
    def _():
        y = acc_ref[...] + b_ref[...]
        if act == "tanh":
            y = jnp.tanh(y)
        o_ref[...] = y


def _affine_act_res_kernel(*refs, act, n_res):
    # refs = (x, scale, shift, *residuals, out)
    x_ref, s_ref, t_ref = refs[0], refs[1], refs[2]
    res_refs = refs[3:3 + n_res]
    o_ref = refs[3 + n_res]
    y = x_ref[...] * s_ref[...] + t_ref[...]
    if act == "relu":
        y = jnp.maximum(y, 0.0)
    elif act == "tanh":
        y = jnp.tanh(y)
    for r in res_refs:
        y = y + r[...]
    o_ref[...] = y


# ------------------------------------------------------------------
# Pallas wrappers
# ------------------------------------------------------------------
def _pick_tiles(M, K, N):
    """Per-layer tile selection (feedback: large tm, 256-wide N when possible, no K padding for K<128)."""
    tm = 256 if M >= 256 else _round_up(max(M, 1), 8)
    Np = _round_up(N, 128)
    tn = 256 if (Np % 256 == 0) else 128        # note: 128 already saturates v5e's 4x128 MXU
    if K <= 128 and K % 8 == 0:
        tk, Kp = K, K                           # single k step, no zero-padding work
    else:
        Kp = _round_up(K, 128)
        tk = 512 if Kp % 512 == 0 else (256 if Kp % 256 == 0 else 128)
    return tm, tn, tk, Np, Kp


def pallas_matmul(x, w, bias=None, act="none"):
    """y = act(x @ w + bias); x:(M,K), w:(K,N).  bf16 operands, f32 accumulate, f32 out."""
    M, K = x.shape
    _, N = w.shape
    tm, tn, tk, Np, Kp = _pick_tiles(M, K, N)
    Mp = _round_up(M, tm)

    xp = x.astype(jnp.bfloat16)
    if (Mp - M) or (Kp - K):
        xp = jnp.pad(xp, ((0, Mp - M), (0, Kp - K)))
    wp = w.astype(jnp.bfloat16)
    if (Kp - K) or (Np - N):
        wp = jnp.pad(wp, ((0, Kp - K), (0, Np - N)))
    b = jnp.zeros((N,), jnp.float32) if bias is None else bias.astype(jnp.float32)
    bp = b.reshape(1, N)
    if Np - N:
        bp = jnp.pad(bp, ((0, 0), (0, Np - N)))

    grid = (Mp // tm, Np // tn, Kp // tk)
    out = pl.pallas_call(
        functools.partial(_matmul_bias_act_kernel, act=act),
        out_shape=jax.ShapeDtypeStruct((Mp, Np), jnp.float32),
        grid_spec=pltpu.PrefetchScalarGridSpec(
            num_scalar_prefetch=0,
            grid=grid,
            in_specs=[
                pl.BlockSpec((tm, tk), lambda i, j, k: (i, k)),
                pl.BlockSpec((tk, tn), lambda i, j, k: (k, j)),
                pl.BlockSpec((1, tn), lambda i, j, k: (0, j)),
            ],
            out_specs=pl.BlockSpec((tm, tn), lambda i, j, k: (i, j)),
            scratch_shapes=[pltpu.VMEM((tm, tn), jnp.float32)],
        ),
        compiler_params=pltpu.CompilerParams(
            dimension_semantics=("parallel", "parallel", "arbitrary"),
            vmem_limit_bytes=VMEM_LIMIT_BYTES),
    )(xp, wp, bp)
    return out[:M, :N]


def pallas_affine_act(x, scale, shift, act, residuals=()):
    """y = act(x*scale + shift) + sum(residuals); x,(residuals): (M,C), scale/shift: (C,).
    Tiled over M so large activations never need to be whole-array VMEM resident."""
    M, C = x.shape
    bm = min(512, _round_up(max(M, 1), 8))
    Mp = _round_up(M, bm)
    pad = Mp - M

    def pad_m(a):
        a = a.astype(jnp.float32)
        return jnp.pad(a, ((0, pad), (0, 0))) if pad else a

    xp = pad_m(x)
    resp = [pad_m(r) for r in residuals]
    s = scale.astype(jnp.float32).reshape(1, C)
    t = shift.astype(jnp.float32).reshape(1, C)

    in_specs = ([pl.BlockSpec((bm, C), lambda i: (i, 0)),
                 pl.BlockSpec((1, C), lambda i: (0, 0)),
                 pl.BlockSpec((1, C), lambda i: (0, 0))] +
                [pl.BlockSpec((bm, C), lambda i: (i, 0)) for _ in residuals])

    out = pl.pallas_call(
        functools.partial(_affine_act_res_kernel, act=act, n_res=len(residuals)),
        out_shape=jax.ShapeDtypeStruct((Mp, C), jnp.float32),
        grid_spec=pltpu.PrefetchScalarGridSpec(
            num_scalar_prefetch=0,
            grid=(Mp // bm,),
            in_specs=in_specs,
            out_specs=pl.BlockSpec((bm, C), lambda i: (i, 0)),
        ),
        compiler_params=pltpu.CompilerParams(
            dimension_semantics=("parallel",),
            vmem_limit_bytes=VMEM_LIMIT_BYTES),
    )(xp, s, t, *resp)
    return out[:M]


# ------------------------------------------------------------------
# Conv layers as im2col + Pallas matmul (patch/weight reshuffles in plain JAX)
# ------------------------------------------------------------------
def conv2x2_s2(x, w):
    """x: (N,H,W,Cin), w: (Cout,Cin,2,2) [PyTorch layout], stride 2, no pad, no bias
    (the bias of a conv feeding training-mode BatchNorm cancels exactly)."""
    Nb, H, W, Cin = x.shape
    Cout = w.shape[0]
    Ho, Wo = H // 2, W // 2
    patches = x.reshape(Nb, Ho, 2, Wo, 2, Cin).transpose(0, 1, 3, 2, 4, 5)
    patches = patches.reshape(Nb * Ho * Wo, 4 * Cin)          # (kh,kw,ci) feature order
    wmat = w.transpose(2, 3, 1, 0).reshape(4 * Cin, Cout)
    y = pallas_matmul(patches, wmat)
    return y.reshape(Nb, Ho, Wo, Cout)


def conv3x3_p1(x, w):
    """x: (N,H,W,Cin), w: (Cout,Cin,3,3), stride 1, pad 1, no bias (cancels in BN)."""
    # TODO(synk): replace the JAX im2col (9 shifted copies in HBM) with in-kernel
    # accumulation over the 9 taps (grid axis over taps picking shifted windows) to cut
    # residual-block activation DMA ~9x at large spatial sizes.
    Nb, H, W, Cin = x.shape
    Cout = w.shape[0]
    xp = jnp.pad(x, ((0, 0), (1, 1), (1, 1), (0, 0)))
    cols = [xp[:, ki:ki + H, kj:kj + W, :] for ki in range(3) for kj in range(3)]
    patches = jnp.stack(cols, axis=3).reshape(Nb * H * W, 9 * Cin)
    wmat = w.transpose(2, 3, 1, 0).reshape(9 * Cin, Cout)
    y = pallas_matmul(patches, wmat)
    return y.reshape(Nb, H, W, Cout)


def convT2x2_s2(x, w, b=None, act="none"):
    """x: (N,H,W,Cin), w: (Cin,Cout,2,2) [PyTorch ConvTranspose layout], stride 2.
    Optional bias + tanh fused into the matmul finalize."""
    Nb, H, W, Cin = x.shape
    Cout = w.shape[1]
    wmat = w.transpose(0, 2, 3, 1).reshape(Cin, 4 * Cout)     # (kh,kw,co) column order
    bexp = None if b is None else jnp.tile(b, 4)
    y = pallas_matmul(x.reshape(Nb * H * W, Cin), wmat, bexp, act=act)
    y = y.reshape(Nb, H, W, 2, 2, Cout).transpose(0, 1, 3, 2, 4, 5)
    return y.reshape(Nb, 2 * H, 2 * W, Cout)


def bn_act(x, gamma, beta, act, residuals=()):
    """Training-mode BatchNorm2d (single-pass batch stats over N,H,W, biased var, f32)
    + activation + fused residual add(s)."""
    Nb, H, W, C = x.shape
    M = Nb * H * W
    xf = x.reshape(M, C)
    s1 = jnp.sum(xf, axis=0)
    s2 = jnp.sum(xf * xf, axis=0)
    mean = s1 / M
    var = jnp.maximum(s2 / M - mean * mean, 0.0)
    scale = gamma * jax.lax.rsqrt(var + BN_EPS)
    shift = beta - mean * scale
    res_flat = [r.reshape(M, C) for r in residuals]
    y = pallas_affine_act(xf, scale, shift, act, res_flat)
    return y.reshape(Nb, H, W, C)


# ------------------------------------------------------------------
# Generator
# ------------------------------------------------------------------
def init_params(key, in_features=3):
    c_in = in_features + 1

    def conv_p(key, cout, cin, k):
        kw, kb = jax.random.split(key)
        return {
            "w": 0.05 * jax.random.normal(kw, (cout, cin, k, k), jnp.float32),
            # conv biases before BatchNorm are kept for parameter parity with PyTorch but are
            # mathematically folded away by training-mode batch statistics (no effect on output).
            "b": 0.05 * jax.random.normal(kb, (cout,), jnp.float32),
        }

    def convT_p(key, cin, cout, k):
        kw, kb = jax.random.split(key)
        return {
            "w": 0.05 * jax.random.normal(kw, (cin, cout, k, k), jnp.float32),
            "b": 0.05 * jax.random.normal(kb, (cout,), jnp.float32),
        }

    def bn_p(c):
        return {"gamma": jnp.ones((c,), jnp.float32),
                "beta": jnp.zeros((c,), jnp.float32)}

    keys = jax.random.split(key, 16)
    params = {}
    params["l1"] = {**conv_p(keys[0], DIM, c_in, 2), **bn_p(DIM)}
    params["l2"] = {**conv_p(keys[1], 2 * DIM, DIM, 2), **bn_p(2 * DIM)}
    params["l3"] = {**conv_p(keys[2], 4 * DIM, 2 * DIM, 2), **bn_p(4 * DIM)}
    params["l4"] = {**conv_p(keys[3], 8 * DIM, 4 * DIM, 2), **bn_p(8 * DIM)}

    res = []
    for i in range(3):
        k1, k2 = jax.random.split(keys[4 + i])
        c1 = conv_p(k1, 8 * DIM, 8 * DIM, 3)
        c2 = conv_p(k2, 8 * DIM, 8 * DIM, 3)
        res.append({
            "w1": c1["w"], "b1": c1["b"],
            "g1": jnp.ones((8 * DIM,), jnp.float32), "be1": jnp.zeros((8 * DIM,), jnp.float32),
            "w2": c2["w"], "b2": c2["b"],
            "g2": jnp.ones((8 * DIM,), jnp.float32), "be2": jnp.zeros((8 * DIM,), jnp.float32),
        })
    params["l5"] = res

    params["l6"] = {**convT_p(keys[7], 8 * DIM, 4 * DIM, 2), **bn_p(4 * DIM)}
    params["l7"] = {**convT_p(keys[8], 4 * DIM, 2 * DIM, 2), **bn_p(2 * DIM)}
    params["l8"] = {**convT_p(keys[9], 2 * DIM, DIM, 2), **bn_p(DIM)}
    params["l9"] = convT_p(keys[10], DIM, c_in, 2)
    return params


def generator_forward(params, img, age):
    # img: (N,3,H,W), age: (N,1,H,W) — NCHW like PyTorch; convert once to NHWC.
    x = jnp.concatenate([img, age], axis=1)
    x = jnp.transpose(x, (0, 2, 3, 1)).astype(jnp.float32)

    def down(h, p):
        return bn_act(conv2x2_s2(h, p["w"]), p["gamma"], p["beta"], "relu")

    def up(h, p, skip):
        # ConvT -> BN -> ReLU, with the U-Net skip add fused into the BN/ReLU kernel.
        return bn_act(convT2x2_s2(h, p["w"]), p["gamma"], p["beta"], "relu",
                      residuals=(skip,))

    x1 = down(x, params["l1"])
    x2 = down(x1, params["l2"])
    x3 = down(x2, params["l3"])
    x4 = down(x3, params["l4"])

    # layer5: 3 residual blocks; the trailing "+ x4" of x5 = layer5(x4) + x4 is fused into the
    # last block's BN epilogue (second residual input).
    h = x4
    nblocks = len(params["l5"])
    for i, rb in enumerate(params["l5"]):
        hh = conv3x3_p1(h, rb["w1"])
        hh = bn_act(hh, rb["g1"], rb["be1"], "relu")
        hh = conv3x3_p1(hh, rb["w2"])
        res = (h, x4) if i == nblocks - 1 else (h,)
        h = bn_act(hh, rb["g2"], rb["be2"], "none", residuals=res)
    x5 = h

    x6 = up(x5, params["l6"], x3)
    x7 = up(x6, params["l7"], x2)
    x8 = up(x7, params["l8"], x1)

    # layer9: ConvTranspose + Tanh, with bias and tanh fused into the matmul finalize.
    p9 = params["l9"]
    x9 = convT2x2_s2(x8, p9["w"], p9["b"], act="tanh")

    out = jnp.transpose(x9, (0, 3, 1, 2))[:, 0:3, :, :]   # back to NCHW, keep RGB
    return out


# ------------------------------------------------------------------
if __name__ == "__main__":
    key = jax.random.PRNGKey(0)
    kp, ki, ka = jax.random.split(key, 3)

    in_features = 3
    N, H, W = 2, 16, 16          # H,W divisible by 16 (4 stride-2 downsamples)
    params = init_params(kp, in_features)

    img = jax.random.normal(ki, (N, in_features, H, W), jnp.float32)
    age = jax.random.normal(ka, (N, 1, H, W), jnp.float32)

    fwd = jax.jit(generator_forward)
    out = fwd(params, img, age)
    out = jax.block_until_ready(out)

    assert out.shape == (N, 3, H, W), out.shape
    assert bool(jnp.all(jnp.isfinite(out)))
    assert bool(jnp.all(jnp.abs(out) <= 1.0 + 1e-6))   # tanh output range
    print("KERNEL_OK")
</pallas_src>

<mosaic_0001>
module attributes {stable_mosaic.version = 11 : i64} {
  func.func @_matmul_bias_act_kernel(%arg0: i32, %arg1: i32, %arg2: i32, %arg3: memref<128x16xbf16, #tpu.memory_space<vmem>>, %arg4: memref<16x128xbf16, #tpu.memory_space<vmem>>, %arg5: memref<1x128xf32, #tpu.memory_space<vmem>>, %arg6: memref<128x128xf32, #tpu.memory_space<vmem>>, %arg7: memref<128x128xf32, #tpu.memory_space<vmem>>) attributes {dimension_semantics = [#tpu.dimension_semantics<parallel>, #tpu.dimension_semantics<parallel>, #tpu.dimension_semantics<arbitrary>], iteration_bounds = array<i64: 1, 1, 1>, scalar_prefetch = 0 : i64, scratch_operands = 1 : i64, tpu.core_type = #tpu.core_type<tc>, window_params = [{transform_indices = @transform_0, window_bounds = array<i64: 128, 16>}, {transform_indices = @transform_1, window_bounds = array<i64: 16, 128>}, {transform_indices = @transform_2, window_bounds = array<i64: 1, 128>}, {transform_indices = @transform_3, window_bounds = array<i64: 128, 128>}]} {
    %c0_i32 = arith.constant 0 : i32
    %0 = arith.cmpi eq, %arg2, %c0_i32 : i32
    %1 = arith.extui %0 : i1 to i32
    %c0_i32_0 = arith.constant 0 : i32
    %2 = arith.cmpi ne, %1, %c0_i32_0 : i32
    scf.if %2 {
      %cst_10 = arith.constant 0.000000e+00 : f32
      %12 = vector.broadcast %cst_10 : f32 to vector<128x128xf32>
      %c0_11 = arith.constant 0 : index
      %c0_12 = arith.constant 0 : index
      %13 = vector.load %arg7[%c0_11, %c0_12] : memref<128x128xf32, #tpu.memory_space<vmem>>, vector<128x128xf32>
      tpu.vector_store %arg7[%c0_11, %c0_12], %12 {strides = array<i32>} : memref<128x128xf32, #tpu.memory_space<vmem>>, vector<128x128xf32>,
    } else {
    }
    %c0 = arith.constant 0 : index
    %c0_1 = arith.constant 0 : index
    %3 = vector.load %arg7[%c0, %c0_1] : memref<128x128xf32, #tpu.memory_space<vmem>>, vector<128x128xf32>
    %c0_2 = arith.constant 0 : index
    %c0_3 = arith.constant 0 : index
    %4 = vector.load %arg3[%c0_2, %c0_3] : memref<128x16xbf16, #tpu.memory_space<vmem>>, vector<128x16xbf16>
    %c0_4 = arith.constant 0 : index
    %c0_5 = arith.constant 0 : index
    %5 = vector.load %arg4[%c0_4, %c0_5] : memref<16x128xbf16, #tpu.memory_space<vmem>>, vector<16x128xbf16>
    %cst = arith.constant dense<0.000000e+00> : vector<128x128xf32>
    %6 = tpu.matmul %4, %5, %cst {dimension_numbers = #tpu.dot_dimension_numbers<[1], [0], [0], [1], [0, 0, 1, 1], [], []>} : vector<128x16xbf16>, vector<16x128xbf16>, vector<128x128xf32> -> vector<128x128xf32>
    %7 = arith.addf %3, %6 : vector<128x128xf32>
    %c0_6 = arith.constant 0 : index
    %c0_7 = arith.constant 0 : index
    %8 = vector.load %arg7[%c0_6, %c0_7] : memref<128x128xf32, #tpu.memory_space<vmem>>, vector<128x128xf32>
    tpu.vector_store %arg7[%c0_6, %c0_7], %7 {strides = array<i32>} : memref<128x128xf32, #tpu.memory_space<vmem>>, vector<128x128xf32>,
    %c0_i32_8 = arith.constant 0 : i32
    %9 = arith.cmpi eq, %arg2, %c0_i32_8 : i32
    %10 = arith.extui %9 : i1 to i32
    %c0_i32_9 = arith.constant 0 : i32
    %11 = arith.cmpi ne, %10, %c0_i32_9 : i32
    scf.if %11 {
      %c0_10 = arith.constant 0 : index
      %c0_11 = arith.constant 0 : index
      %12 = vector.load %arg7[%c0_10, %c0_11] : memref<128x128xf32, #tpu.memory_space<vmem>>, vector<128x128xf32>
      %c0_12 = arith.constant 0 : index
      %c0_13 = arith.constant 0 : index
      %13 = vector.load %arg5[%c0_12, %c0_13] : memref<1x128xf32, #tpu.memory_space<vmem>>, vector<1x128xf32>
      %14 = vector.broadcast %13 : vector<1x128xf32> to vector<128x128xf32>
      %15 = arith.addf %12, %14 : vector<128x128xf32>
      %c0_14 = arith.constant 0 : index
      %c0_15 = arith.constant 0 : index
      %16 = vector.load %arg6[%c0_14, %c0_15] : memref<128x128xf32, #tpu.memory_space<vmem>>, vector<128x128xf32>
      tpu.vector_store %arg6[%c0_14, %c0_15], %15 {strides = array<i32>} : memref<128x128xf32, #tpu.memory_space<vmem>>, vector<128x128xf32>,
    } else {
    }
    return
  }
  func.func @transform_0(%arg0: i32, %arg1: i32, %arg2: i32) -> (i32, i32) {
    %c0_i32 = arith.constant 0 : i32
    return %arg0, %arg2 : i32, i32
  }
  func.func @transform_1(%arg0: i32, %arg1: i32, %arg2: i32) -> (i32, i32) {
    %c0_i32 = arith.constant 0 : i32
    return %arg2, %arg1 : i32, i32
  }
  func.func @transform_2(%arg0: i32, %arg1: i32, %arg2: i32) -> (i32, i32) {
    %c0_i32 = arith.constant 0 : i32
    %c0_i32_0 = arith.constant 0 : i32
    return %c0_i32, %arg1 : i32, i32
  }
  func.func @transform_3(%arg0: i32, %arg1: i32, %arg2: i32) -> (i32, i32) {
    %c0_i32 = arith.constant 0 : i32
    return %arg0, %arg1 : i32, i32
  }
}

module attributes {stable_mosaic.version = 11 : i64} {
  func.func @_affine_act_res_kernel(%arg0: i32, %arg1: memref<128x64xf32, #tpu.memory_space<vmem>>, %arg2: memref<1x64xf32, #tpu.memory_space<vmem>>, %arg3: memref<1x64xf32, #tpu.memory_space<vmem>>, %arg4: memref<128x64xf32, #tpu.memory_space<vmem>>) attributes {dimension_semantics = [#tpu.dimension_semantics<parallel>], iteration_bounds = array<i64: 1>, scalar_prefetch = 0 : i64, scratch_operands = 0 : i64, tpu.core_type = #tpu.core_type<tc>, window_params = [{transform_indices = @transform_0, window_bounds = array<i64: 128, 64>}, {pipeline_mode = #tpu.pipeline_mode<synchronous>, transform_indices = @transform_1, window_bounds = array<i64: 1, 64>}, {pipeline_mode = #tpu.pipeline_mode<synchronous>, transform_indices = @transform_2, window_bounds = array<i64: 1, 64>}, {transform_indices = @transform_3, window_bounds = array<i64: 128, 64>}]} {
    %c0 = arith.constant 0 : index
    %c0_0 = arith.constant 0 : index
    %0 = vector.load %arg1[%c0, %c0_0] : memref<128x64xf32, #tpu.memory_space<vmem>>, vector<128x64xf32>
    %c0_1 = arith.constant 0 : index
    %c0_2 = arith.constant 0 : index
    %1 = vector.load %arg2[%c0_1, %c0_2] : memref<1x64xf32, #tpu.memory_space<vmem>>, vector<1x64xf32>
    %2 = vector.broadcast %1 : vector<1x64xf32> to vector<128x64xf32>
    %3 = arith.mulf %0, %2 : vector<128x64xf32>
    %c0_3 = arith.constant 0 : index
    %c0_4 = arith.constant 0 : index
    %4 = vector.load %arg3[%c0_3, %c0_4] : memref<1x64xf32, #tpu.memory_space<vmem>>, vector<1x64xf32>
    %5 = vector.broadcast %4 : vector<1x64xf32> to vector<128x64xf32>
    %6 = arith.addf %3, %5 : vector<128x64xf32>
    %cst = arith.constant 0.000000e+00 : f32
    %7 = vector.broadcast %cst : f32 to vector<128x64xf32>
    %8 = arith.maximumf %6, %7 : vector<128x64xf32>
    %c0_5 = arith.constant 0 : index
    %c0_6 = arith.constant 0 : index
    %9 = vector.load %arg4[%c0_5, %c0_6] : memref<128x64xf32, #tpu.memory_space<vmem>>, vector<128x64xf32>
    tpu.vector_store %arg4[%c0_5, %c0_6], %8 {strides = array<i32>} : memref<128x64xf32, #tpu.memory_space<vmem>>, vector<128x64xf32>,
    return
  }
  func.func @transform_0(%arg0: i32) -> (i32, i32) {
    %c0_i32 = arith.constant 0 : i32
    %c0_i32_0 = arith.constant 0 : i32
    return %arg0, %c0_i32 : i32, i32
  }
  func.func @transform_1(%arg0: i32) -> (i32, i32) {
    %c0_i32 = arith.constant 0 : i32
    %c0_i32_0 = arith.constant 0 : i32
    %c0_i32_1 = arith.constant 0 : i32
    return %c0_i32, %c0_i32_0 : i32, i32
  }
  func.func @transform_2(%arg0: i32) -> (i32, i32) {
    %c0_i32 = arith.constant 0 : i32
    %c0_i32_0 = arith.constant 0 : i32
    %c0_i32_1 = arith.constant 0 : i32
    return %c0_i32, %c0_i32_0 : i32, i32
  }
  func.func @transform_3(%arg0: i32) -> (i32, i32) {
    %c0_i32 = arith.constant 0 : i32
    %c0_i32_0 = arith.constant 0 : i32
    return %arg0, %c0_i32 : i32, i32
  }
}

module attributes {stable_mosaic.version = 11 : i64} {
  func.func @_affine_act_res_kernel(%arg0: i32, %arg1: memref<32x128xf32, #tpu.memory_space<vmem>>, %arg2: memref<1x128xf32, #tpu.memory_space<vmem>>, %arg3: memref<1x128xf32, #tpu.memory_space<vmem>>, %arg4: memref<32x128xf32, #tpu.memory_space<vmem>>) attributes {dimension_semantics = [#tpu.dimension_semantics<parallel>], iteration_bounds = array<i64: 1>, scalar_prefetch = 0 : i64, scratch_operands = 0 : i64, tpu.core_type = #tpu.core_type<tc>, window_params = [{transform_indices = @transform_0, window_bounds = array<i64: 32, 128>}, {pipeline_mode = #tpu.pipeline_mode<synchronous>, transform_indices = @transform_1, window_bounds = array<i64: 1, 128>}, {pipeline_mode = #tpu.pipeline_mode<synchronous>, transform_indices = @transform_2, window_bounds = array<i64: 1, 128>}, {transform_indices = @transform_3, window_bounds = array<i64: 32, 128>}]} {
    %c0 = arith.constant 0 : index
    %c0_0 = arith.constant 0 : index
    %0 = vector.load %arg1[%c0, %c0_0] : memref<32x128xf32, #tpu.memory_space<vmem>>, vector<32x128xf32>
    %c0_1 = arith.constant 0 : index
    %c0_2 = arith.constant 0 : index
    %1 = vector.load %arg2[%c0_1, %c0_2] : memref<1x128xf32, #tpu.memory_space<vmem>>, vector<1x128xf32>
    %2 = vector.broadcast %1 : vector<1x128xf32> to vector<32x128xf32>
    %3 = arith.mulf %0, %2 : vector<32x128xf32>
    %c0_3 = arith.constant 0 : index
    %c0_4 = arith.constant 0 : index
    %4 = vector.load %arg3[%c0_3, %c0_4] : memref<1x128xf32, #tpu.memory_space<vmem>>, vector<1x128xf32>
    %5 = vector.broadcast %4 : vector<1x128xf32> to vector<32x128xf32>
    %6 = arith.addf %3, %5 : vector<32x128xf32>
    %cst = arith.constant 0.000000e+00 : f32
    %7 = vector.broadcast %cst : f32 to vector<32x128xf32>
    %8 = arith.maximumf %6, %7 : vector<32x128xf32>
    %c0_5 = arith.constant 0 : index
    %c0_6 = arith.constant 0 : index
    %9 = vector.load %arg4[%c0_5, %c0_6] : memref<32x128xf32, #tpu.memory_space<vmem>>, vector<32x128xf32>
    tpu.vector_store %arg4[%c0_5, %c0_6], %8 {strides = array<i32>} : memref<32x128xf32, #tpu.memory_space<vmem>>, vector<32x128xf32>,
    return
  }
  func.func @transform_0(%arg0: i32) -> (i32, i32) {
    %c0_i32 = arith.constant 0 : i32
    %c0_i32_0 = arith.constant 0 : i32
    return %arg0, %c0_i32 : i32, i32
  }
  func.func @transform_1(%arg0: i32) -> (i32, i32) {
    %c0_i32 = arith.constant 0 : i32
    %c0_i32_0 = arith.constant 0 : i32
    %c0_i32_1 = arith.constant 0 : i32
    return %c0_i32, %c0_i32_0 : i32, i32
  }
  func.func @transform_2(%arg0: i32) -> (i32, i32) {
    %c0_i32 = arith.constant 0 : i32
    %c0_i32_0 = arith.constant 0 : i32
    %c0_i32_1 = arith.constant 0 : i32
    return %c0_i32, %c0_i32_0 : i32, i32
  }
  func.func @transform_3(%arg0: i32) -> (i32, i32) {
    %c0_i32 = arith.constant 0 : i32
    %c0_i32_0 = arith.constant 0 : i32
    return %arg0, %c0_i32 : i32, i32
  }
}

module attributes {stable_mosaic.version = 11 : i64} {
  func.func @_matmul_bias_act_kernel(%arg0: i32, %arg1: i32, %arg2: i32, %arg3: memref<32x256xbf16, #tpu.memory_space<vmem>>, %arg4: memref<256x128xbf16, #tpu.memory_space<vmem>>, %arg5: memref<1x128xf32, #tpu.memory_space<vmem>>, %arg6: memref<32x128xf32, #tpu.memory_space<vmem>>, %arg7: memref<32x128xf32, #tpu.memory_space<vmem>>) attributes {dimension_semantics = [#tpu.dimension_semantics<parallel>, #tpu.dimension_semantics<parallel>, #tpu.dimension_semantics<arbitrary>], iteration_bounds = array<i64: 1, 1, 1>, scalar_prefetch = 0 : i64, scratch_operands = 1 : i64, tpu.core_type = #tpu.core_type<tc>, window_params = [{transform_indices = @transform_0, window_bounds = array<i64: 32, 256>}, {transform_indices = @transform_1, window_bounds = array<i64: 256, 128>}, {transform_indices = @transform_2, window_bounds = array<i64: 1, 128>}, {transform_indices = @transform_3, window_bounds = array<i64: 32, 128>}]} {
    %c0_i32 = arith.constant 0 : i32
    %0 = arith.cmpi eq, %arg2, %c0_i32 : i32
    %1 = arith.extui %0 : i1 to i32
    %c0_i32_0 = arith.constant 0 : i32
    %2 = arith.cmpi ne, %1, %c0_i32_0 : i32
    scf.if %2 {
      %cst_10 = arith.constant 0.000000e+00 : f32
      %12 = vector.broadcast %cst_10 : f32 to vector<32x128xf32>
      %c0_11 = arith.constant 0 : index
      %c0_12 = arith.constant 0 : index
      %13 = vector.load %arg7[%c0_11, %c0_12] : memref<32x128xf32, #tpu.memory_space<vmem>>, vector<32x128xf32>
      tpu.vector_store %arg7[%c0_11, %c0_12], %12 {strides = array<i32>} : memref<32x128xf32, #tpu.memory_space<vmem>>, vector<32x128xf32>,
    } else {
    }
    %c0 = arith.constant 0 : index
    %c0_1 = arith.constant 0 : index
    %3 = vector.load %arg7[%c0, %c0_1] : memref<32x128xf32, #tpu.memory_space<vmem>>, vector<32x128xf32>
    %c0_2 = arith.constant 0 : index
    %c0_3 = arith.constant 0 : index
    %4 = vector.load %arg3[%c0_2, %c0_3] : memref<32x256xbf16, #tpu.memory_space<vmem>>, vector<32x256xbf16>
    %c0_4 = arith.constant 0 : index
    %c0_5 = arith.constant 0 : index
    %5 = vector.load %arg4[%c0_4, %c0_5] : memref<256x128xbf16, #tpu.memory_space<vmem>>, vector<256x128xbf16>
    %cst = arith.constant dense<0.000000e+00> : vector<32x128xf32>
    %6 = tpu.matmul %4, %5, %cst {dimension_numbers = #tpu.dot_dimension_numbers<[1], [0], [0], [1], [0, 0, 1, 1], [], []>} : vector<32x256xbf16>, vector<256x128xbf16>, vector<32x128xf32> -> vector<32x128xf32>
    %7 = arith.addf %3, %6 : vector<32x128xf32>
    %c0_6 = arith.constant 0 : index
    %c0_7 = arith.constant 0 : index
    %8 = vector.load %arg7[%c0_6, %c0_7] : memref<32x128xf32, #tpu.memory_space<vmem>>, vector<32x128xf32>
    tpu.vector_store %arg7[%c0_6, %c0_7], %7 {strides = array<i32>} : memref<32x128xf32, #tpu.memory_space<vmem>>, vector<32x128xf32>,
    %c0_i32_8 = arith.constant 0 : i32
    %9 = arith.cmpi eq, %arg2, %c0_i32_8 : i32
    %10 = arith.extui %9 : i1 to i32
    %c0_i32_9 = arith.constant 0 : i32
    %11 = arith.cmpi ne, %10, %c0_i32_9 : i32
    scf.if %11 {
      %c0_10 = arith.constant 0 : index
      %c0_11 = arith.constant 0 : index
      %12 = vector.load %arg7[%c0_10, %c0_11] : memref<32x128xf32, #tpu.memory_space<vmem>>, vector<32x128xf32>
      %c0_12 = arith.constant 0 : index
      %c0_13 = arith.constant 0 : index
      %13 = vector.load %arg5[%c0_12, %c0_13] : memref<1x128xf32, #tpu.memory_space<vmem>>, vector<1x128xf32>
      %14 = vector.broadcast %13 : vector<1x128xf32> to vector<32x128xf32>
      %15 = arith.addf %12, %14 : vector<32x128xf32>
      %c0_14 = arith.constant 0 : index
      %c0_15 = arith.constant 0 : index
      %16 = vector.load %arg6[%c0_14, %c0_15] : memref<32x128xf32, #tpu.memory_space<vmem>>, vector<32x128xf32>
      tpu.vector_store %arg6[%c0_14, %c0_15], %15 {strides = array<i32>} : memref<32x128xf32, #tpu.memory_space<vmem>>, vector<32x128xf32>,
    } else {
    }
    return
  }
  func.func @transform_0(%arg0: i32, %arg1: i32, %arg2: i32) -> (i32, i32) {
    %c0_i32 = arith.constant 0 : i32
    return %arg0, %arg2 : i32, i32
  }
  func.func @transform_1(%arg0: i32, %arg1: i32, %arg2: i32) -> (i32, i32) {
    %c0_i32 = arith.constant 0 : i32
    return %arg2, %arg1 : i32, i32
  }
  func.func @transform_2(%arg0: i32, %arg1: i32, %arg2: i32) -> (i32, i32) {
    %c0_i32 = arith.constant 0 : i32
    %c0_i32_0 = arith.constant 0 : i32
    return %c0_i32, %arg1 : i32, i32
  }
  func.func @transform_3(%arg0: i32, %arg1: i32, %arg2: i32) -> (i32, i32) {
    %c0_i32 = arith.constant 0 : i32
    return %arg0, %arg1 : i32, i32
  }
}

module attributes {stable_mosaic.version = 11 : i64} {
  func.func @_matmul_bias_act_kernel(%arg0: i32, %arg1: i32, %arg2: i32, %arg3: memref<8x512xbf16, #tpu.memory_space<vmem>>, %arg4: memref<512x256xbf16, #tpu.memory_space<vmem>>, %arg5: memref<1x256xf32, #tpu.memory_space<vmem>>, %arg6: memref<8x256xf32, #tpu.memory_space<vmem>>, %arg7: memref<8x256xf32, #tpu.memory_space<vmem>>) attributes {dimension_semantics = [#tpu.dimension_semantics<parallel>, #tpu.dimension_semantics<parallel>, #tpu.dimension_semantics<arbitrary>], iteration_bounds = array<i64: 1, 1, 1>, scalar_prefetch = 0 : i64, scratch_operands = 1 : i64, tpu.core_type = #tpu.core_type<tc>, window_params = [{transform_indices = @transform_0, window_bounds = array<i64: 8, 512>}, {transform_indices = @transform_1, window_bounds = array<i64: 512, 256>}, {transform_indices = @transform_2, window_bounds = array<i64: 1, 256>}, {transform_indices = @transform_3, window_bounds = array<i64: 8, 256>}]} {
    %c0_i32 = arith.constant 0 : i32
    %0 = arith.cmpi eq, %arg2, %c0_i32 : i32
    %1 = arith.extui %0 : i1 to i32
    %c0_i32_0 = arith.constant 0 : i32
    %2 = arith.cmpi ne, %1, %c0_i32_0 : i32
    scf.if %2 {
      %cst_10 = arith.constant 0.000000e+00 : f32
      %12 = vector.broadcast %cst_10 : f32 to vector<8x256xf32>
      %c0_11 = arith.constant 0 : index
      %c0_12 = arith.constant 0 : index
      %13 = vector.load %arg7[%c0_11, %c0_12] : memref<8x256xf32, #tpu.memory_space<vmem>>, vector<8x256xf32>
      tpu.vector_store %arg7[%c0_11, %c0_12], %12 {strides = array<i32>} : memref<8x256xf32, #tpu.memory_space<vmem>>, vector<8x256xf32>,
    } else {
    }
    %c0 = arith.constant 0 : index
    %c0_1 = arith.constant 0 : index
    %3 = vector.load %arg7[%c0, %c0_1] : memref<8x256xf32, #tpu.memory_space<vmem>>, vector<8x256xf32>
    %c0_2 = arith.constant 0 : index
    %c0_3 = arith.constant 0 : index
    %4 = vector.load %arg3[%c0_2, %c0_3] : memref<8x512xbf16, #tpu.memory_space<vmem>>, vector<8x512xbf16>
    %c0_4 = arith.constant 0 : index
    %c0_5 = arith.constant 0 : index
    %5 = vector.load %arg4[%c0_4, %c0_5] : memref<512x256xbf16, #tpu.memory_space<vmem>>, vector<512x256xbf16>
    %cst = arith.constant dense<0.000000e+00> : vector<8x256xf32>
    %6 = tpu.matmul %4, %5, %cst {dimension_numbers = #tpu.dot_dimension_numbers<[1], [0], [0], [1], [0, 0, 1, 1], [], []>} : vector<8x512xbf16>, vector<512x256xbf16>, vector<8x256xf32> -> vector<8x256xf32>
    %7 = arith.addf %3, %6 : vector<8x256xf32>
    %c0_6 = arith.constant 0 : index
    %c0_7 = arith.constant 0 : index
    %8 = vector.load %arg7[%c0_6, %c0_7] : memref<8x256xf32, #tpu.memory_space<vmem>>, vector<8x256xf32>
    tpu.vector_store %arg7[%c0_6, %c0_7], %7 {strides = array<i32>} : memref<8x256xf32, #tpu.memory_space<vmem>>, vector<8x256xf32>,
    %c0_i32_8 = arith.constant 0 : i32
    %9 = arith.cmpi eq, %arg2, %c0_i32_8 : i32
    %10 = arith.extui %9 : i1 to i32
    %c0_i32_9 = arith.constant 0 : i32
    %11 = arith.cmpi ne, %10, %c0_i32_9 : i32
    scf.if %11 {
      %c0_10 = arith.constant 0 : index
      %c0_11 = arith.constant 0 : index
      %12 = vector.load %arg7[%c0_10, %c0_11] : memref<8x256xf32, #tpu.memory_space<vmem>>, vector<8x256xf32>
      %c0_12 = arith.constant 0 : index
      %c0_13 = arith.constant 0 : index
      %13 = vector.load %arg5[%c0_12, %c0_13] : memref<1x256xf32, #tpu.memory_space<vmem>>, vector<1x256xf32>
      %14 = vector.broadcast %13 : vector<1x256xf32> to vector<8x256xf32>
      %15 = arith.addf %12, %14 : vector<8x256xf32>
      %c0_14 = arith.constant 0 : index
      %c0_15 = arith.constant 0 : index
      %16 = vector.load %arg6[%c0_14, %c0_15] : memref<8x256xf32, #tpu.memory_space<vmem>>, vector<8x256xf32>
      tpu.vector_store %arg6[%c0_14, %c0_15], %15 {strides = array<i32>} : memref<8x256xf32, #tpu.memory_space<vmem>>, vector<8x256xf32>,
    } else {
    }
    return
  }
  func.func @transform_0(%arg0: i32, %arg1: i32, %arg2: i32) -> (i32, i32) {
    %c0_i32 = arith.constant 0 : i32
    return %arg0, %arg2 : i32, i32
  }
  func.func @transform_1(%arg0: i32, %arg1: i32, %arg2: i32) -> (i32, i32) {
    %c0_i32 = arith.constant 0 : i32
    return %arg2, %arg1 : i32, i32
  }
  func.func @transform_2(%arg0: i32, %arg1: i32, %arg2: i32) -> (i32, i32) {
    %c0_i32 = arith.constant 0 : i32
    %c0_i32_0 = arith.constant 0 : i32
    return %c0_i32, %arg1 : i32, i32
  }
  func.func @transform_3(%arg0: i32, %arg1: i32, %arg2: i32) -> (i32, i32) {
    %c0_i32 = arith.constant 0 : i32
    return %arg0, %arg1 : i32, i32
  }
}

module attributes {stable_mosaic.version = 11 : i64} {
  func.func @_affine_act_res_kernel(%arg0: i32, %arg1: memref<8x256xf32, #tpu.memory_space<vmem>>, %arg2: memref<1x256xf32, #tpu.memory_space<vmem>>, %arg3: memref<1x256xf32, #tpu.memory_space<vmem>>, %arg4: memref<8x256xf32, #tpu.memory_space<vmem>>) attributes {dimension_semantics = [#tpu.dimension_semantics<parallel>], iteration_bounds = array<i64: 1>, scalar_prefetch = 0 : i64, scratch_operands = 0 : i64, tpu.core_type = #tpu.core_type<tc>, window_params = [{transform_indices = @transform_0, window_bounds = array<i64: 8, 256>}, {pipeline_mode = #tpu.pipeline_mode<synchronous>, transform_indices = @transform_1, window_bounds = array<i64: 1, 256>}, {pipeline_mode = #tpu.pipeline_mode<synchronous>, transform_indices = @transform_2, window_bounds = array<i64: 1, 256>}, {transform_indices = @transform_3, window_bounds = array<i64: 8, 256>}]} {
    %c0 = arith.constant 0 : index
    %c0_0 = arith.constant 0 : index
    %0 = vector.load %arg1[%c0, %c0_0] : memref<8x256xf32, #tpu.memory_space<vmem>>, vector<8x256xf32>
    %c0_1 = arith.constant 0 : index
    %c0_2 = arith.constant 0 : index
    %1 = vector.load %arg2[%c0_1, %c0_2] : memref<1x256xf32, #tpu.memory_space<vmem>>, vector<1x256xf32>
    %2 = vector.broadcast %1 : vector<1x256xf32> to vector<8x256xf32>
    %3 = arith.mulf %0, %2 : vector<8x256xf32>
    %c0_3 = arith.constant 0 : index
    %c0_4 = arith.constant 0 : index
    %4 = vector.load %arg3[%c0_3, %c0_4] : memref<1x256xf32, #tpu.memory_space<vmem>>, vector<1x256xf32>
    %5 = vector.broadcast %4 : vector<1x256xf32> to vector<8x256xf32>
    %6 = arith.addf %3, %5 : vector<8x256xf32>
    %cst = arith.constant 0.000000e+00 : f32
    %7 = vector.broadcast %cst : f32 to vector<8x256xf32>
    %8 = arith.maximumf %6, %7 : vector<8x256xf32>
    %c0_5 = arith.constant 0 : index
    %c0_6 = arith.constant 0 : index
    %9 = vector.load %arg4[%c0_5, %c0_6] : memref<8x256xf32, #tpu.memory_space<vmem>>, vector<8x256xf32>
    tpu.vector_store %arg4[%c0_5, %c0_6], %8 {strides = array<i32>} : memref<8x256xf32, #tpu.memory_space<vmem>>, vector<8x256xf32>,
    return
  }
  func.func @transform_0(%arg0: i32) -> (i32, i32) {
    %c0_i32 = arith.constant 0 : i32
    %c0_i32_0 = arith.constant 0 : i32
    return %arg0, %c0_i32 : i32, i32
  }
  func.func @transform_1(%arg0: i32) -> (i32, i32) {
    %c0_i32 = arith.constant 0 : i32
    %c0_i32_0 = arith.constant 0 : i32
    %c0_i32_1 = arith.constant 0 : i32
    return %c0_i32, %c0_i32_0 : i32, i32
  }
  func.func @transform_2(%arg0: i32) -> (i32, i32) {
    %c0_i32 = arith.constant 0 : i32
    %c0_i32_0 = arith.constant 0 : i32
    %c0_i32_1 = arith.constant 0 : i32
    return %c0_i32, %c0_i32_0 : i32, i32
  }
  func.func @transform_3(%arg0: i32) -> (i32, i32) {
    %c0_i32 = arith.constant 0 : i32
    %c0_i32_0 = arith.constant 0 : i32
    return %arg0, %c0_i32 : i32, i32
  }
}

module attributes {stable_mosaic.version = 11 : i64} {
  func.func @_matmul_bias_act_kernel(%arg0: i32, %arg1: i32, %arg2: i32, %arg3: memref<8x512xbf16, #tpu.memory_space<vmem>>, %arg4: memref<512x256xbf16, #tpu.memory_space<vmem>>, %arg5: memref<1x256xf32, #tpu.memory_space<vmem>>, %arg6: memref<8x256xf32, #tpu.memory_space<vmem>>, %arg7: memref<8x256xf32, #tpu.memory_space<vmem>>) attributes {dimension_semantics = [#tpu.dimension_semantics<parallel>, #tpu.dimension_semantics<parallel>, #tpu.dimension_semantics<arbitrary>], iteration_bounds = array<i64: 1, 2, 2>, scalar_prefetch = 0 : i64, scratch_operands = 1 : i64, tpu.core_type = #tpu.core_type<tc>, window_params = [{transform_indices = @transform_0, window_bounds = array<i64: 8, 512>}, {transform_indices = @transform_1, window_bounds = array<i64: 512, 256>}, {transform_indices = @transform_2, window_bounds = array<i64: 1, 256>}, {transform_indices = @transform_3, window_bounds = array<i64: 8, 256>}]} {
    %c0_i32 = arith.constant 0 : i32
    %0 = arith.cmpi eq, %arg2, %c0_i32 : i32
    %1 = arith.extui %0 : i1 to i32
    %c0_i32_0 = arith.constant 0 : i32
    %2 = arith.cmpi ne, %1, %c0_i32_0 : i32
    scf.if %2 {
      %cst_9 = arith.constant 0.000000e+00 : f32
      %12 = vector.broadcast %cst_9 : f32 to vector<8x256xf32>
      %c0_10 = arith.constant 0 : index
      %c0_11 = arith.constant 0 : index
      %13 = vector.load %arg7[%c0_10, %c0_11] : memref<8x256xf32, #tpu.memory_space<vmem>>, vector<8x256xf32>
      tpu.vector_store %arg7[%c0_10, %c0_11], %12 {strides = array<i32>} : memref<8x256xf32, #tpu.memory_space<vmem>>, vector<8x256xf32>,
    } else {
    }
    %c0 = arith.constant 0 : index
    %c0_1 = arith.constant 0 : index
    %3 = vector.load %arg7[%c0, %c0_1] : memref<8x256xf32, #tpu.memory_space<vmem>>, vector<8x256xf32>
    %c0_2 = arith.constant 0 : index
    %c0_3 = arith.constant 0 : index
    %4 = vector.load %arg3[%c0_2, %c0_3] : memref<8x512xbf16, #tpu.memory_space<vmem>>, vector<8x512xbf16>
    %c0_4 = arith.constant 0 : index
    %c0_5 = arith.constant 0 : index
    %5 = vector.load %arg4[%c0_4, %c0_5] : memref<512x256xbf16, #tpu.memory_space<vmem>>, vector<512x256xbf16>
    %cst = arith.constant dense<0.000000e+00> : vector<8x256xf32>
    %6 = tpu.matmul %4, %5, %cst {dimension_numbers = #tpu.dot_dimension_numbers<[1], [0], [0], [1], [0, 0, 1, 1], [], []>} : vector<8x512xbf16>, vector<512x256xbf16>, vector<8x256xf32> -> vector<8x256xf32>
    %7 = arith.addf %3, %6 : vector<8x256xf32>
    %c0_6 = arith.constant 0 : index
    %c0_7 = arith.constant 0 : index
    %8 = vector.load %arg7[%c0_6, %c0_7] : memref<8x256xf32, #tpu.memory_space<vmem>>, vector<8x256xf32>
    tpu.vector_store %arg7[%c0_6, %c0_7], %7 {strides = array<i32>} : memref<8x256xf32, #tpu.memory_space<vmem>>, vector<8x256xf32>,
    %c1_i32 = arith.constant 1 : i32
    %9 = arith.cmpi eq, %arg2, %c1_i32 : i32
    %10 = arith.extui %9 : i1 to i32
    %c0_i32_8 = arith.constant 0 : i32
    %11 = arith.cmpi ne, %10, %c0_i32_8 : i32
    scf.if %11 {
      %c0_9 = arith.constant 0 : index
      %c0_10 = arith.constant 0 : index
      %12 = vector.load %arg7[%c0_9, %c0_10] : memref<8x256xf32, #tpu.memory_space<vmem>>, vector<8x256xf32>
      %c0_11 = arith.constant 0 : index
      %c0_12 = arith.constant 0 : index
      %13 = vector.load %arg5[%c0_11, %c0_12] : memref<1x256xf32, #tpu.memory_space<vmem>>, vector<1x256xf32>
      %14 = vector.broadcast %13 : vector<1x256xf32> to vector<8x256xf32>
      %15 = arith.addf %12, %14 : vector<8x256xf32>
      %c0_13 = arith.constant 0 : index
      %c0_14 = arith.constant 0 : index
      %16 = vector.load %arg6[%c0_13, %c0_14] : memref<8x256xf32, #tpu.memory_space<vmem>>, vector<8x256xf32>
      tpu.vector_store %arg6[%c0_13, %c0_14], %15 {strides = array<i32>} : memref<8x256xf32, #tpu.memory_space<vmem>>, vector<8x256xf32>,
    } else {
    }
    return
  }
  func.func @transform_0(%arg0: i32, %arg1: i32, %arg2: i32) -> (i32, i32) {
    %c0_i32 = arith.constant 0 : i32
    return %arg0, %arg2 : i32, i32
  }
  func.func @transform_1(%arg0: i32, %arg1: i32, %arg2: i32) -> (i32, i32) {
    %c0_i32 = arith.constant 0 : i32
    return %arg2, %arg1 : i32, i32
  }
  func.func @transform_2(%arg0: i32, %arg1: i32, %arg2: i32) -> (i32, i32) {
    %c0_i32 = arith.constant 0 : i32
    %c0_i32_0 = arith.constant 0 : i32
    return %c0_i32, %arg1 : i32, i32
  }
  func.func @transform_3(%arg0: i32, %arg1: i32, %arg2: i32) -> (i32, i32) {
    %c0_i32 = arith.constant 0 : i32
    return %arg0, %arg1 : i32, i32
  }
}

module attributes {stable_mosaic.version = 11 : i64} {
  func.func @_affine_act_res_kernel(%arg0: i32, %arg1: memref<8x512xf32, #tpu.memory_space<vmem>>, %arg2: memref<1x512xf32, #tpu.memory_space<vmem>>, %arg3: memref<1x512xf32, #tpu.memory_space<vmem>>, %arg4: memref<8x512xf32, #tpu.memory_space<vmem>>) attributes {dimension_semantics = [#tpu.dimension_semantics<parallel>], iteration_bounds = array<i64: 1>, scalar_prefetch = 0 : i64, scratch_operands = 0 : i64, tpu.core_type = #tpu.core_type<tc>, window_params = [{transform_indices = @transform_0, window_bounds = array<i64: 8, 512>}, {pipeline_mode = #tpu.pipeline_mode<synchronous>, transform_indices = @transform_1, window_bounds = array<i64: 1, 512>}, {pipeline_mode = #tpu.pipeline_mode<synchronous>, transform_indices = @transform_2, window_bounds = array<i64: 1, 512>}, {transform_indices = @transform_3, window_bounds = array<i64: 8, 512>}]} {
    %c0 = arith.constant 0 : index
    %c0_0 = arith.constant 0 : index
    %0 = vector.load %arg1[%c0, %c0_0] : memref<8x512xf32, #tpu.memory_space<vmem>>, vector<8x512xf32>
    %c0_1 = arith.constant 0 : index
    %c0_2 = arith.constant 0 : index
    %1 = vector.load %arg2[%c0_1, %c0_2] : memref<1x512xf32, #tpu.memory_space<vmem>>, vector<1x512xf32>
    %2 = vector.broadcast %1 : vector<1x512xf32> to vector<8x512xf32>
    %3 = arith.mulf %0, %2 : vector<8x512xf32>
    %c0_3 = arith.constant 0 : index
    %c0_4 = arith.constant 0 : index
    %4 = vector.load %arg3[%c0_3, %c0_4] : memref<1x512xf32, #tpu.memory_space<vmem>>, vector<1x512xf32>
    %5 = vector.broadcast %4 : vector<1x512xf32> to vector<8x512xf32>
    %6 = arith.addf %3, %5 : vector<8x512xf32>
    %cst = arith.constant 0.000000e+00 : f32
    %7 = vector.broadcast %cst : f32 to vector<8x512xf32>
    %8 = arith.maximumf %6, %7 : vector<8x512xf32>
    %c0_5 = arith.constant 0 : index
    %c0_6 = arith.constant 0 : index
    %9 = vector.load %arg4[%c0_5, %c0_6] : memref<8x512xf32, #tpu.memory_space<vmem>>, vector<8x512xf32>
    tpu.vector_store %arg4[%c0_5, %c0_6], %8 {strides = array<i32>} : memref<8x512xf32, #tpu.memory_space<vmem>>, vector<8x512xf32>,
    return
  }
  func.func @transform_0(%arg0: i32) -> (i32, i32) {
    %c0_i32 = arith.constant 0 : i32
    %c0_i32_0 = arith.constant 0 : i32
    return %arg0, %c0_i32 : i32, i32
  }
  func.func @transform_1(%arg0: i32) -> (i32, i32) {
    %c0_i32 = arith.constant 0 : i32
    %c0_i32_0 = arith.constant 0 : i32
    %c0_i32_1 = arith.constant 0 : i32
    return %c0_i32, %c0_i32_0 : i32, i32
  }
  func.func @transform_2(%arg0: i32) -> (i32, i32) {
    %c0_i32 = arith.constant 0 : i32
    %c0_i32_0 = arith.constant 0 : i32
    %c0_i32_1 = arith.constant 0 : i32
    return %c0_i32, %c0_i32_0 : i32, i32
  }
  func.func @transform_3(%arg0: i32) -> (i32, i32) {
    %c0_i32 = arith.constant 0 : i32
    %c0_i32_0 = arith.constant 0 : i32
    return %arg0, %c0_i32 : i32, i32
  }
}

module attributes {stable_mosaic.version = 11 : i64} {
  func.func @_matmul_bias_act_kernel(%arg0: i32, %arg1: i32, %arg2: i32, %arg3: memref<8x512xbf16, #tpu.memory_space<vmem>>, %arg4: memref<512x256xbf16, #tpu.memory_space<vmem>>, %arg5: memref<1x256xf32, #tpu.memory_space<vmem>>, %arg6: memref<8x256xf32, #tpu.memory_space<vmem>>, %arg7: memref<8x256xf32, #tpu.memory_space<vmem>>) attributes {dimension_semantics = [#tpu.dimension_semantics<parallel>, #tpu.dimension_semantics<parallel>, #tpu.dimension_semantics<arbitrary>], iteration_bounds = array<i64: 1, 2, 9>, scalar_prefetch = 0 : i64, scratch_operands = 1 : i64, tpu.core_type = #tpu.core_type<tc>, window_params = [{transform_indices = @transform_0, window_bounds = array<i64: 8, 512>}, {transform_indices = @transform_1, window_bounds = array<i64: 512, 256>}, {transform_indices = @transform_2, window_bounds = array<i64: 1, 256>}, {transform_indices = @transform_3, window_bounds = array<i64: 8, 256>}]} {
    %c0_i32 = arith.constant 0 : i32
    %0 = arith.cmpi eq, %arg2, %c0_i32 : i32
    %1 = arith.extui %0 : i1 to i32
    %c0_i32_0 = arith.constant 0 : i32
    %2 = arith.cmpi ne, %1, %c0_i32_0 : i32
    scf.if %2 {
      %cst_9 = arith.constant 0.000000e+00 : f32
      %12 = vector.broadcast %cst_9 : f32 to vector<8x256xf32>
      %c0_10 = arith.constant 0 : index
      %c0_11 = arith.constant 0 : index
      %13 = vector.load %arg7[%c0_10, %c0_11] : memref<8x256xf32, #tpu.memory_space<vmem>>, vector<8x256xf32>
      tpu.vector_store %arg7[%c0_10, %c0_11], %12 {strides = array<i32>} : memref<8x256xf32, #tpu.memory_space<vmem>>, vector<8x256xf32>,
    } else {
    }
    %c0 = arith.constant 0 : index
    %c0_1 = arith.constant 0 : index
    %3 = vector.load %arg7[%c0, %c0_1] : memref<8x256xf32, #tpu.memory_space<vmem>>, vector<8x256xf32>
    %c0_2 = arith.constant 0 : index
    %c0_3 = arith.constant 0 : index
    %4 = vector.load %arg3[%c0_2, %c0_3] : memref<8x512xbf16, #tpu.memory_space<vmem>>, vector<8x512xbf16>
    %c0_4 = arith.constant 0 : index
    %c0_5 = arith.constant 0 : index
    %5 = vector.load %arg4[%c0_4, %c0_5] : memref<512x256xbf16, #tpu.memory_space<vmem>>, vector<512x256xbf16>
    %cst = arith.constant dense<0.000000e+00> : vector<8x256xf32>
    %6 = tpu.matmul %4, %5, %cst {dimension_numbers = #tpu.dot_dimension_numbers<[1], [0], [0], [1], [0, 0, 1, 1], [], []>} : vector<8x512xbf16>, vector<512x256xbf16>, vector<8x256xf32> -> vector<8x256xf32>
    %7 = arith.addf %3, %6 : vector<8x256xf32>
    %c0_6 = arith.constant 0 : index
    %c0_7 = arith.constant 0 : index
    %8 = vector.load %arg7[%c0_6, %c0_7] : memref<8x256xf32, #tpu.memory_space<vmem>>, vector<8x256xf32>
    tpu.vector_store %arg7[%c0_6, %c0_7], %7 {strides = array<i32>} : memref<8x256xf32, #tpu.memory_space<vmem>>, vector<8x256xf32>,
    %c8_i32 = arith.constant 8 : i32
    %9 = arith.cmpi eq, %arg2, %c8_i32 : i32
    %10 = arith.extui %9 : i1 to i32
    %c0_i32_8 = arith.constant 0 : i32
    %11 = arith.cmpi ne, %10, %c0_i32_8 : i32
    scf.if %11 {
      %c0_9 = arith.constant 0 : index
      %c0_10 = arith.constant 0 : index
      %12 = vector.load %arg7[%c0_9, %c0_10] : memref<8x256xf32, #tpu.memory_space<vmem>>, vector<8x256xf32>
      %c0_11 = arith.constant 0 : index
      %c0_12 = arith.constant 0 : index
      %13 = vector.load %arg5[%c0_11, %c0_12] : memref<1x256xf32, #tpu.memory_space<vmem>>, vector<1x256xf32>
      %14 = vector.broadcast %13 : vector<1x256xf32> to vector<8x256xf32>
      %15 = arith.addf %12, %14 : vector<8x256xf32>
      %c0_13 = arith.constant 0 : index
      %c0_14 = arith.constant 0 : index
      %16 = vector.load %arg6[%c0_13, %c0_14] : memref<8x256xf32, #tpu.memory_space<vmem>>, vector<8x256xf32>
      tpu.vector_store %arg6[%c0_13, %c0_14], %15 {strides = array<i32>} : memref<8x256xf32, #tpu.memory_space<vmem>>, vector<8x256xf32>,
    } else {
    }
    return
  }
  func.func @transform_0(%arg0: i32, %arg1: i32, %arg2: i32) -> (i32, i32) {
    %c0_i32 = arith.constant 0 : i32
    return %arg0, %arg2 : i32, i32
  }
  func.func @transform_1(%arg0: i32, %arg1: i32, %arg2: i32) -> (i32, i32) {
    %c0_i32 = arith.constant 0 : i32
    return %arg2, %arg1 : i32, i32
  }
  func.func @transform_2(%arg0: i32, %arg1: i32, %arg2: i32) -> (i32, i32) {
    %c0_i32 = arith.constant 0 : i32
    %c0_i32_0 = arith.constant 0 : i32
    return %c0_i32, %arg1 : i32, i32
  }
  func.func @transform_3(%arg0: i32, %arg1: i32, %arg2: i32) -> (i32, i32) {
    %c0_i32 = arith.constant 0 : i32
    return %arg0, %arg1 : i32, i32
  }
}

module attributes {stable_mosaic.version = 11 : i64} {
  func.func @_affine_act_res_kernel(%arg0: i32, %arg1: memref<8x512xf32, #tpu.memory_space<vmem>>, %arg2: memref<1x512xf32, #tpu.memory_space<vmem>>, %arg3: memref<1x512xf32, #tpu.memory_space<vmem>>, %arg4: memref<8x512xf32, #tpu.memory_space<vmem>>, %arg5: memref<8x512xf32, #tpu.memory_space<vmem>>) attributes {dimension_semantics = [#tpu.dimension_semantics<parallel>], iteration_bounds = array<i64: 1>, scalar_prefetch = 0 : i64, scratch_operands = 0 : i64, tpu.core_type = #tpu.core_type<tc>, window_params = [{transform_indices = @transform_0, window_bounds = array<i64: 8, 512>}, {pipeline_mode = #tpu.pipeline_mode<synchronous>, transform_indices = @transform_1, window_bounds = array<i64: 1, 512>}, {pipeline_mode = #tpu.pipeline_mode<synchronous>, transform_indices = @transform_2, window_bounds = array<i64: 1, 512>}, {transform_indices = @transform_3, window_bounds = array<i64: 8, 512>}, {transform_indices = @transform_4, window_bounds = array<i64: 8, 512>}]} {
    %c0 = arith.constant 0 : index
    %c0_0 = arith.constant 0 : index
    %0 = vector.load %arg1[%c0, %c0_0] : memref<8x512xf32, #tpu.memory_space<vmem>>, vector<8x512xf32>
    %c0_1 = arith.constant 0 : index
    %c0_2 = arith.constant 0 : index
    %1 = vector.load %arg2[%c0_1, %c0_2] : memref<1x512xf32, #tpu.memory_space<vmem>>, vector<1x512xf32>
    %2 = vector.broadcast %1 : vector<1x512xf32> to vector<8x512xf32>
    %3 = arith.mulf %0, %2 : vector<8x512xf32>
    %c0_3 = arith.constant 0 : index
    %c0_4 = arith.constant 0 : index
    %4 = vector.load %arg3[%c0_3, %c0_4] : memref<1x512xf32, #tpu.memory_space<vmem>>, vector<1x512xf32>
    %5 = vector.broadcast %4 : vector<1x512xf32> to vector<8x512xf32>
    %6 = arith.addf %3, %5 : vector<8x512xf32>
    %c0_5 = arith.constant 0 : index
    %c0_6 = arith.constant 0 : index
    %7 = vector.load %arg4[%c0_5, %c0_6] : memref<8x512xf32, #tpu.memory_space<vmem>>, vector<8x512xf32>
    %8 = arith.addf %6, %7 : vector<8x512xf32>
    %c0_7 = arith.constant 0 : index
    %c0_8 = arith.constant 0 : index
    %9 = vector.load %arg5[%c0_7, %c0_8] : memref<8x512xf32, #tpu.memory_space<vmem>>, vector<8x512xf32>
    tpu.vector_store %arg5[%c0_7, %c0_8], %8 {strides = array<i32>} : memref<8x512xf32, #tpu.memory_space<vmem>>, vector<8x512xf32>,
    return
  }
  func.func @transform_0(%arg0: i32) -> (i32, i32) {
    %c0_i32 = arith.constant 0 : i32
    %c0_i32_0 = arith.constant 0 : i32
    return %arg0, %c0_i32 : i32, i32
  }
  func.func @transform_1(%arg0: i32) -> (i32, i32) {
    %c0_i32 = arith.constant 0 : i32
    %c0_i32_0 = arith.constant 0 : i32
    %c0_i32_1 = arith.constant 0 : i32
    return %c0_i32, %c0_i32_0 : i32, i32
  }
  func.func @transform_2(%arg0: i32) -> (i32, i32) {
    %c0_i32 = arith.constant 0 : i32
    %c0_i32_0 = arith.constant 0 : i32
    %c0_i32_1 = arith.constant 0 : i32
    return %c0_i32, %c0_i32_0 : i32, i32
  }
  func.func @transform_3(%arg0: i32) -> (i32, i32) {
    %c0_i32 = arith.constant 0 : i32
    %c0_i32_0 = arith.constant 0 : i32
    return %arg0, %c0_i32 : i32, i32
  }
  func.func @transform_4(%arg0: i32) -> (i32, i32) {
    %c0_i32 = arith.constant 0 : i32
    %c0_i32_0 = arith.constant 0 : i32
    return %arg0, %c0_i32 : i32, i32
  }
}

module attributes {stable_mosaic.version = 11 : i64} {
  func.func @_affine_act_res_kernel(%arg0: i32, %arg1: memref<8x512xf32, #tpu.memory_space<vmem>>, %arg2: memref<1x512xf32, #tpu.memory_space<vmem>>, %arg3: memref<1x512xf32, #tpu.memory_space<vmem>>, %arg4: memref<8x512xf32, #tpu.memory_space<vmem>>, %arg5: memref<8x512xf32, #tpu.memory_space<vmem>>, %arg6: memref<8x512xf32, #tpu.memory_space<vmem>>) attributes {dimension_semantics = [#tpu.dimension_semantics<parallel>], iteration_bounds = array<i64: 1>, scalar_prefetch = 0 : i64, scratch_operands = 0 : i64, tpu.core_type = #tpu.core_type<tc>, window_params = [{transform_indices = @transform_0, window_bounds = array<i64: 8, 512>}, {pipeline_mode = #tpu.pipeline_mode<synchronous>, transform_indices = @transform_1, window_bounds = array<i64: 1, 512>}, {pipeline_mode = #tpu.pipeline_mode<synchronous>, transform_indices = @transform_2, window_bounds = array<i64: 1, 512>}, {transform_indices = @transform_3, window_bounds = array<i64: 8, 512>}, {transform_indices = @transform_4, window_bounds = array<i64: 8, 512>}, {transform_indices = @transform_5, window_bounds = array<i64: 8, 512>}]} {
    %c0 = arith.constant 0 : index
    %c0_0 = arith.constant 0 : index
    %0 = vector.load %arg1[%c0, %c0_0] : memref<8x512xf32, #tpu.memory_space<vmem>>, vector<8x512xf32>
    %c0_1 = arith.constant 0 : index
    %c0_2 = arith.constant 0 : index
    %1 = vector.load %arg2[%c0_1, %c0_2] : memref<1x512xf32, #tpu.memory_space<vmem>>, vector<1x512xf32>
    %2 = vector.broadcast %1 : vector<1x512xf32> to vector<8x512xf32>
    %3 = arith.mulf %0, %2 : vector<8x512xf32>
    %c0_3 = arith.constant 0 : index
    %c0_4 = arith.constant 0 : index
    %4 = vector.load %arg3[%c0_3, %c0_4] : memref<1x512xf32, #tpu.memory_space<vmem>>, vector<1x512xf32>
    %5 = vector.broadcast %4 : vector<1x512xf32> to vector<8x512xf32>
    %6 = arith.addf %3, %5 : vector<8x512xf32>
    %c0_5 = arith.constant 0 : index
    %c0_6 = arith.constant 0 : index
    %7 = vector.load %arg4[%c0_5, %c0_6] : memref<8x512xf32, #tpu.memory_space<vmem>>, vector<8x512xf32>
    %8 = arith.addf %6, %7 : vector<8x512xf32>
    %c0_7 = arith.constant 0 : index
    %c0_8 = arith.constant 0 : index
    %9 = vector.load %arg5[%c0_7, %c0_8] : memref<8x512xf32, #tpu.memory_space<vmem>>, vector<8x512xf32>
    %10 = arith.addf %8, %9 : vector<8x512xf32>
    %c0_9 = arith.constant 0 : index
    %c0_10 = arith.constant 0 : index
    %11 = vector.load %arg6[%c0_9, %c0_10] : memref<8x512xf32, #tpu.memory_space<vmem>>, vector<8x512xf32>
    tpu.vector_store %arg6[%c0_9, %c0_10], %10 {strides = array<i32>} : memref<8x512xf32, #tpu.memory_space<vmem>>, vector<8x512xf32>,
    return
  }
  func.func @transform_0(%arg0: i32) -> (i32, i32) {
    %c0_i32 = arith.constant 0 : i32
    %c0_i32_0 = arith.constant 0 : i32
    return %arg0, %c0_i32 : i32, i32
  }
  func.func @transform_1(%arg0: i32) -> (i32, i32) {
    %c0_i32 = arith.constant 0 : i32
    %c0_i32_0 = arith.constant 0 : i32
    %c0_i32_1 = arith.constant 0 : i32
    return %c0_i32, %c0_i32_0 : i32, i32
  }
  func.func @transform_2(%arg0: i32) -> (i32, i32) {
    %c0_i32 = arith.constant 0 : i32
    %c0_i32_0 = arith.constant 0 : i32
    %c0_i32_1 = arith.constant 0 : i32
    return %c0_i32, %c0_i32_0 : i32, i32
  }
  func.func @transform_3(%arg0: i32) -> (i32, i32) {
    %c0_i32 = arith.constant 0 : i32
    %c0_i32_0 = arith.constant 0 : i32
    return %arg0, %c0_i32 : i32, i32
  }
  func.func @transform_4(%arg0: i32) -> (i32, i32) {
    %c0_i32 = arith.constant 0 : i32
    %c0_i32_0 = arith.constant 0 : i32
    return %arg0, %c0_i32 : i32, i32
  }
  func.func @transform_5(%arg0: i32) -> (i32, i32) {
    %c0_i32 = arith.constant 0 : i32
    %c0_i32_0 = arith.constant 0 : i32
    return %arg0, %c0_i32 : i32, i32
  }
}

module attributes {stable_mosaic.version = 11 : i64} {
  func.func @_matmul_bias_act_kernel(%arg0: i32, %arg1: i32, %arg2: i32, %arg3: memref<8x512xbf16, #tpu.memory_space<vmem>>, %arg4: memref<512x256xbf16, #tpu.memory_space<vmem>>, %arg5: memref<1x256xf32, #tpu.memory_space<vmem>>, %arg6: memref<8x256xf32, #tpu.memory_space<vmem>>, %arg7: memref<8x256xf32, #tpu.memory_space<vmem>>) attributes {dimension_semantics = [#tpu.dimension_semantics<parallel>, #tpu.dimension_semantics<parallel>, #tpu.dimension_semantics<arbitrary>], iteration_bounds = array<i64: 1, 4, 1>, scalar_prefetch = 0 : i64, scratch_operands = 1 : i64, tpu.core_type = #tpu.core_type<tc>, window_params = [{transform_indices = @transform_0, window_bounds = array<i64: 8, 512>}, {transform_indices = @transform_1, window_bounds = array<i64: 512, 256>}, {transform_indices = @transform_2, window_bounds = array<i64: 1, 256>}, {transform_indices = @transform_3, window_bounds = array<i64: 8, 256>}]} {
    %c0_i32 = arith.constant 0 : i32
    %0 = arith.cmpi eq, %arg2, %c0_i32 : i32
    %1 = arith.extui %0 : i1 to i32
    %c0_i32_0 = arith.constant 0 : i32
    %2 = arith.cmpi ne, %1, %c0_i32_0 : i32
    scf.if %2 {
      %cst_10 = arith.constant 0.000000e+00 : f32
      %12 = vector.broadcast %cst_10 : f32 to vector<8x256xf32>
      %c0_11 = arith.constant 0 : index
      %c0_12 = arith.constant 0 : index
      %13 = vector.load %arg7[%c0_11, %c0_12] : memref<8x256xf32, #tpu.memory_space<vmem>>, vector<8x256xf32>
      tpu.vector_store %arg7[%c0_11, %c0_12], %12 {strides = array<i32>} : memref<8x256xf32, #tpu.memory_space<vmem>>, vector<8x256xf32>,
    } else {
    }
    %c0 = arith.constant 0 : index
    %c0_1 = arith.constant 0 : index
    %3 = vector.load %arg7[%c0, %c0_1] : memref<8x256xf32, #tpu.memory_space<vmem>>, vector<8x256xf32>
    %c0_2 = arith.constant 0 : index
    %c0_3 = arith.constant 0 : index
    %4 = vector.load %arg3[%c0_2, %c0_3] : memref<8x512xbf16, #tpu.memory_space<vmem>>, vector<8x512xbf16>
    %c0_4 = arith.constant 0 : index
    %c0_5 = arith.constant 0 : index
    %5 = vector.load %arg4[%c0_4, %c0_5] : memref<512x256xbf16, #tpu.memory_space<vmem>>, vector<512x256xbf16>
    %cst = arith.constant dense<0.000000e+00> : vector<8x256xf32>
    %6 = tpu.matmul %4, %5, %cst {dimension_numbers = #tpu.dot_dimension_numbers<[1], [0], [0], [1], [0, 0, 1, 1], [], []>} : vector<8x512xbf16>, vector<512x256xbf16>, vector<8x256xf32> -> vector<8x256xf32>
    %7 = arith.addf %3, %6 : vector<8x256xf32>
    %c0_6 = arith.constant 0 : index
    %c0_7 = arith.constant 0 : index
    %8 = vector.load %arg7[%c0_6, %c0_7] : memref<8x256xf32, #tpu.memory_space<vmem>>, vector<8x256xf32>
    tpu.vector_store %arg7[%c0_6, %c0_7], %7 {strides = array<i32>} : memref<8x256xf32, #tpu.memory_space<vmem>>, vector<8x256xf32>,
    %c0_i32_8 = arith.constant 0 : i32
    %9 = arith.cmpi eq, %arg2, %c0_i32_8 : i32
    %10 = arith.extui %9 : i1 to i32
    %c0_i32_9 = arith.constant 0 : i32
    %11 = arith.cmpi ne, %10, %c0_i32_9 : i32
    scf.if %11 {
      %c0_10 = arith.constant 0 : index
      %c0_11 = arith.constant 0 : index
      %12 = vector.load %arg7[%c0_10, %c0_11] : memref<8x256xf32, #tpu.memory_space<vmem>>, vector<8x256xf32>
      %c0_12 = arith.constant 0 : index
      %c0_13 = arith.constant 0 : index
      %13 = vector.load %arg5[%c0_12, %c0_13] : memref<1x256xf32, #tpu.memory_space<vmem>>, vector<1x256xf32>
      %14 = vector.broadcast %13 : vector<1x256xf32> to vector<8x256xf32>
      %15 = arith.addf %12, %14 : vector<8x256xf32>
      %c0_14 = arith.constant 0 : index
      %c0_15 = arith.constant 0 : index
      %16 = vector.load %arg6[%c0_14, %c0_15] : memref<8x256xf32, #tpu.memory_space<vmem>>, vector<8x256xf32>
      tpu.vector_store %arg6[%c0_14, %c0_15], %15 {strides = array<i32>} : memref<8x256xf32, #tpu.memory_space<vmem>>, vector<8x256xf32>,
    } else {
    }
    return
  }
  func.func @transform_0(%arg0: i32, %arg1: i32, %arg2: i32) -> (i32, i32) {
    %c0_i32 = arith.constant 0 : i32
    return %arg0, %arg2 : i32, i32
  }
  func.func @transform_1(%arg0: i32, %arg1: i32, %arg2: i32) -> (i32, i32) {
    %c0_i32 = arith.constant 0 : i32
    return %arg2, %arg1 : i32, i32
  }
  func.func @transform_2(%arg0: i32, %arg1: i32, %arg2: i32) -> (i32, i32) {
    %c0_i32 = arith.constant 0 : i32
    %c0_i32_0 = arith.constant 0 : i32
    return %c0_i32, %arg1 : i32, i32
  }
  func.func @transform_3(%arg0: i32, %arg1: i32, %arg2: i32) -> (i32, i32) {
    %c0_i32 = arith.constant 0 : i32
    return %arg0, %arg1 : i32, i32
  }
}

module attributes {stable_mosaic.version = 11 : i64} {
  func.func @_affine_act_res_kernel(%arg0: i32, %arg1: memref<8x256xf32, #tpu.memory_space<vmem>>, %arg2: memref<1x256xf32, #tpu.memory_space<vmem>>, %arg3: memref<1x256xf32, #tpu.memory_space<vmem>>, %arg4: memref<8x256xf32, #tpu.memory_space<vmem>>, %arg5: memref<8x256xf32, #tpu.memory_space<vmem>>) attributes {dimension_semantics = [#tpu.dimension_semantics<parallel>], iteration_bounds = array<i64: 1>, scalar_prefetch = 0 : i64, scratch_operands = 0 : i64, tpu.core_type = #tpu.core_type<tc>, window_params = [{transform_indices = @transform_0, window_bounds = array<i64: 8, 256>}, {pipeline_mode = #tpu.pipeline_mode<synchronous>, transform_indices = @transform_1, window_bounds = array<i64: 1, 256>}, {pipeline_mode = #tpu.pipeline_mode<synchronous>, transform_indices = @transform_2, window_bounds = array<i64: 1, 256>}, {transform_indices = @transform_3, window_bounds = array<i64: 8, 256>}, {transform_indices = @transform_4, window_bounds = array<i64: 8, 256>}]} {
    %c0 = arith.constant 0 : index
    %c0_0 = arith.constant 0 : index
    %0 = vector.load %arg1[%c0, %c0_0] : memref<8x256xf32, #tpu.memory_space<vmem>>, vector<8x256xf32>
    %c0_1 = arith.constant 0 : index
    %c0_2 = arith.constant 0 : index
    %1 = vector.load %arg2[%c0_1, %c0_2] : memref<1x256xf32, #tpu.memory_space<vmem>>, vector<1x256xf32>
    %2 = vector.broadcast %1 : vector<1x256xf32> to vector<8x256xf32>
    %3 = arith.mulf %0, %2 : vector<8x256xf32>
    %c0_3 = arith.constant 0 : index
    %c0_4 = arith.constant 0 : index
    %4 = vector.load %arg3[%c0_3, %c0_4] : memref<1x256xf32, #tpu.memory_space<vmem>>, vector<1x256xf32>
    %5 = vector.broadcast %4 : vector<1x256xf32> to vector<8x256xf32>
    %6 = arith.addf %3, %5 : vector<8x256xf32>
    %cst = arith.constant 0.000000e+00 : f32
    %7 = vector.broadcast %cst : f32 to vector<8x256xf32>
    %8 = arith.maximumf %6, %7 : vector<8x256xf32>
    %c0_5 = arith.constant 0 : index
    %c0_6 = arith.constant 0 : index
    %9 = vector.load %arg4[%c0_5, %c0_6] : memref<8x256xf32, #tpu.memory_space<vmem>>, vector<8x256xf32>
    %10 = arith.addf %8, %9 : vector<8x256xf32>
    %c0_7 = arith.constant 0 : index
    %c0_8 = arith.constant 0 : index
    %11 = vector.load %arg5[%c0_7, %c0_8] : memref<8x256xf32, #tpu.memory_space<vmem>>, vector<8x256xf32>
    tpu.vector_store %arg5[%c0_7, %c0_8], %10 {strides = array<i32>} : memref<8x256xf32, #tpu.memory_space<vmem>>, vector<8x256xf32>,
    return
  }
  func.func @transform_0(%arg0: i32) -> (i32, i32) {
    %c0_i32 = arith.constant 0 : i32
    %c0_i32_0 = arith.constant 0 : i32
    return %arg0, %c0_i32 : i32, i32
  }
  func.func @transform_1(%arg0: i32) -> (i32, i32) {
    %c0_i32 = arith.constant 0 : i32
    %c0_i32_0 = arith.constant 0 : i32
    %c0_i32_1 = arith.constant 0 : i32
    return %c0_i32, %c0_i32_0 : i32, i32
  }
  func.func @transform_2(%arg0: i32) -> (i32, i32) {
    %c0_i32 = arith.constant 0 : i32
    %c0_i32_0 = arith.constant 0 : i32
    %c0_i32_1 = arith.constant 0 : i32
    return %c0_i32, %c0_i32_0 : i32, i32
  }
  func.func @transform_3(%arg0: i32) -> (i32, i32) {
    %c0_i32 = arith.constant 0 : i32
    %c0_i32_0 = arith.constant 0 : i32
    return %arg0, %c0_i32 : i32, i32
  }
  func.func @transform_4(%arg0: i32) -> (i32, i32) {
    %c0_i32 = arith.constant 0 : i32
    %c0_i32_0 = arith.constant 0 : i32
    return %arg0, %c0_i32 : i32, i32
  }
}

module attributes {stable_mosaic.version = 11 : i64} {
  func.func @_matmul_bias_act_kernel(%arg0: i32, %arg1: i32, %arg2: i32, %arg3: memref<8x256xbf16, #tpu.memory_space<vmem>>, %arg4: memref<256x256xbf16, #tpu.memory_space<vmem>>, %arg5: memref<1x256xf32, #tpu.memory_space<vmem>>, %arg6: memref<8x256xf32, #tpu.memory_space<vmem>>, %arg7: memref<8x256xf32, #tpu.memory_space<vmem>>) attributes {dimension_semantics = [#tpu.dimension_semantics<parallel>, #tpu.dimension_semantics<parallel>, #tpu.dimension_semantics<arbitrary>], iteration_bounds = array<i64: 1, 2, 1>, scalar_prefetch = 0 : i64, scratch_operands = 1 : i64, tpu.core_type = #tpu.core_type<tc>, window_params = [{transform_indices = @transform_0, window_bounds = array<i64: 8, 256>}, {transform_indices = @transform_1, window_bounds = array<i64: 256, 256>}, {transform_indices = @transform_2, window_bounds = array<i64: 1, 256>}, {transform_indices = @transform_3, window_bounds = array<i64: 8, 256>}]} {
    %c0_i32 = arith.constant 0 : i32
    %0 = arith.cmpi eq, %arg2, %c0_i32 : i32
    %1 = arith.extui %0 : i1 to i32
    %c0_i32_0 = arith.constant 0 : i32
    %2 = arith.cmpi ne, %1, %c0_i32_0 : i32
    scf.if %2 {
      %cst_10 = arith.constant 0.000000e+00 : f32
      %12 = vector.broadcast %cst_10 : f32 to vector<8x256xf32>
      %c0_11 = arith.constant 0 : index
      %c0_12 = arith.constant 0 : index
      %13 = vector.load %arg7[%c0_11, %c0_12] : memref<8x256xf32, #tpu.memory_space<vmem>>, vector<8x256xf32>
      tpu.vector_store %arg7[%c0_11, %c0_12], %12 {strides = array<i32>} : memref<8x256xf32, #tpu.memory_space<vmem>>, vector<8x256xf32>,
    } else {
    }
    %c0 = arith.constant 0 : index
    %c0_1 = arith.constant 0 : index
    %3 = vector.load %arg7[%c0, %c0_1] : memref<8x256xf32, #tpu.memory_space<vmem>>, vector<8x256xf32>
    %c0_2 = arith.constant 0 : index
    %c0_3 = arith.constant 0 : index
    %4 = vector.load %arg3[%c0_2, %c0_3] : memref<8x256xbf16, #tpu.memory_space<vmem>>, vector<8x256xbf16>
    %c0_4 = arith.constant 0 : index
    %c0_5 = arith.constant 0 : index
    %5 = vector.load %arg4[%c0_4, %c0_5] : memref<256x256xbf16, #tpu.memory_space<vmem>>, vector<256x256xbf16>
    %cst = arith.constant dense<0.000000e+00> : vector<8x256xf32>
    %6 = tpu.matmul %4, %5, %cst {dimension_numbers = #tpu.dot_dimension_numbers<[1], [0], [0], [1], [0, 0, 1, 1], [], []>} : vector<8x256xbf16>, vector<256x256xbf16>, vector<8x256xf32> -> vector<8x256xf32>
    %7 = arith.addf %3, %6 : vector<8x256xf32>
    %c0_6 = arith.constant 0 : index
    %c0_7 = arith.constant 0 : index
    %8 = vector.load %arg7[%c0_6, %c0_7] : memref<8x256xf32, #tpu.memory_space<vmem>>, vector<8x256xf32>
    tpu.vector_store %arg7[%c0_6, %c0_7], %7 {strides = array<i32>} : memref<8x256xf32, #tpu.memory_space<vmem>>, vector<8x256xf32>,
    %c0_i32_8 = arith.constant 0 : i32
    %9 = arith.cmpi eq, %arg2, %c0_i32_8 : i32
    %10 = arith.extui %9 : i1 to i32
    %c0_i32_9 = arith.constant 0 : i32
    %11 = arith.cmpi ne, %10, %c0_i32_9 : i32
    scf.if %11 {
      %c0_10 = arith.constant 0 : index
      %c0_11 = arith.constant 0 : index
      %12 = vector.load %arg7[%c0_10, %c0_11] : memref<8x256xf32, #tpu.memory_space<vmem>>, vector<8x256xf32>
      %c0_12 = arith.constant 0 : index
      %c0_13 = arith.constant 0 : index
      %13 = vector.load %arg5[%c0_12, %c0_13] : memref<1x256xf32, #tpu.memory_space<vmem>>, vector<1x256xf32>
      %14 = vector.broadcast %13 : vector<1x256xf32> to vector<8x256xf32>
      %15 = arith.addf %12, %14 : vector<8x256xf32>
      %c0_14 = arith.constant 0 : index
      %c0_15 = arith.constant 0 : index
      %16 = vector.load %arg6[%c0_14, %c0_15] : memref<8x256xf32, #tpu.memory_space<vmem>>, vector<8x256xf32>
      tpu.vector_store %arg6[%c0_14, %c0_15], %15 {strides = array<i32>} : memref<8x256xf32, #tpu.memory_space<vmem>>, vector<8x256xf32>,
    } else {
    }
    return
  }
  func.func @transform_0(%arg0: i32, %arg1: i32, %arg2: i32) -> (i32, i32) {
    %c0_i32 = arith.constant 0 : i32
    return %arg0, %arg2 : i32, i32
  }
  func.func @transform_1(%arg0: i32, %arg1: i32, %arg2: i32) -> (i32, i32) {
    %c0_i32 = arith.constant 0 : i32
    return %arg2, %arg1 : i32, i32
  }
  func.func @transform_2(%arg0: i32, %arg1: i32, %arg2: i32) -> (i32, i32) {
    %c0_i32 = arith.constant 0 : i32
    %c0_i32_0 = arith.constant 0 : i32
    return %c0_i32, %arg1 : i32, i32
  }
  func.func @transform_3(%arg0: i32, %arg1: i32, %arg2: i32) -> (i32, i32) {
    %c0_i32 = arith.constant 0 : i32
    return %arg0, %arg1 : i32, i32
  }
}

module attributes {stable_mosaic.version = 11 : i64} {
  func.func @_affine_act_res_kernel(%arg0: i32, %arg1: memref<32x128xf32, #tpu.memory_space<vmem>>, %arg2: memref<1x128xf32, #tpu.memory_space<vmem>>, %arg3: memref<1x128xf32, #tpu.memory_space<vmem>>, %arg4: memref<32x128xf32, #tpu.memory_space<vmem>>, %arg5: memref<32x128xf32, #tpu.memory_space<vmem>>) attributes {dimension_semantics = [#tpu.dimension_semantics<parallel>], iteration_bounds = array<i64: 1>, scalar_prefetch = 0 : i64, scratch_operands = 0 : i64, tpu.core_type = #tpu.core_type<tc>, window_params = [{transform_indices = @transform_0, window_bounds = array<i64: 32, 128>}, {pipeline_mode = #tpu.pipeline_mode<synchronous>, transform_indices = @transform_1, window_bounds = array<i64: 1, 128>}, {pipeline_mode = #tpu.pipeline_mode<synchronous>, transform_indices = @transform_2, window_bounds = array<i64: 1, 128>}, {transform_indices = @transform_3, window_bounds = array<i64: 32, 128>}, {transform_indices = @transform_4, window_bounds = array<i64: 32, 128>}]} {
    %c0 = arith.constant 0 : index
    %c0_0 = arith.constant 0 : index
    %0 = vector.load %arg1[%c0, %c0_0] : memref<32x128xf32, #tpu.memory_space<vmem>>, vector<32x128xf32>
    %c0_1 = arith.constant 0 : index
    %c0_2 = arith.constant 0 : index
    %1 = vector.load %arg2[%c0_1, %c0_2] : memref<1x128xf32, #tpu.memory_space<vmem>>, vector<1x128xf32>
    %2 = vector.broadcast %1 : vector<1x128xf32> to vector<32x128xf32>
    %3 = arith.mulf %0, %2 : vector<32x128xf32>
    %c0_3 = arith.constant 0 : index
    %c0_4 = arith.constant 0 : index
    %4 = vector.load %arg3[%c0_3, %c0_4] : memref<1x128xf32, #tpu.memory_space<vmem>>, vector<1x128xf32>
    %5 = vector.broadcast %4 : vector<1x128xf32> to vector<32x128xf32>
    %6 = arith.addf %3, %5 : vector<32x128xf32>
    %cst = arith.constant 0.000000e+00 : f32
    %7 = vector.broadcast %cst : f32 to vector<32x128xf32>
    %8 = arith.maximumf %6, %7 : vector<32x128xf32>
    %c0_5 = arith.constant 0 : index
    %c0_6 = arith.constant 0 : index
    %9 = vector.load %arg4[%c0_5, %c0_6] : memref<32x128xf32, #tpu.memory_space<vmem>>, vector<32x128xf32>
    %10 = arith.addf %8, %9 : vector<32x128xf32>
    %c0_7 = arith.constant 0 : index
    %c0_8 = arith.constant 0 : index
    %11 = vector.load %arg5[%c0_7, %c0_8] : memref<32x128xf32, #tpu.memory_space<vmem>>, vector<32x128xf32>
    tpu.vector_store %arg5[%c0_7, %c0_8], %10 {strides = array<i32>} : memref<32x128xf32, #tpu.memory_space<vmem>>, vector<32x128xf32>,
    return
  }
  func.func @transform_0(%arg0: i32) -> (i32, i32) {
    %c0_i32 = arith.constant 0 : i32
    %c0_i32_0 = arith.constant 0 : i32
    return %arg0, %c0_i32 : i32, i32
  }
  func.func @transform_1(%arg0: i32) -> (i32, i32) {
    %c0_i32 = arith.constant 0 : i32
    %c0_i32_0 = arith.constant 0 : i32
    %c0_i32_1 = arith.constant 0 : i32
    return %c0_i32, %c0_i32_0 : i32, i32
  }
  func.func @transform_2(%arg0: i32) -> (i32, i32) {
    %c0_i32 = arith.constant 0 : i32
    %c0_i32_0 = arith.constant 0 : i32
    %c0_i32_1 = arith.constant 0 : i32
    return %c0_i32, %c0_i32_0 : i32, i32
  }
  func.func @transform_3(%arg0: i32) -> (i32, i32) {
    %c0_i32 = arith.constant 0 : i32
    %c0_i32_0 = arith.constant 0 : i32
    return %arg0, %c0_i32 : i32, i32
  }
  func.func @transform_4(%arg0: i32) -> (i32, i32) {
    %c0_i32 = arith.constant 0 : i32
    %c0_i32_0 = arith.constant 0 : i32
    return %arg0, %c0_i32 : i32, i32
  }
}

module attributes {stable_mosaic.version = 11 : i64} {
  func.func @_matmul_bias_act_kernel(%arg0: i32, %arg1: i32, %arg2: i32, %arg3: memref<32x128xbf16, #tpu.memory_space<vmem>>, %arg4: memref<128x256xbf16, #tpu.memory_space<vmem>>, %arg5: memref<1x256xf32, #tpu.memory_space<vmem>>, %arg6: memref<32x256xf32, #tpu.memory_space<vmem>>, %arg7: memref<32x256xf32, #tpu.memory_space<vmem>>) attributes {dimension_semantics = [#tpu.dimension_semantics<parallel>, #tpu.dimension_semantics<parallel>, #tpu.dimension_semantics<arbitrary>], iteration_bounds = array<i64: 1, 1, 1>, scalar_prefetch = 0 : i64, scratch_operands = 1 : i64, tpu.core_type = #tpu.core_type<tc>, window_params = [{transform_indices = @transform_0, window_bounds = array<i64: 32, 128>}, {transform_indices = @transform_1, window_bounds = array<i64: 128, 256>}, {transform_indices = @transform_2, window_bounds = array<i64: 1, 256>}, {transform_indices = @transform_3, window_bounds = array<i64: 32, 256>}]} {
    %c0_i32 = arith.constant 0 : i32
    %0 = arith.cmpi eq, %arg2, %c0_i32 : i32
    %1 = arith.extui %0 : i1 to i32
    %c0_i32_0 = arith.constant 0 : i32
    %2 = arith.cmpi ne, %1, %c0_i32_0 : i32
    scf.if %2 {
      %cst_10 = arith.constant 0.000000e+00 : f32
      %12 = vector.broadcast %cst_10 : f32 to vector<32x256xf32>
      %c0_11 = arith.constant 0 : index
      %c0_12 = arith.constant 0 : index
      %13 = vector.load %arg7[%c0_11, %c0_12] : memref<32x256xf32, #tpu.memory_space<vmem>>, vector<32x256xf32>
      tpu.vector_store %arg7[%c0_11, %c0_12], %12 {strides = array<i32>} : memref<32x256xf32, #tpu.memory_space<vmem>>, vector<32x256xf32>,
    } else {
    }
    %c0 = arith.constant 0 : index
    %c0_1 = arith.constant 0 : index
    %3 = vector.load %arg7[%c0, %c0_1] : memref<32x256xf32, #tpu.memory_space<vmem>>, vector<32x256xf32>
    %c0_2 = arith.constant 0 : index
    %c0_3 = arith.constant 0 : index
    %4 = vector.load %arg3[%c0_2, %c0_3] : memref<32x128xbf16, #tpu.memory_space<vmem>>, vector<32x128xbf16>
    %c0_4 = arith.constant 0 : index
    %c0_5 = arith.constant 0 : index
    %5 = vector.load %arg4[%c0_4, %c0_5] : memref<128x256xbf16, #tpu.memory_space<vmem>>, vector<128x256xbf16>
    %cst = arith.constant dense<0.000000e+00> : vector<32x256xf32>
    %6 = tpu.matmul %4, %5, %cst {dimension_numbers = #tpu.dot_dimension_numbers<[1], [0], [0], [1], [0, 0, 1, 1], [], []>} : vector<32x128xbf16>, vector<128x256xbf16>, vector<32x256xf32> -> vector<32x256xf32>
    %7 = arith.addf %3, %6 : vector<32x256xf32>
    %c0_6 = arith.constant 0 : index
    %c0_7 = arith.constant 0 : index
    %8 = vector.load %arg7[%c0_6, %c0_7] : memref<32x256xf32, #tpu.memory_space<vmem>>, vector<32x256xf32>
    tpu.vector_store %arg7[%c0_6, %c0_7], %7 {strides = array<i32>} : memref<32x256xf32, #tpu.memory_space<vmem>>, vector<32x256xf32>,
    %c0_i32_8 = arith.constant 0 : i32
    %9 = arith.cmpi eq, %arg2, %c0_i32_8 : i32
    %10 = arith.extui %9 : i1 to i32
    %c0_i32_9 = arith.constant 0 : i32
    %11 = arith.cmpi ne, %10, %c0_i32_9 : i32
    scf.if %11 {
      %c0_10 = arith.constant 0 : index
      %c0_11 = arith.constant 0 : index
      %12 = vector.load %arg7[%c0_10, %c0_11] : memref<32x256xf32, #tpu.memory_space<vmem>>, vector<32x256xf32>
      %c0_12 = arith.constant 0 : index
      %c0_13 = arith.constant 0 : index
      %13 = vector.load %arg5[%c0_12, %c0_13] : memref<1x256xf32, #tpu.memory_space<vmem>>, vector<1x256xf32>
      %14 = vector.broadcast %13 : vector<1x256xf32> to vector<32x256xf32>
      %15 = arith.addf %12, %14 : vector<32x256xf32>
      %c0_14 = arith.constant 0 : index
      %c0_15 = arith.constant 0 : index
      %16 = vector.load %arg6[%c0_14, %c0_15] : memref<32x256xf32, #tpu.memory_space<vmem>>, vector<32x256xf32>
      tpu.vector_store %arg6[%c0_14, %c0_15], %15 {strides = array<i32>} : memref<32x256xf32, #tpu.memory_space<vmem>>, vector<32x256xf32>,
    } else {
    }
    return
  }
  func.func @transform_0(%arg0: i32, %arg1: i32, %arg2: i32) -> (i32, i32) {
    %c0_i32 = arith.constant 0 : i32
    return %arg0, %arg2 : i32, i32
  }
  func.func @transform_1(%arg0: i32, %arg1: i32, %arg2: i32) -> (i32, i32) {
    %c0_i32 = arith.constant 0 : i32
    return %arg2, %arg1 : i32, i32
  }
  func.func @transform_2(%arg0: i32, %arg1: i32, %arg2: i32) -> (i32, i32) {
    %c0_i32 = arith.constant 0 : i32
    %c0_i32_0 = arith.constant 0 : i32
    return %c0_i32, %arg1 : i32, i32
  }
  func.func @transform_3(%arg0: i32, %arg1: i32, %arg2: i32) -> (i32, i32) {
    %c0_i32 = arith.constant 0 : i32
    return %arg0, %arg1 : i32, i32
  }
}

module attributes {stable_mosaic.version = 11 : i64} {
  func.func @_affine_act_res_kernel(%arg0: i32, %arg1: memref<128x64xf32, #tpu.memory_space<vmem>>, %arg2: memref<1x64xf32, #tpu.memory_space<vmem>>, %arg3: memref<1x64xf32, #tpu.memory_space<vmem>>, %arg4: memref<128x64xf32, #tpu.memory_space<vmem>>, %arg5: memref<128x64xf32, #tpu.memory_space<vmem>>) attributes {dimension_semantics = [#tpu.dimension_semantics<parallel>], iteration_bounds = array<i64: 1>, scalar_prefetch = 0 : i64, scratch_operands = 0 : i64, tpu.core_type = #tpu.core_type<tc>, window_params = [{transform_indices = @transform_0, window_bounds = array<i64: 128, 64>}, {pipeline_mode = #tpu.pipeline_mode<synchronous>, transform_indices = @transform_1, window_bounds = array<i64: 1, 64>}, {pipeline_mode = #tpu.pipeline_mode<synchronous>, transform_indices = @transform_2, window_bounds = array<i64: 1, 64>}, {transform_indices = @transform_3, window_bounds = array<i64: 128, 64>}, {transform_indices = @transform_4, window_bounds = array<i64: 128, 64>}]} {
    %c0 = arith.constant 0 : index
    %c0_0 = arith.constant 0 : index
    %0 = vector.load %arg1[%c0, %c0_0] : memref<128x64xf32, #tpu.memory_space<vmem>>, vector<128x64xf32>
    %c0_1 = arith.constant 0 : index
    %c0_2 = arith.constant 0 : index
    %1 = vector.load %arg2[%c0_1, %c0_2] : memref<1x64xf32, #tpu.memory_space<vmem>>, vector<1x64xf32>
    %2 = vector.broadcast %1 : vector<1x64xf32> to vector<128x64xf32>
    %3 = arith.mulf %0, %2 : vector<128x64xf32>
    %c0_3 = arith.constant 0 : index
    %c0_4 = arith.constant 0 : index
    %4 = vector.load %arg3[%c0_3, %c0_4] : memref<1x64xf32, #tpu.memory_space<vmem>>, vector<1x64xf32>
    %5 = vector.broadcast %4 : vector<1x64xf32> to vector<128x64xf32>
    %6 = arith.addf %3, %5 : vector<128x64xf32>
    %cst = arith.constant 0.000000e+00 : f32
    %7 = vector.broadcast %cst : f32 to vector<128x64xf32>
    %8 = arith.maximumf %6, %7 : vector<128x64xf32>
    %c0_5 = arith.constant 0 : index
    %c0_6 = arith.constant 0 : index
    %9 = vector.load %arg4[%c0_5, %c0_6] : memref<128x64xf32, #tpu.memory_space<vmem>>, vector<128x64xf32>
    %10 = arith.addf %8, %9 : vector<128x64xf32>
    %c0_7 = arith.constant 0 : index
    %c0_8 = arith.constant 0 : index
    %11 = vector.load %arg5[%c0_7, %c0_8] : memref<128x64xf32, #tpu.memory_space<vmem>>, vector<128x64xf32>
    tpu.vector_store %arg5[%c0_7, %c0_8], %10 {strides = array<i32>} : memref<128x64xf32, #tpu.memory_space<vmem>>, vector<128x64xf32>,
    return
  }
  func.func @transform_0(%arg0: i32) -> (i32, i32) {
    %c0_i32 = arith.constant 0 : i32
    %c0_i32_0 = arith.constant 0 : i32
    return %arg0, %c0_i32 : i32, i32
  }
  func.func @transform_1(%arg0: i32) -> (i32, i32) {
    %c0_i32 = arith.constant 0 : i32
    %c0_i32_0 = arith.constant 0 : i32
    %c0_i32_1 = arith.constant 0 : i32
    return %c0_i32, %c0_i32_0 : i32, i32
  }
  func.func @transform_2(%arg0: i32) -> (i32, i32) {
    %c0_i32 = arith.constant 0 : i32
    %c0_i32_0 = arith.constant 0 : i32
    %c0_i32_1 = arith.constant 0 : i32
    return %c0_i32, %c0_i32_0 : i32, i32
  }
  func.func @transform_3(%arg0: i32) -> (i32, i32) {
    %c0_i32 = arith.constant 0 : i32
    %c0_i32_0 = arith.constant 0 : i32
    return %arg0, %c0_i32 : i32, i32
  }
  func.func @transform_4(%arg0: i32) -> (i32, i32) {
    %c0_i32 = arith.constant 0 : i32
    %c0_i32_0 = arith.constant 0 : i32
    return %arg0, %c0_i32 : i32, i32
  }
}

module attributes {stable_mosaic.version = 11 : i64} {
  func.func @_matmul_bias_act_kernel(%arg0: i32, %arg1: i32, %arg2: i32, %arg3: memref<128x64xbf16, #tpu.memory_space<vmem>>, %arg4: memref<64x128xbf16, #tpu.memory_space<vmem>>, %arg5: memref<1x128xf32, #tpu.memory_space<vmem>>, %arg6: memref<128x128xf32, #tpu.memory_space<vmem>>, %arg7: memref<128x128xf32, #tpu.memory_space<vmem>>) attributes {dimension_semantics = [#tpu.dimension_semantics<parallel>, #tpu.dimension_semantics<parallel>, #tpu.dimension_semantics<arbitrary>], iteration_bounds = array<i64: 1, 1, 1>, scalar_prefetch = 0 : i64, scratch_operands = 1 : i64, tpu.core_type = #tpu.core_type<tc>, window_params = [{transform_indices = @transform_0, window_bounds = array<i64: 128, 64>}, {transform_indices = @transform_1, window_bounds = array<i64: 64, 128>}, {transform_indices = @transform_2, window_bounds = array<i64: 1, 128>}, {transform_indices = @transform_3, window_bounds = array<i64: 128, 128>}]} {
    %c0_i32 = arith.constant 0 : i32
    %0 = arith.cmpi eq, %arg2, %c0_i32 : i32
    %1 = arith.extui %0 : i1 to i32
    %c0_i32_0 = arith.constant 0 : i32
    %2 = arith.cmpi ne, %1, %c0_i32_0 : i32
    scf.if %2 {
      %cst_10 = arith.constant 0.000000e+00 : f32
      %12 = vector.broadcast %cst_10 : f32 to vector<128x128xf32>
      %c0_11 = arith.constant 0 : index
      %c0_12 = arith.constant 0 : index
      %13 = vector.load %arg7[%c0_11, %c0_12] : memref<128x128xf32, #tpu.memory_space<vmem>>, vector<128x128xf32>
      tpu.vector_store %arg7[%c0_11, %c0_12], %12 {strides = array<i32>} : memref<128x128xf32, #tpu.memory_space<vmem>>, vector<128x128xf32>,
    } else {
    }
    %c0 = arith.constant 0 : index
    %c0_1 = arith.constant 0 : index
    %3 = vector.load %arg7[%c0, %c0_1] : memref<128x128xf32, #tpu.memory_space<vmem>>, vector<128x128xf32>
    %c0_2 = arith.constant 0 : index
    %c0_3 = arith.constant 0 : index
    %4 = vector.load %arg3[%c0_2, %c0_3] : memref<128x64xbf16, #tpu.memory_space<vmem>>, vector<128x64xbf16>
    %c0_4 = arith.constant 0 : index
    %c0_5 = arith.constant 0 : index
    %5 = vector.load %arg4[%c0_4, %c0_5] : memref<64x128xbf16, #tpu.memory_space<vmem>>, vector<64x128xbf16>
    %cst = arith.constant dense<0.000000e+00> : vector<128x128xf32>
    %6 = tpu.matmul %4, %5, %cst {dimension_numbers = #tpu.dot_dimension_numbers<[1], [0], [0], [1], [0, 0, 1, 1], [], []>} : vector<128x64xbf16>, vector<64x128xbf16>, vector<128x128xf32> -> vector<128x128xf32>
    %7 = arith.addf %3, %6 : vector<128x128xf32>
    %c0_6 = arith.constant 0 : index
    %c0_7 = arith.constant 0 : index
    %8 = vector.load %arg7[%c0_6, %c0_7] : memref<128x128xf32, #tpu.memory_space<vmem>>, vector<128x128xf32>
    tpu.vector_store %arg7[%c0_6, %c0_7], %7 {strides = array<i32>} : memref<128x128xf32, #tpu.memory_space<vmem>>, vector<128x128xf32>,
    %c0_i32_8 = arith.constant 0 : i32
    %9 = arith.cmpi eq, %arg2, %c0_i32_8 : i32
    %10 = arith.extui %9 : i1 to i32
    %c0_i32_9 = arith.constant 0 : i32
    %11 = arith.cmpi ne, %10, %c0_i32_9 : i32
    scf.if %11 {
      %c0_10 = arith.constant 0 : index
      %c0_11 = arith.constant 0 : index
      %12 = vector.load %arg7[%c0_10, %c0_11] : memref<128x128xf32, #tpu.memory_space<vmem>>, vector<128x128xf32>
      %c0_12 = arith.constant 0 : index
      %c0_13 = arith.constant 0 : index
      %13 = vector.load %arg5[%c0_12, %c0_13] : memref<1x128xf32, #tpu.memory_space<vmem>>, vector<1x128xf32>
      %14 = vector.broadcast %13 : vector<1x128xf32> to vector<128x128xf32>
      %15 = arith.addf %12, %14 : vector<128x128xf32>
      %16 = math.tanh %15 : vector<128x128xf32>
      %c0_14 = arith.constant 0 : index
      %c0_15 = arith.constant 0 : index
      %17 = vector.load %arg6[%c0_14, %c0_15] : memref<128x128xf32, #tpu.memory_space<vmem>>, vector<128x128xf32>
      tpu.vector_store %arg6[%c0_14, %c0_15], %16 {strides = array<i32>} : memref<128x128xf32, #tpu.memory_space<vmem>>, vector<128x128xf32>,
    } else {
    }
    return
  }
  func.func @transform_0(%arg0: i32, %arg1: i32, %arg2: i32) -> (i32, i32) {
    %c0_i32 = arith.constant 0 : i32
    return %arg0, %arg2 : i32, i32
  }
  func.func @transform_1(%arg0: i32, %arg1: i32, %arg2: i32) -> (i32, i32) {
    %c0_i32 = arith.constant 0 : i32
    return %arg2, %arg1 : i32, i32
  }
  func.func @transform_2(%arg0: i32, %arg1: i32, %arg2: i32) -> (i32, i32) {
    %c0_i32 = arith.constant 0 : i32
    %c0_i32_0 = arith.constant 0 : i32
    return %c0_i32, %arg1 : i32, i32
  }
  func.func @transform_3(%arg0: i32, %arg1: i32, %arg2: i32) -> (i32, i32) {
    %c0_i32 = arith.constant 0 : i32
    return %arg0, %arg1 : i32, i32
  }
}

</mosaic_0001>

<bundles_post_ra>
// kernel: generator_forward.28
= control target key start
LH: loop header
LB: loop body
LE: loop exit
PB: predicated region body
PF: predicated region fallthrough
CT: control target
= control target key end

     0   :  { %vm92_vm0 = vcmask 523264   ;;  %s271_s0 = inlined_call_operand.vmem [shape: f32[128,64], index: 0, kind: input, shape index: {}]   ;;  %s272_s1 = inlined_call_operand.vmem [shape: f32[1,64], index: 1, kind: input, shape index: {}]   ;;  %s273_s2 = inlined_call_operand.vmem [shape: f32[1,64], index: 2, kind: input, shape index: {}]   ;;  %s274_s3 = inlined_call_operand.vmem [shape: f32[128,64], index: 3, kind: output, shape index: {}]  }
   0x1   :  { %v14_v0 = vld [vmem:[%s271_s0] sm:$0xff]  ;;  %v15_v4 = vld [vmem:[%s271_s0 + $0x8] sm:$0xff]  ;;  %v16_v5 = vld [vmem:[%s271_s0 + $0x10] sm:$0xff] }
   0x2   :  { %v113_v1 = vld [vmem:[%s272_s1] ss:$0 sm:$0xff]  ;;  %v17_v6 = vld [vmem:[%s271_s0 + $0x18] sm:$0xff]  ;;  %v19_v11 = vld [vmem:[%s271_s0 + $0x28] sm:$0xff] }
   0x3   :  { %v144_v2 = vld [vmem:[%s273_s2] ss:$0 sm:$0xff]  ;;  %v37_v3 = vmul.f32 %v113_v1, %v14_v0  ;;  %v38_v7 = vmul.f32 %v113_v1, %v15_v4  ;;  %v39_v8 = vmul.f32 %v113_v1, %v16_v5  ;;  %v40_v9 = vmul.f32 %v113_v1, %v17_v6  ;;  %v20_v12 = vld [vmem:[%s271_s0 + $0x30] sm:$0xff]  ;;  %v21_v17 = vld [vmem:[%s271_s0 + $0x38] sm:$0xff] }
   0x4   :  { %v18_v10 = vld [vmem:[%s271_s0 + $0x20] sm:$0xff]  ;;  %v42_v15 = vmul.f32 %v113_v1, %v19_v11  ;;  %v43_v16 = vmul.f32 %v113_v1, %v20_v12  ;;  %v44_v21 = vmul.f32 %v113_v1, %v21_v17  ;;  %v23_v27 = vld [vmem:[%s271_s0 + $0x48] sm:$0xff]  ;;  %v24_v28 = vld [vmem:[%s271_s0 + $0x50] sm:$0xff] }
   0x5   :  { %v60_v13 = vadd.f32 %v144_v2, %v37_v3  ;;  %v41_v14 = vmul.f32 %v113_v1, %v18_v10  ;;  %v61_v18 = vadd.f32 %v144_v2, %v38_v7  ;;  %v62_v19 = vadd.f32 %v144_v2, %v39_v8  ;;  %v22_v22 = vld [vmem:[%s271_s0 + $0x40] sm:$0xff]  ;;  %v25_v29 = vld [vmem:[%s271_s0 + $0x58] sm:$0xff]  ;;  %v27_v35 = vld [vmem:[%s271_s0 + $0x68] sm:$0xff] }
   0x6   :  { %v63_v20 = vadd.f32 %v144_v2, %v40_v9  ;;  %v65_v25 = vadd.f32 %v144_v2, %v42_v15  ;;  %v66_v26 = vadd.f32 %v144_v2, %v43_v16  ;;  %v67_v33 = vadd.f32 %v144_v2, %v44_v21  ;;  %v26_v34 = vld [vmem:[%s271_s0 + $0x60] sm:$0xff]  ;;  %v28_v36 = vld [vmem:[%s271_s0 + $0x70] sm:$0xff]  ;;  %v29_v41 = vld [vmem:[%s271_s0 + $0x78] sm:$0xff] }
   0x7   :  { %v76_v23 = vmax.f32 %v60_v13, 0.0  ;;  %v64_v24 = vadd.f32 %v144_v2, %v41_v14  ;;  %v77_v30 = vmax.f32 %v61_v18, 0.0  ;;  %v78_v31 = vmax.f32 %v62_v19, 0.0 }
   0x8   :  { %v79_v32 = vmax.f32 %v63_v20, 0.0  ;;  %v81_v38 = vmax.f32 %v65_v25, 0.0  ;;  %v82_v39 = vmax.f32 %v66_v26, 0.0  ;;  %v45_v40 = vmul.f32 %v113_v1, %v22_v22 }
   0x9   :  { %93 = vst.msk [vmem:[%s274_s3] sm:$0xff] %vm92_vm0, %v76_v23  ;;  %v80_v37 = vmax.f32 %v64_v24, 0.0  ;;  %94 = vst.msk [vmem:[%s274_s3 + $0x8] sm:$0xff] %vm92_vm0, %v77_v30  ;;  %v83_v42 = vmax.f32 %v67_v33, 0.0  ;;  %v46_v43 = vmul.f32 %v113_v1, %v23_v27  ;;  %v47_v44 = vmul.f32 %v113_v1, %v24_v28 }
   0xa   :  { %95 = vst.msk [vmem:[%s274_s3 + $0x10] sm:$0xff] %vm92_vm0, %v78_v31  ;;  %96 = vst.msk [vmem:[%s274_s3 + $0x18] sm:$0xff] %vm92_vm0, %v79_v32  ;;  %v48_v45 = vmul.f32 %v113_v1, %v25_v29  ;;  %v68_v46 = vadd.f32 %v144_v2, %v45_v40  ;;  %v49_v47 = vmul.f32 %v113_v1, %v26_v34 }
   0xb   :  { %97 = vst.msk [vmem:[%s274_s3 + $0x20] sm:$0xff] %vm92_vm0, %v80_v37  ;;  %98 = vst.msk [vmem:[%s274_s3 + $0x28] sm:$0xff] %vm92_vm0, %v81_v38  ;;  %v50_v48 = vmul.f32 %v113_v1, %v27_v35  ;;  %v51_v49 = vmul.f32 %v113_v1, %v28_v36  ;;  %v69_v50 = vadd.f32 %v144_v2, %v46_v43 }
   0xc   :  { %99 = vst.msk [vmem:[%s274_s3 + $0x30] sm:$0xff] %vm92_vm0, %v82_v39  ;;  %100 = vst.msk [vmem:[%s274_s3 + $0x38] sm:$0xff] %vm92_vm0, %v83_v42  ;;  %v70_v51 = vadd.f32 %v144_v2, %v47_v44  ;;  %v71_v52 = vadd.f32 %v144_v2, %v48_v45  ;;  %v52_v53 = vmul.f32 %v113_v1, %v29_v41  ;;  %v84_v54 = vmax.f32 %v68_v46, 0.0 }
   0xd   :  { %v72_v55 = vadd.f32 %v144_v2, %v49_v47  ;;  %v73_v56 = vadd.f32 %v144_v2, %v50_v48  ;;  %v74_v57 = vadd.f32 %v144_v2, %v51_v49  ;;  %v85_v58 = vmax.f32 %v69_v50, 0.0 }
   0xe   :  { %v86_v59 = vmax.f32 %v70_v51, 0.0  ;;  %v87_v60 = vmax.f32 %v71_v52, 0.0  ;;  %v75_v61 = vadd.f32 %v144_v2, %v52_v53  ;;  %101 = vst.msk [vmem:[%s274_s3 + $0x40] sm:$0xff] %vm92_vm0, %v84_v54 }
   0xf   :  { %v88_v62 = vmax.f32 %v72_v55, 0.0  ;;  %v89_v63 = vmax.f32 %v73_v56, 0.0  ;;  %v90_v0 = vmax.f32 %v74_v57, 0.0  ;;  %102 = vst.msk [vmem:[%s274_s3 + $0x48] sm:$0xff] %vm92_vm0, %v85_v58 }
  0x10   :  { %103 = vst.msk [vmem:[%s274_s3 + $0x50] sm:$0xff] %vm92_vm0, %v86_v59  ;;  %104 = vst.msk [vmem:[%s274_s3 + $0x58] sm:$0xff] %vm92_vm0, %v87_v60  ;;  %v91_v1 = vmax.f32 %v75_v61, 0.0 }
  0x11   :  { %105 = vst.msk [vmem:[%s274_s3 + $0x60] sm:$0xff] %vm92_vm0, %v88_v62  ;;  %106 = vst.msk [vmem:[%s274_s3 + $0x68] sm:$0xff] %vm92_vm0, %v89_v63 }
  0x12   :  { %107 = vst.msk [vmem:[%s274_s3 + $0x70] sm:$0xff] %vm92_vm0, %v90_v0  ;;  %108 = vst.msk [vmem:[%s274_s3 + $0x78] sm:$0xff] %vm92_vm0, %v91_v1 }

// kernel: generator_forward.27
= control target key start
LH: loop header
LB: loop body
LE: loop exit
PB: predicated region body
PF: predicated region fallthrough
CT: control target
= control target key end

     0   :  { %vm115_vm0 = vcmask 130048   ;;  %s493_s1 = inlined_call_operand.vmem [shape: bf16[16,128], index: 1, kind: input, shape index: {}]   ;;  %s494_s0 = inlined_call_operand.vmem [shape: bf16[128,16], index: 0, kind: input, shape index: {}]   ;;  %s495_s2 = inlined_call_operand.vmem [shape: f32[1,128], index: 2, kind: input, shape index: {}]   ;;  %s496_s3 = inlined_call_operand.vmem [shape: f32[128,128], index: 3, kind: output, shape index: {}]  }
   0x1   :  { %v378_v0 = vld [vmem:[%s493_s1] sm:$0xff]   ;;  %v381_v3 = vld [vmem:[%s494_s0 + $0x8] sm:$0xff]   ;;  %v383_v5 = vld [vmem:[%s494_s0 + $0x10] sm:$0xff]  }
   0x2   :  { %v379_v1 = vld [vmem:[%s494_s0] sm:$0xff]   ;;  %358 = vmatprep.subr.bf16.mxu0 %v378_v0  ;;  %376 = vmatprep.subr.bf16.mxu1 %v378_v0  ;;  %v382_v4 = vld [vmem:[%s494_s0 + $0x28] sm:$0xff]   ;;  %v384_v6 = vld [vmem:[%s494_s0 + $0x30] sm:$0xff]  }
   0x3   :  { %v380_v2 = vld [vmem:[%s494_s0 + $0x20] sm:$0xff]   ;;  %359 = vmatpush3.bf16.msra.mxu0 %v378_v0  ;;  %377 = vmatpush3.bf16.msra.mxu1 %v378_v0  ;;  %v385_v7 = vld [vmem:[%s494_s0 + $0x18] sm:$0xff]  }
   0x4   :  { %360 = vmatprep.mubr.msk.bf16.mxu0 %vm115_vm0, %v379_v1  ;;  %368 = vmatprep.mubr.msk.bf16.mxu1 %vm115_vm0, %v380_v2  ;;  %v386_v8 = vld [vmem:[%s494_s0 + $0x38] sm:$0xff]   ;;  %v348_v9 = vld [vmem:[%s495_s2] ss:$0 sm:$0xff] }
   0x6   :  { %361 = vmatmul.mubr.msk.bf16.vlgmr.msra.gmra.mxu0 %vm115_vm0, %v381_v3  ;;  %369 = vmatmul.mubr.msk.bf16.vlgmr.msra.gmra.mxu1 %vm115_vm0, %v382_v4 }
   0x7   :  { %364 = vmatprep.mubr.msk.bf16.mxu0 %vm115_vm0, %v383_v5  ;;  %372 = vmatprep.mubr.msk.bf16.mxu1 %vm115_vm0, %v384_v6 }
   0xe   :  { %365 = vmatmul.mubr.msk.bf16.gmra.mxu0 %vm115_vm0, %v385_v7  ;;  %373 = vmatmul.mubr.msk.bf16.gmra.mxu1 %vm115_vm0, %v386_v8 }
  0xc6   :  { %v362_v10 = vpop.f32.mrf.mxu0  ;;  %v370_v11 = vpop.f32.mrf.mxu1 }
  0xc7   :  { %v297_v12 = vadd.f32 %v362_v10, %v348_v9  ;;  %v305_v13 = vadd.f32 %v370_v11, %v348_v9 }
  0xc8   :  { %v174_v14 = vpop.f32.mrf.mxu0  ;;  %v206_v15 = vpop.f32.mrf.mxu1 }
  0xc9   :  { %313 = vst [vmem:[%s496_s3 + $0x10] sm:$0xff] %v297_v12  ;;  %321 = vst [vmem:[%s496_s3 + $0x50] sm:$0xff] %v305_v13  ;;  %v295_v16 = vadd.f32 %v348_v9, %v174_v14  ;;  %v303_v17 = vadd.f32 %v348_v9, %v206_v15 }
  0xca   :  { %v363_v18 = vpop.f32.mrf.mxu0  ;;  %v371_v19 = vpop.f32.mrf.mxu1 }
  0xcb   :  { %311 = vst [vmem:[%s496_s3] sm:$0xff] %v295_v16  ;;  %319 = vst [vmem:[%s496_s3 + $0x40] sm:$0xff] %v303_v17  ;;  %v298_v20 = vadd.f32 %v363_v18, %v348_v9  ;;  %v306_v21 = vadd.f32 %v371_v19, %v348_v9 }
  0xcc   :  { %v177_v22 = vpop.f32.mrf.mxu0  ;;  %v209_v23 = vpop.f32.mrf.mxu1 }
  0xcd   :  { %314 = vst [vmem:[%s496_s3 + $0x18] sm:$0xff] %v298_v20  ;;  %322 = vst [vmem:[%s496_s3 + $0x58] sm:$0xff] %v306_v21  ;;  %v296_v24 = vadd.f32 %v348_v9, %v177_v22  ;;  %v304_v25 = vadd.f32 %v348_v9, %v209_v23 }
  0xce   :  { %v366_v26 = vpop.f32.mrf.mxu0  ;;  %v374_v27 = vpop.f32.mrf.mxu1 }
  0xcf   :  { %312 = vst [vmem:[%s496_s3 + $0x8] sm:$0xff] %v296_v24  ;;  %320 = vst [vmem:[%s496_s3 + $0x48] sm:$0xff] %v304_v25  ;;  %v301_v28 = vadd.f32 %v366_v26, %v348_v9  ;;  %v309_v29 = vadd.f32 %v374_v27, %v348_v9 }
  0xd0   :  { %v190_v30 = vpop.f32.mrf.mxu0  ;;  %v222_v31 = vpop.f32.mrf.mxu1 }
  0xd1   :  { %317 = vst [vmem:[%s496_s3 + $0x30] sm:$0xff] %v301_v28  ;;  %325 = vst [vmem:[%s496_s3 + $0x70] sm:$0xff] %v309_v29  ;;  %v299_v32 = vadd.f32 %v348_v9, %v190_v30  ;;  %v307_v33 = vadd.f32 %v348_v9, %v222_v31 }
  0xd2   :  { %v367_v34 = vpop.f32.mrf.mxu0  ;;  %v375_v35 = vpop.f32.mrf.mxu1 }
  0xd3   :  { %315 = vst [vmem:[%s496_s3 + $0x20] sm:$0xff] %v299_v32  ;;  %323 = vst [vmem:[%s496_s3 + $0x60] sm:$0xff] %v307_v33  ;;  %v302_v36 = vadd.f32 %v367_v34, %v348_v9  ;;  %v310_v37 = vadd.f32 %v375_v35, %v348_v9 }
  0xd4   :  { %v193_v38 = vpop.f32.mrf.mxu0  ;;  %v225_v39 = vpop.f32.mrf.mxu1 }
  0xd5   :  { %318 = vst [vmem:[%s496_s3 + $0x38] sm:$0xff] %v302_v36  ;;  %326 = vst [vmem:[%s496_s3 + $0x78] sm:$0xff] %v310_v37  ;;  %v300_v40 = vadd.f32 %v348_v9, %v193_v38  ;;  %v308_v41 = vadd.f32 %v348_v9, %v225_v39 }
  0xd7   :  { %316 = vst [vmem:[%s496_s3 + $0x28] sm:$0xff] %v300_v40  ;;  %324 = vst [vmem:[%s496_s3 + $0x68] sm:$0xff] %v308_v41 }

// kernel: generator_forward.30
= control target key start
LH: loop header
LB: loop body
LE: loop exit
PB: predicated region body
PF: predicated region fallthrough
CT: control target
= control target key end

     0   :  { %s104_s0 = inlined_call_operand.vmem [shape: f32[32,128], index: 0, kind: input, shape index: {}]   ;;  %s105_s1 = inlined_call_operand.vmem [shape: f32[1,128], index: 1, kind: input, shape index: {}]   ;;  %s106_s2 = inlined_call_operand.vmem [shape: f32[1,128], index: 2, kind: input, shape index: {}]   ;;  %s107_s3 = inlined_call_operand.vmem [shape: f32[32,128], index: 3, kind: output, shape index: {}]  }
   0x1   :  { %v14_v0 = vld [vmem:[%s104_s0] sm:$0xff]  ;;  %v15_v4 = vld [vmem:[%s104_s0 + $0x8] sm:$0xff]  ;;  %v16_v5 = vld [vmem:[%s104_s0 + $0x10] sm:$0xff] }
   0x2   :  { %v52_v1 = vld [vmem:[%s105_s1] ss:$0 sm:$0xff]  ;;  %v17_v6 = vld [vmem:[%s104_s0 + $0x18] sm:$0xff] }
   0x3   :  { %v53_v2 = vld [vmem:[%s106_s2] ss:$0 sm:$0xff]  ;;  %v25_v3 = vmul.f32 %v52_v1, %v14_v0  ;;  %v26_v7 = vmul.f32 %v52_v1, %v15_v4  ;;  %v27_v8 = vmul.f32 %v52_v1, %v16_v5  ;;  %v28_v9 = vmul.f32 %v52_v1, %v17_v6 }
   0x5   :  { %v36_v10 = vadd.f32 %v53_v2, %v25_v3  ;;  %v37_v11 = vadd.f32 %v53_v2, %v26_v7  ;;  %v38_v12 = vadd.f32 %v53_v2, %v27_v8  ;;  %v39_v13 = vadd.f32 %v53_v2, %v28_v9 }
   0x7   :  { %v40_v14 = vmax.f32 %v36_v10, 0.0  ;;  %v41_v15 = vmax.f32 %v37_v11, 0.0  ;;  %v42_v16 = vmax.f32 %v38_v12, 0.0  ;;  %v43_v17 = vmax.f32 %v39_v13, 0.0 }
   0x9   :  { %44 = vst [vmem:[%s107_s3] sm:$0xff] %v40_v14  ;;  %45 = vst [vmem:[%s107_s3 + $0x8] sm:$0xff] %v41_v15 }
   0xa   :  { %46 = vst [vmem:[%s107_s3 + $0x10] sm:$0xff] %v42_v16  ;;  %47 = vst [vmem:[%s107_s3 + $0x18] sm:$0xff] %v43_v17 }

// kernel: generator_forward.29
= control target key start
LH: loop header
LB: loop body
LE: loop exit
PB: predicated region body
PF: predicated region fallthrough
CT: control target
= control target key end

     0   :  { %s444_s1 = inlined_call_operand.vmem [shape: bf16[256,128], index: 1, kind: input, shape index: {}]   ;;  %s445_s0 = inlined_call_operand.vmem [shape: bf16[32,256], index: 0, kind: input, shape index: {}]   ;;  %s446_s2 = inlined_call_operand.vmem [shape: f32[1,128], index: 2, kind: input, shape index: {}]   ;;  %s447_s3 = inlined_call_operand.vmem [shape: f32[32,128], index: 3, kind: output, shape index: {}]  }
   0x1   :  { %v327_v0 = vld [vmem:[%s444_s1 + $0x78] sm:$0xff]   ;;  %v329_v2 = vld [vmem:[%s444_s1 + $0x70] sm:$0xff]   ;;  %v331_v4 = vld [vmem:[%s444_s1 + $0x68] sm:$0xff]  }
   0x2   :  { %v328_v1 = vld [vmem:[%s444_s1 + $0x38] sm:$0xff]   ;;  %283 = vmatprep.subr.bf16.mxu0 %v327_v0  ;;  %311 = vmatprep.subr.bf16.mxu1 %v327_v0  ;;  %v330_v3 = vld [vmem:[%s444_s1 + $0x30] sm:$0xff]   ;;  %v332_v5 = vld [vmem:[%s444_s1 + $0x28] sm:$0xff]  }
   0x3   :  { %284 = vmatpush3.bf16.msra.mxu0 %v328_v1  ;;  %319 = vmatpush3.bf16.msra.mxu1 %v328_v1  ;;  %v333_v6 = vld [vmem:[%s444_s1 + $0x60] sm:$0xff]   ;;  %v335_v8 = vld [vmem:[%s444_s1 + $0x58] sm:$0xff]   ;;  %v337_v10 = vld [vmem:[%s444_s1 + $0x50] sm:$0xff]  }
   0x4   :  { %285 = vmatprep.subr.bf16.mxu0 %v329_v2  ;;  %312 = vmatprep.subr.bf16.mxu1 %v329_v2  ;;  %v334_v7 = vld [vmem:[%s444_s1 + $0x20] sm:$0xff]   ;;  %v336_v9 = vld [vmem:[%s444_s1 + $0x18] sm:$0xff]   ;;  %v338_v13 = vld [vmem:[%s444_s1 + $0x10] sm:$0xff]  }
   0x5   :  { %v345_v11 = vld [vmem:[%s445_s0 + $0x4] ss:$8 sps:$4 sm:$0xff]   ;;  %v348_v12 = vld [vmem:[%s445_s0 + $0x14] ss:$8 sps:$4 sm:$0xff]   ;;  %v343_v18 = vld [vmem:[%s445_s0] ss:$8 sps:$4 sm:$0xff]  }
   0x6   :  { %v339_v14 = vld [vmem:[%s444_s1 + $0x48] sm:$0xff]   ;;  %211 = vmatprep.mubr.bf16.mxu0 %v345_v11  ;;  %219 = vmatprep.mubr.bf16.mxu1 %v348_v12  ;;  %v341_v16 = vld [vmem:[%s444_s1 + $0x40] sm:$0xff]   ;;  %v346_v19 = vld [vmem:[%s445_s0 + $0x10] ss:$8 sps:$4 sm:$0xff]  }
   0x7   :  { %286 = vmatpush3.bf16.msra.mxu0 %v330_v3  ;;  %320 = vmatpush3.bf16.msra.mxu1 %v330_v3  ;;  %v340_v15 = vld [vmem:[%s444_s1 + $0x8] sm:$0xff]   ;;  %v342_v17 = vld [vmem:[%s444_s1] sm:$0xff]  }
   0x8   :  { %287 = vmatprep.subr.bf16.mxu0 %v331_v4  ;;  %313 = vmatprep.subr.bf16.mxu1 %v331_v4  ;;  %v282_v23 = vld [vmem:[%s446_s2] ss:$0 sm:$0xff] }
   0xb   :  { %288 = vmatpush3.bf16.msra.mxu0 %v332_v5  ;;  %321 = vmatpush3.bf16.msra.mxu1 %v332_v5 }
   0xc   :  { %289 = vmatprep.subr.bf16.mxu0 %v333_v6  ;;  %314 = vmatprep.subr.bf16.mxu1 %v333_v6 }
   0xf   :  { %290 = vmatpush3.bf16.msra.mxu0 %v334_v7  ;;  %322 = vmatpush3.bf16.msra.mxu1 %v334_v7 }
  0x10   :  { %291 = vmatprep.subr.bf16.mxu0 %v335_v8  ;;  %315 = vmatprep.subr.bf16.mxu1 %v335_v8 }
  0x13   :  { %292 = vmatpush3.bf16.msra.mxu0 %v336_v9  ;;  %323 = vmatpush3.bf16.msra.mxu1 %v336_v9 }
  0x14   :  { %293 = vmatprep.subr.bf16.mxu0 %v337_v10  ;;  %316 = vmatprep.subr.bf16.mxu1 %v337_v10 }
  0x17   :  { %294 = vmatpush3.bf16.msra.mxu0 %v338_v13  ;;  %324 = vmatpush3.bf16.msra.mxu1 %v338_v13 }
  0x18   :  { %295 = vmatprep.subr.bf16.mxu0 %v339_v14  ;;  %317 = vmatprep.subr.bf16.mxu1 %v339_v14 }
  0x1b   :  { %296 = vmatpush3.bf16.msra.mxu0 %v340_v15  ;;  %325 = vmatpush3.bf16.msra.mxu1 %v340_v15 }
  0x1c   :  { %297 = vmatprep.subr.bf16.mxu0 %v341_v16  ;;  %318 = vmatprep.subr.bf16.mxu1 %v341_v16 }
  0x1f   :  { %298 = vmatpush3.bf16.msra.mxu0 %v342_v17  ;;  %326 = vmatpush3.bf16.msra.mxu1 %v342_v17 }
  0x22   :  { %212 = vmatmul.mubr.bf16.vlgmr.msra.gmra.mxu0 %v343_v18  ;;  %220 = vmatmul.mubr.bf16.vlgmr.msra.gmra.mxu1 %v346_v19 }
  0xe2   :  { %v299_v20 = vpop.f32.mrf.mxu0  ;;  %v305_v21 = vpop.f32.mrf.mxu1 }
  0xe4   :  { %v300_v22 = vpop.f32.mrf.mxu0  ;;  %v306_v24 = vpop.f32.mrf.mxu1 }
  0xe5   :  { %v301_v25 = vadd.f32 %v300_v22, %v299_v20  ;;  %v307_v26 = vadd.f32 %v306_v24, %v305_v21 }
  0xe6   :  { %v302_v27 = vpop.f32.mrf.mxu0  ;;  %v308_v28 = vpop.f32.mrf.mxu1 }
  0xe7   :  { %v250_v29 = vadd.f32 %v301_v25, %v282_v23  ;;  %v252_v30 = vadd.f32 %v307_v26, %v282_v23 }
  0xe8   :  { %v303_v31 = vpop.f32.mrf.mxu0  ;;  %v309_v32 = vpop.f32.mrf.mxu1 }
  0xe9   :  { %254 = vst [vmem:[%s447_s3] sm:$0xff] %v250_v29  ;;  %256 = vst [vmem:[%s447_s3 + $0x10] sm:$0xff] %v252_v30  ;;  %v304_v33 = vadd.f32 %v303_v31, %v302_v27  ;;  %v310_v34 = vadd.f32 %v309_v32, %v308_v28 }
  0xeb   :  { %v251_v35 = vadd.f32 %v304_v33, %v282_v23  ;;  %v253_v36 = vadd.f32 %v310_v34, %v282_v23 }
  0xed   :  { %255 = vst [vmem:[%s447_s3 + $0x8] sm:$0xff] %v251_v35  ;;  %257 = vst [vmem:[%s447_s3 + $0x18] sm:$0xff] %v253_v36 }

// kernel: generator_forward.31
= control target key start
LH: loop header
LB: loop body
LE: loop exit
PB: predicated region body
PF: predicated region fallthrough
CT: control target
= control target key end

     0   :  { %s928_s1 = inlined_call_operand.vmem [shape: bf16[512,256], index: 1, kind: input, shape index: {}]   ;;  %s929_s0 = inlined_call_operand.vmem [shape: bf16[8,512], index: 0, kind: input, shape index: {}]   ;;  %s930_s2 = inlined_call_operand.vmem [shape: f32[1,256], index: 2, kind: input, shape index: {}]   ;;  %s931_s3 = inlined_call_operand.vmem [shape: f32[8,256], index: 3, kind: output, shape index: {}]  }
   0x1   :  { %v601_v0 = vld [vmem:[%s928_s1 + $0x74] ss:$8 sps:$4 sm:$0xff]   ;;  %v605_v2 = vld [vmem:[%s928_s1 + $0x70] ss:$8 sps:$4 sm:$0xff]   ;;  %v607_v4 = vld [vmem:[%s928_s1 + $0x64] ss:$8 sps:$4 sm:$0xff]  }
   0x2   :  { %v603_v1 = vld [vmem:[%s928_s1 + $0x174] ss:$8 sps:$4 sm:$0xff]   ;;  %422 = vmatprep.subr.bf16.mxu0 %v601_v0  ;;  %v606_v3 = vld [vmem:[%s928_s1 + $0x170] ss:$8 sps:$4 sm:$0xff]   ;;  %v609_v5 = vld [vmem:[%s928_s1 + $0x164] ss:$8 sps:$4 sm:$0xff]  }
   0x3   :  { %463 = vmatprep.subr.bf16.mxu1 %v603_v1  ;;  %423 = vmatpush1.bf16.msra.mxu0 %v605_v2  ;;  %v611_v6 = vld [vmem:[%s928_s1 + $0x60] ss:$8 sps:$4 sm:$0xff]   ;;  %v613_v8 = vld [vmem:[%s928_s1 + $0x54] ss:$8 sps:$4 sm:$0xff]   ;;  %v617_v10 = vld [vmem:[%s928_s1 + $0x50] ss:$8 sps:$4 sm:$0xff]  }
   0x4   :  { %464 = vmatpush1.bf16.msra.mxu1 %v606_v3  ;;  %424 = vmatprep.subr.bf16.mxu0 %v607_v4  ;;  %v612_v7 = vld [vmem:[%s928_s1 + $0x160] ss:$8 sps:$4 sm:$0xff]   ;;  %v615_v9 = vld [vmem:[%s928_s1 + $0x154] ss:$8 sps:$4 sm:$0xff]   ;;  %v618_v11 = vld [vmem:[%s928_s1 + $0x150] ss:$8 sps:$4 sm:$0xff]  }
   0x5   :  { %465 = vmatprep.subr.bf16.mxu1 %v609_v5  ;;  %v619_v12 = vld [vmem:[%s928_s1 + $0x44] ss:$8 sps:$4 sm:$0xff]   ;;  %v623_v14 = vld [vmem:[%s928_s1 + $0x40] ss:$8 sps:$4 sm:$0xff]   ;;  %v625_v16 = vld [vmem:[%s928_s1 + $0x34] ss:$8 sps:$4 sm:$0xff]  }
   0x6   :  { %v621_v13 = vld [vmem:[%s928_s1 + $0x144] ss:$8 sps:$4 sm:$0xff]   ;;  %v624_v15 = vld [vmem:[%s928_s1 + $0x140] ss:$8 sps:$4 sm:$0xff]   ;;  %v627_v17 = vld [vmem:[%s928_s1 + $0x134] ss:$8 sps:$4 sm:$0xff]  }
   0x7   :  { %425 = vmatpush1.bf16.msra.mxu0 %v611_v6  ;;  %v629_v18 = vld [vmem:[%s928_s1 + $0x30] ss:$8 sps:$4 sm:$0xff]   ;;  %v631_v20 = vld [vmem:[%s928_s1 + $0x24] ss:$8 sps:$4 sm:$0xff]   ;;  %v635_v22 = vld [vmem:[%s928_s1 + $0x20] ss:$8 sps:$4 sm:$0xff]   ;;  %v515_v6 = vlaneseq }
   0x8   :  { %466 = vmatpush1.bf16.msra.mxu1 %v612_v7  ;;  %426 = vmatprep.subr.bf16.mxu0 %v613_v8  ;;  %v630_v19 = vld [vmem:[%s928_s1 + $0x130] ss:$8 sps:$4 sm:$0xff]   ;;  %v633_v21 = vld [vmem:[%s928_s1 + $0x124] ss:$8 sps:$4 sm:$0xff]   ;;  %v636_v23 = vld [vmem:[%s928_s1 + $0x120] ss:$8 sps:$4 sm:$0xff]  }
   0x9   :  { %467 = vmatprep.subr.bf16.mxu1 %v615_v9  ;;  %v637_v24 = vld [vmem:[%s928_s1 + $0x14] ss:$8 sps:$4 sm:$0xff]   ;;  %v641_v26 = vld [vmem:[%s928_s1 + $0x10] ss:$8 sps:$4 sm:$0xff]   ;;  %v643_v28 = vld [vmem:[%s928_s1 + $0x4] ss:$8 sps:$4 sm:$0xff]  }
   0xa   :  { %v639_v25 = vld [vmem:[%s928_s1 + $0x114] ss:$8 sps:$4 sm:$0xff]   ;;  %v642_v27 = vld [vmem:[%s928_s1 + $0x110] ss:$8 sps:$4 sm:$0xff]   ;;  %v645_v29 = vld [vmem:[%s928_s1 + $0x104] ss:$8 sps:$4 sm:$0xff]  }
   0xb   :  { %427 = vmatpush1.bf16.msra.mxu0 %v617_v10  ;;  %v647_v30 = vld [vmem:[%s928_s1] ss:$8 sps:$4 sm:$0xff]   ;;  %v649_v32 = vld [vmem:[%s928_s1 + $0xf4] ss:$8 sps:$4 sm:$0xff]   ;;  %v653_v34 = vld [vmem:[%s928_s1 + $0xf0] ss:$8 sps:$4 sm:$0xff]  }
   0xc   :  { %468 = vmatpush1.bf16.msra.mxu1 %v618_v11  ;;  %428 = vmatprep.subr.bf16.mxu0 %v619_v12  ;;  %v648_v31 = vld [vmem:[%s928_s1 + $0x100] ss:$8 sps:$4 sm:$0xff]   ;;  %v651_v33 = vld [vmem:[%s928_s1 + $0x1f4] ss:$8 sps:$4 sm:$0xff]   ;;  %v654_v35 = vld [vmem:[%s928_s1 + $0x1f0] ss:$8 sps:$4 sm:$0xff]  }
   0xd   :  { %469 = vmatprep.subr.bf16.mxu1 %v621_v13  ;;  %v655_v36 = vld [vmem:[%s928_s1 + $0xe4] ss:$8 sps:$4 sm:$0xff]   ;;  %v659_v38 = vld [vmem:[%s928_s1 + $0xe0] ss:$8 sps:$4 sm:$0xff]   ;;  %v661_v40 = vld [vmem:[%s928_s1 + $0xd4] ss:$8 sps:$4 sm:$0xff]  }
   0xe   :  { %v657_v37 = vld [vmem:[%s928_s1 + $0x1e4] ss:$8 sps:$4 sm:$0xff]   ;;  %v660_v39 = vld [vmem:[%s928_s1 + $0x1e0] ss:$8 sps:$4 sm:$0xff]   ;;  %v663_v41 = vld [vmem:[%s928_s1 + $0x1d4] ss:$8 sps:$4 sm:$0xff]  }
   0xf   :  { %429 = vmatpush1.bf16.msra.mxu0 %v623_v14  ;;  %v665_v42 = vld [vmem:[%s928_s1 + $0xd0] ss:$8 sps:$4 sm:$0xff]   ;;  %v667_v44 = vld [vmem:[%s928_s1 + $0xc4] ss:$8 sps:$4 sm:$0xff]   ;;  %v671_v49 = vld [vmem:[%s928_s1 + $0xc0] ss:$8 sps:$4 sm:$0xff]  }
  0x10   :  { %470 = vmatpush1.bf16.msra.mxu1 %v624_v15  ;;  %430 = vmatprep.subr.bf16.mxu0 %v625_v16  ;;  %v666_v43 = vld [vmem:[%s928_s1 + $0x1d0] ss:$8 sps:$4 sm:$0xff]   ;;  %v669_v45 = vld [vmem:[%s928_s1 + $0x1c4] ss:$8 sps:$4 sm:$0xff]   ;;  %v672_v50 = vld [vmem:[%s928_s1 + $0x1c0] ss:$8 sps:$4 sm:$0xff]  }
  0x11   :  { %471 = vmatprep.subr.bf16.mxu1 %v627_v17  ;;  %v22_v46 = vld [vmem:[%s929_s0] sm:$0xff]  ;;  %v23_v48 = vld [vmem:[%s929_s0 + $0x8] sm:$0xff]  ;;  %v673_v52 = vld [vmem:[%s928_s1 + $0xb4] ss:$8 sps:$4 sm:$0xff]   ;;  %v516_v7 = vshrl.u32 %v515_v6, 7 }
  0x12   :  { %v534_v47 = vcombine.high %v22_v46, %v22_v46  ;;  %v536_v51 = vcombine.high %v23_v48, %v23_v48  ;;  %v675_v53 = vld [vmem:[%s928_s1 + $0x1b4] ss:$8 sps:$4 sm:$0xff]   ;;  %v677_v54 = vld [vmem:[%s928_s1 + $0xb0] ss:$8 sps:$4 sm:$0xff]   ;;  %v679_v56 = vld [vmem:[%s928_s1 + $0xa4] ss:$8 sps:$4 sm:$0xff]   ;;  %v533_v4 = vcombine.low %v22_v46, %v22_v46  ;;  %v535_v5 = vcombine.low %v23_v48, %v23_v48 }
  0x13   :  { %431 = vmatpush1.bf16.msra.mxu0 %v629_v18  ;;  %v678_v55 = vld [vmem:[%s928_s1 + $0x1b0] ss:$8 sps:$4 sm:$0xff]   ;;  %v681_v57 = vld [vmem:[%s928_s1 + $0x1a4] ss:$8 sps:$4 sm:$0xff]   ;;  %v683_v58 = vld [vmem:[%s928_s1 + $0xa0] ss:$8 sps:$4 sm:$0xff]  }
  0x14   :  { %472 = vmatpush1.bf16.msra.mxu1 %v630_v19  ;;  %432 = vmatprep.subr.bf16.mxu0 %v631_v20  ;;  %v684_v59 = vld [vmem:[%s928_s1 + $0x1a0] ss:$8 sps:$4 sm:$0xff]   ;;  %v685_v60 = vld [vmem:[%s928_s1 + $0x94] ss:$8 sps:$4 sm:$0xff]   ;;  %v689_v62 = vld [vmem:[%s928_s1 + $0x90] ss:$8 sps:$4 sm:$0xff]  }
  0x15   :  { %473 = vmatprep.subr.bf16.mxu1 %v633_v21  ;;  %454 = vmatprep.mubr.bf16.mxu0 %v534_v47  ;;  %v687_v61 = vld [vmem:[%s928_s1 + $0x194] ss:$8 sps:$4 sm:$0xff]   ;;  %v690_v63 = vld [vmem:[%s928_s1 + $0x190] ss:$8 sps:$4 sm:$0xff]   ;;  %v691_v0 = vld [vmem:[%s928_s1 + $0x84] ss:$8 sps:$4 sm:$0xff]  }
  0x16   :  { %495 = vmatprep.mubr.bf16.mxu1 %v536_v51  ;;  %v693_v1 = vld [vmem:[%s928_s1 + $0x184] ss:$8 sps:$4 sm:$0xff]   ;;  %v695_v2 = vld [vmem:[%s928_s1 + $0x80] ss:$8 sps:$4 sm:$0xff]   ;;  %v517_v8 = vsub.s32 0, %v516_v7  ;;  %v521_v10 = vsub.s32 1, %v516_v7 }
  0x17   :  { %433 = vmatpush1.bf16.msra.mxu0 %v635_v22  ;;  %v696_v3 = vld [vmem:[%s928_s1 + $0x180] ss:$8 sps:$4 sm:$0xff]  }
  0x18   :  { %474 = vmatpush1.bf16.msra.mxu1 %v636_v23  ;;  %434 = vmatprep.subr.bf16.mxu0 %v637_v24  ;;  %v513_v9 = vld [vmem:[%s930_s2] sm:$0x3] }
  0x19   :  { %475 = vmatprep.subr.bf16.mxu1 %v639_v25  ;;  %v518_v11 = vrot.slane %v513_v9, %v517_v8  ;;  %v522_v15 = vrot.slane %v513_v9, %v521_v10 }
  0x1b   :  { %435 = vmatpush1.bf16.msra.mxu0 %v641_v26 }
  0x1c   :  { %476 = vmatpush1.bf16.msra.mxu1 %v642_v27  ;;  %436 = vmatprep.subr.bf16.mxu0 %v643_v28 }
  0x1d   :  { %477 = vmatprep.subr.bf16.mxu1 %v645_v29 }
  0x1f   :  { %437 = vmatpush1.bf16.msra.mxu0 %v647_v30 }
  0x20   :  { %478 = vmatpush1.bf16.msra.mxu1 %v648_v31  ;;  %438 = vmatprep.subr.bf16.mxu0 %v649_v32 }
  0x21   :  { %479 = vmatprep.subr.bf16.mxu1 %v651_v33 }
  0x23   :  { %439 = vmatpush2.bf16.msra.mxu0 %v653_v34 }
  0x24   :  { %480 = vmatpush2.bf16.msra.mxu1 %v654_v35  ;;  %440 = vmatprep.subr.bf16.mxu0 %v655_v36 }
  0x25   :  { %481 = vmatprep.subr.bf16.mxu1 %v657_v37 }
  0x27   :  { %441 = vmatpush2.bf16.msra.mxu0 %v659_v38 }
  0x28   :  { %482 = vmatpush2.bf16.msra.mxu1 %v660_v39  ;;  %442 = vmatprep.subr.bf16.mxu0 %v661_v40 }
  0x29   :  { %483 = vmatprep.subr.bf16.mxu1 %v663_v41 }
  0x2b   :  { %443 = vmatpush2.bf16.msra.mxu0 %v665_v42 }
  0x2c   :  { %484 = vmatpush2.bf16.msra.mxu1 %v666_v43  ;;  %444 = vmatprep.subr.bf16.mxu0 %v667_v44 }
  0x2d   :  { %485 = vmatprep.subr.bf16.mxu1 %v669_v45 }
  0x2f   :  { %445 = vmatpush2.bf16.msra.mxu0 %v671_v49 }
  0x30   :  { %486 = vmatpush2.bf16.msra.mxu1 %v672_v50  ;;  %446 = vmatprep.subr.bf16.mxu0 %v673_v52 }
  0x31   :  { %487 = vmatprep.subr.bf16.mxu1 %v675_v53 }
  0x33   :  { %447 = vmatpush2.bf16.msra.mxu0 %v677_v54 }
  0x34   :  { %488 = vmatpush2.bf16.msra.mxu1 %v678_v55  ;;  %448 = vmatprep.subr.bf16.mxu0 %v679_v56 }
  0x35   :  { %489 = vmatprep.subr.bf16.mxu1 %v681_v57 }
  0x37   :  { %449 = vmatpush2.bf16.msra.mxu0 %v683_v58 }
  0x38   :  { %490 = vmatpush2.bf16.msra.mxu1 %v684_v59  ;;  %450 = vmatprep.subr.bf16.mxu0 %v685_v60 }
  0x39   :  { %491 = vmatprep.subr.bf16.mxu1 %v687_v61 }
  0x3b   :  { %451 = vmatpush2.bf16.msra.mxu0 %v689_v62 }
  0x3c   :  { %492 = vmatpush2.bf16.msra.mxu1 %v690_v63  ;;  %452 = vmatprep.subr.bf16.mxu0 %v691_v0 }
  0x3d   :  { %493 = vmatprep.subr.bf16.mxu1 %v693_v1 }
  0x3f   :  { %453 = vmatpush2.bf16.msra.mxu0 %v695_v2 }
  0x40   :  { %494 = vmatpush2.bf16.msra.mxu1 %v696_v3 }
  0x42   :  { %455 = vmatmul.mubr.bf16.vlgmr.msra.gmra.mxu0 %v533_v4 }
  0x43   :  { %496 = vmatmul.mubr.bf16.vlgmr.msra.gmra.mxu1 %v535_v5 }
 0x102   :  { %v456_v12 = vpop.f32.mrf.mxu0 }
 0x103   :  { %v497_v13 = vpop.f32.mrf.mxu1 }
 0x104   :  { %v498_v14 = vadd.f32 %v497_v13, %v456_v12  ;;  %v458_v16 = vpop.f32.mrf.mxu0 }
 0x105   :  { %v499_v17 = vpop.f32.mrf.mxu1 }
 0x106   :  { %v525_v18 = vadd.f32 %v518_v11, %v498_v14  ;;  %v500_v19 = vadd.f32 %v499_v17, %v458_v16  ;;  %v460_v20 = vpop.f32.mrf.mxu0 }
 0x107   :  { %v501_v21 = vpop.f32.mrf.mxu1 }
 0x108   :  { %527 = vst [vmem:[%s931_s3] sm:$0xff] %v525_v18  ;;  %v526_v22 = vadd.f32 %v522_v15, %v500_v19  ;;  %v461_v23 = vpop.f32.mrf.mxu0 }
 0x109   :  { %v502_v24 = vpop.f32.mrf.mxu1 }
 0x10a   :  { %528 = vst [vmem:[%s931_s3 + $0x8] sm:$0xff] %v526_v22 }

// kernel: generator_forward.32
= control target key start
LH: loop header
LB: loop body
LE: loop exit
PB: predicated region body
PF: predicated region fallthrough
CT: control target
= control target key end

     0   :  { %v18_v0 = vlaneseq  ;;  %s90_s1 = inlined_call_operand.vmem [shape: f32[1,256], index: 1, kind: input, shape index: {}]   ;;  %s91_s2 = inlined_call_operand.vmem [shape: f32[1,256], index: 2, kind: input, shape index: {}]   ;;  %s92_s0 = inlined_call_operand.vmem [shape: f32[8,256], index: 0, kind: input, shape index: {}]   ;;  %s93_s3 = inlined_call_operand.vmem [shape: f32[8,256], index: 3, kind: output, shape index: {}]  }
   0x1   :  { %v16_v2 = vld [vmem:[%s90_s1] sm:$0x3]  ;;  %v15_v7 = vld [vmem:[%s92_s0 + $0x8] sm:$0xff] }
   0x2   :  { %v19_v1 = vshrl.u32 %v18_v0, 7  ;;  %v30_v3 = vld [vmem:[%s91_s2] sm:$0x3] }
   0x3   :  { %v14_v6 = vld [vmem:[%s92_s0] sm:$0xff] }
   0x4   :  { %v20_v4 = vsub.s32 0, %v19_v1  ;;  %v24_v5 = vsub.s32 1, %v19_v1 }
   0x6   :  { %v21_v8 = vrot.slane %v16_v2, %v20_v4  ;;  %v35_v9 = vrot.slane %v30_v3, %v20_v4  ;;  %v25_v10 = vrot.slane %v16_v2, %v24_v5  ;;  %v39_v11 = vrot.slane %v30_v3, %v24_v5 }
   0x8   :  { %v28_v12 = vmul.f32 %v21_v8, %v14_v6  ;;  %v29_v13 = vmul.f32 %v25_v10, %v15_v7 }
   0xa   :  { %v42_v14 = vadd.f32 %v35_v9, %v28_v12  ;;  %v43_v15 = vadd.f32 %v39_v11, %v29_v13 }
   0xc   :  { %v44_v16 = vmax.f32 %v42_v14, 0.0  ;;  %v45_v17 = vmax.f32 %v43_v15, 0.0 }
   0xe   :  { %46 = vst [vmem:[%s93_s3] sm:$0xff] %v44_v16  ;;  %47 = vst [vmem:[%s93_s3 + $0x8] sm:$0xff] %v45_v17 }

// kernel: generator_forward.33
= control target key start
LH: loop header
LB: loop body
LE: loop exit
PB: predicated region body
PF: predicated region fallthrough
CT: control target
= control target key end

     0   :  { %s1513_s12 = smov 0   ;;  %s1515_s13 = smov 0   ;;  %s1825_s0 = inlined_call_operand.vmem [shape: bf16[8,1024], index: 0, kind: input, shape index: {}]   ;;  %s1826_s1 = inlined_call_operand.vmem [shape: bf16[1024,512], index: 1, kind: input, shape index: {}]   ;;  %s1827_s2 = inlined_call_operand.vmem [shape: f32[1,512], index: 2, kind: input, shape index: {}]   ;;  %s1828_s3 = inlined_call_operand.vmem [shape: f32[8,512], index: 3, kind: output, shape index: {}]  }
   0x1   :  { %s1517_s14 = smov 0   ;;  %s1519_s15 = smov 0  }
   0x2   :  { %s1521_s16 = smov 0   ;;  %s1523_s17 = smov 0  }
   0x3   :  { %s1525_s18 = smov 0  }
   0x4 LB: > { %s25_s19 = sadd.s32 1, %s1482_s16  ;;  %s28_s20 = sadd.s32 1, %s1486_s17  ;;  %s1490_s18 = sphi %s1525_s18, %s13_s18   ;;  %s1486_s17 = sphi %s1523_s17, %s1834_s17   ;;  %s1482_s16 = sphi %s1521_s16, %s1833_s16   ;;  %s1478_s15 = sphi %s1519_s15, %s1832_s15   ;;  %s1474_s14 = sphi %s1517_s14, %s1831_s14   ;;  %s1470_s13 = sphi %s1515_s13, %s1830_s13   ;;  %s1466_s12 = sphi %s1513_s12, %s1829_s12  }
   0x5   : > { %p26_p0 = scmp.ge.s32.totalorder %s25_s19, 2  ;;  %p76_p1 = scmp.ne.s32.totalorder %s1470_s13, %s1466_s12 }
   0x6   : > { %p77_p2 = scmp.eq.s32.totalorder %s1490_s18, 0  ;;  %s69_s24 = sadd.s32 1, %s1470_s13 }
   0x7   : > { %s1836_s19 = smov (%p26_p0, %s25_s19), 0  ;;  %s1838_s20 = smov (!%p26_p0, %s28_s20), %s1486_s17 }
   0x8   : > { %p78_p3 = por %p77_p2, %p76_p1  ;;  %p30_p4 = scmp.ge.s32.totalorder %s1838_s20, 2 }
   0x9   : > { %s64_s21 = ssub.s32 %s1482_s16, %s1836_s19  ;;  %p1193_p6 = scmp.ge.s32.totalorder %s1490_s18, 4 }
   0xa   : > { %s1840_s20 = smov (%p30_p4, %s1838_s20), 0 }
   0xb   : > { %s65_s22 = ssub.s32 %s1486_s17, %s1840_s20  ;;  %156 = sbr.rel (%p1193_p6) target bundleno = 55 (0x37), region = 16 }
   0xc   : > { %s66_s23 = sor.u32 %s65_s22, %s64_s21 }
   0xd   : > { %p67_p5 = scmp.eq.s32.totalorder %s66_s23, 0 }
   0xf   : > { %s1564_s25 = scalar_select %p67_p5, %s1470_s13, %s69_s24  }
  0x10   : > { %172 = sbr.rel (!%p78_p3) target bundleno = 55 (0x37), region = 24  ;;  %s174_s26 = sand.u32 (%p78_p3), 1, %s1470_s13  }
  0x11   : > { %s1196_s27 = sshll.u32 (%p78_p3), %s1486_s17, 1  ;;  %s1194_s28 = sshll.u32 (%p78_p3), %s174_s26, 9 }
  0x12   : > { %s1278_s29 = sshll.u32 (%p78_p3), %s1482_s16, 8  ;;  %s1578_s8 = scalar_lea.vmem (%p78_p3), [#allocation3], %s1194_s28 }
  0x13   : > { %s180_s30 = sadd.s32 (%p78_p3), %s1278_s29, %s1196_s27 }
  0x14   : > { %s1198_s4 = sshll.u32 (%p78_p3), %s180_s30, 2 }
  0x15   : > { %s1573_s7 = scalar_lea.vmem %s1826_s1, %s1198_s4 }
  0x16   : > { %v337_v0 = vld [vmem:[%s1573_s7] sm:$0xff]  ;;  %v339_v1 = vld [vmem:[%s1573_s7 + $0x10] sm:$0xff] }
  0x17   : > { %v341_v2 = vld [vmem:[%s1573_s7 + $0x20] sm:$0xff]  ;;  %338 = vst [vmem:[%s1578_s8] sm:$0xff] %v337_v0  ;;  %340 = vst [vmem:[%s1578_s8 + $0x8] sm:$0xff] %v339_v1  ;;  %v343_v3 = vld [vmem:[%s1573_s7 + $0x30] sm:$0xff] }
  0x18   : > { %342 = vst [vmem:[%s1578_s8 + $0x10] sm:$0xff] %v341_v2  ;;  %v345_v4 = vld [vmem:[%s1573_s7 + $0x40] sm:$0xff]  ;;  %v347_v5 = vld [vmem:[%s1573_s7 + $0x50] sm:$0xff]  ;;  %344 = vst [vmem:[%s1578_s8 + $0x18] sm:$0xff] %v343_v3 }
  0x19   : > { %346 = vst [vmem:[%s1578_s8 + $0x20] sm:$0xff] %v345_v4  ;;  %348 = vst [vmem:[%s1578_s8 + $0x28] sm:$0xff] %v347_v5  ;;  %v349_v6 = vld [vmem:[%s1573_s7 + $0x60] sm:$0xff]  ;;  %v351_v7 = vld [vmem:[%s1573_s7 + $0x70] sm:$0xff] }
  0x1a   : > { %v353_v8 = vld [vmem:[%s1573_s7 + $0x80] sm:$0xff]  ;;  %350 = vst [vmem:[%s1578_s8 + $0x30] sm:$0xff] %v349_v6  ;;  %352 = vst [vmem:[%s1578_s8 + $0x38] sm:$0xff] %v351_v7  ;;  %v355_v9 = vld [vmem:[%s1573_s7 + $0x90] sm:$0xff] }
  0x1b   : > { %354 = vst [vmem:[%s1578_s8 + $0x40] sm:$0xff] %v353_v8  ;;  %v357_v10 = vld [vmem:[%s1573_s7 + $0xa0] sm:$0xff]  ;;  %v359_v11 = vld [vmem:[%s1573_s7 + $0xb0] sm:$0xff]  ;;  %356 = vst [vmem:[%s1578_s8 + $0x48] sm:$0xff] %v355_v9 }
  0x1c   : > { %358 = vst [vmem:[%s1578_s8 + $0x50] sm:$0xff] %v357_v10  ;;  %360 = vst [vmem:[%s1578_s8 + $0x58] sm:$0xff] %v359_v11  ;;  %v361_v12 = vld [vmem:[%s1573_s7 + $0xc0] sm:$0xff]  ;;  %v363_v13 = vld [vmem:[%s1573_s7 + $0xd0] sm:$0xff] }
  0x1d   : > { %v365_v14 = vld [vmem:[%s1573_s7 + $0xe0] sm:$0xff]  ;;  %362 = vst [vmem:[%s1578_s8 + $0x60] sm:$0xff] %v361_v12  ;;  %364 = vst [vmem:[%s1578_s8 + $0x68] sm:$0xff] %v363_v13  ;;  %v367_v15 = vld [vmem:[%s1573_s7 + $0xf0] sm:$0xff] }
  0x1e   : > { %366 = vst [vmem:[%s1578_s8 + $0x70] sm:$0xff] %v365_v14  ;;  %v369_v16 = vld [vmem:[%s1573_s7 + $0x100] sm:$0xff]  ;;  %v371_v17 = vld [vmem:[%s1573_s7 + $0x110] sm:$0xff]  ;;  %368 = vst [vmem:[%s1578_s8 + $0x78] sm:$0xff] %v367_v15 }
  0x1f   : > { %370 = vst [vmem:[%s1578_s8 + $0x80] sm:$0xff] %v369_v16  ;;  %372 = vst [vmem:[%s1578_s8 + $0x88] sm:$0xff] %v371_v17  ;;  %v373_v18 = vld [vmem:[%s1573_s7 + $0x120] sm:$0xff]  ;;  %v375_v19 = vld [vmem:[%s1573_s7 + $0x130] sm:$0xff] }
  0x20   : > { %v377_v20 = vld [vmem:[%s1573_s7 + $0x140] sm:$0xff]  ;;  %374 = vst [vmem:[%s1578_s8 + $0x90] sm:$0xff] %v373_v18  ;;  %376 = vst [vmem:[%s1578_s8 + $0x98] sm:$0xff] %v375_v19  ;;  %v379_v21 = vld [vmem:[%s1573_s7 + $0x150] sm:$0xff] }
  0x21   : > { %378 = vst [vmem:[%s1578_s8 + $0xa0] sm:$0xff] %v377_v20  ;;  %v381_v22 = vld [vmem:[%s1573_s7 + $0x160] sm:$0xff]  ;;  %v383_v23 = vld [vmem:[%s1573_s7 + $0x170] sm:$0xff]  ;;  %380 = vst [vmem:[%s1578_s8 + $0xa8] sm:$0xff] %v379_v21 }
  0x22   : > { %382 = vst [vmem:[%s1578_s8 + $0xb0] sm:$0xff] %v381_v22  ;;  %384 = vst [vmem:[%s1578_s8 + $0xb8] sm:$0xff] %v383_v23  ;;  %v385_v24 = vld [vmem:[%s1573_s7 + $0x180] sm:$0xff]  ;;  %v387_v25 = vld [vmem:[%s1573_s7 + $0x190] sm:$0xff] }
  0x23   : > { %v389_v26 = vld [vmem:[%s1573_s7 + $0x1a0] sm:$0xff]  ;;  %386 = vst [vmem:[%s1578_s8 + $0xc0] sm:$0xff] %v385_v24  ;;  %388 = vst [vmem:[%s1578_s8 + $0xc8] sm:$0xff] %v387_v25  ;;  %v391_v27 = vld [vmem:[%s1573_s7 + $0x1b0] sm:$0xff] }
  0x24   : > { %390 = vst [vmem:[%s1578_s8 + $0xd0] sm:$0xff] %v389_v26  ;;  %v393_v28 = vld [vmem:[%s1573_s7 + $0x1c0] sm:$0xff]  ;;  %v395_v29 = vld [vmem:[%s1573_s7 + $0x1d0] sm:$0xff]  ;;  %392 = vst [vmem:[%s1578_s8 + $0xd8] sm:$0xff] %v391_v27 }
  0x25   : > { %394 = vst [vmem:[%s1578_s8 + $0xe0] sm:$0xff] %v393_v28  ;;  %396 = vst [vmem:[%s1578_s8 + $0xe8] sm:$0xff] %v395_v29  ;;  %v397_v30 = vld [vmem:[%s1573_s7 + $0x1e0] sm:$0xff]  ;;  %v399_v31 = vld [vmem:[%s1573_s7 + $0x1f0] sm:$0xff] }
  0x26   : > { %v401_v32 = vld [vmem:[%s1573_s7 + $0x200] sm:$0xff]  ;;  %398 = vst [vmem:[%s1578_s8 + $0xf0] sm:$0xff] %v397_v30  ;;  %400 = vst [vmem:[%s1578_s8 + $0xf8] sm:$0xff] %v399_v31  ;;  %v403_v33 = vld [vmem:[%s1573_s7 + $0x210] sm:$0xff] }
  0x27   : > { %402 = vst [vmem:[%s1578_s8 + $0x100] sm:$0xff] %v401_v32  ;;  %v405_v34 = vld [vmem:[%s1573_s7 + $0x220] sm:$0xff]  ;;  %v407_v35 = vld [vmem:[%s1573_s7 + $0x230] sm:$0xff]  ;;  %404 = vst [vmem:[%s1578_s8 + $0x108] sm:$0xff] %v403_v33 }
  0x28   : > { %406 = vst [vmem:[%s1578_s8 + $0x110] sm:$0xff] %v405_v34  ;;  %408 = vst [vmem:[%s1578_s8 + $0x118] sm:$0xff] %v407_v35  ;;  %v409_v36 = vld [vmem:[%s1573_s7 + $0x240] sm:$0xff]  ;;  %v411_v37 = vld [vmem:[%s1573_s7 + $0x250] sm:$0xff] }
  0x29   : > { %v413_v38 = vld [vmem:[%s1573_s7 + $0x260] sm:$0xff]  ;;  %410 = vst [vmem:[%s1578_s8 + $0x120] sm:$0xff] %v409_v36  ;;  %412 = vst [vmem:[%s1578_s8 + $0x128] sm:$0xff] %v411_v37  ;;  %v415_v39 = vld [vmem:[%s1573_s7 + $0x270] sm:$0xff] }
  0x2a   : > { %414 = vst [vmem:[%s1578_s8 + $0x130] sm:$0xff] %v413_v38  ;;  %v417_v40 = vld [vmem:[%s1573_s7 + $0x280] sm:$0xff]  ;;  %v419_v41 = vld [vmem:[%s1573_s7 + $0x290] sm:$0xff]  ;;  %416 = vst [vmem:[%s1578_s8 + $0x138] sm:$0xff] %v415_v39 }
  0x2b   : > { %418 = vst [vmem:[%s1578_s8 + $0x140] sm:$0xff] %v417_v40  ;;  %420 = vst [vmem:[%s1578_s8 + $0x148] sm:$0xff] %v419_v41  ;;  %v421_v42 = vld [vmem:[%s1573_s7 + $0x2a0] sm:$0xff]  ;;  %v423_v43 = vld [vmem:[%s1573_s7 + $0x2b0] sm:$0xff] }
  0x2c   : > { %v425_v44 = vld [vmem:[%s1573_s7 + $0x2c0] sm:$0xff]  ;;  %422 = vst [vmem:[%s1578_s8 + $0x150] sm:$0xff] %v421_v42  ;;  %424 = vst [vmem:[%s1578_s8 + $0x158] sm:$0xff] %v423_v43  ;;  %v427_v45 = vld [vmem:[%s1573_s7 + $0x2d0] sm:$0xff] }
  0x2d   : > { %426 = vst [vmem:[%s1578_s8 + $0x160] sm:$0xff] %v425_v44  ;;  %v429_v46 = vld [vmem:[%s1573_s7 + $0x2e0] sm:$0xff]  ;;  %v431_v47 = vld [vmem:[%s1573_s7 + $0x2f0] sm:$0xff]  ;;  %428 = vst [vmem:[%s1578_s8 + $0x168] sm:$0xff] %v427_v45 }
  0x2e   : > { %430 = vst [vmem:[%s1578_s8 + $0x170] sm:$0xff] %v429_v46  ;;  %432 = vst [vmem:[%s1578_s8 + $0x178] sm:$0xff] %v431_v47  ;;  %v433_v48 = vld [vmem:[%s1573_s7 + $0x300] sm:$0xff]  ;;  %v435_v49 = vld [vmem:[%s1573_s7 + $0x310] sm:$0xff] }
  0x2f   : > { %v437_v50 = vld [vmem:[%s1573_s7 + $0x320] sm:$0xff]  ;;  %434 = vst [vmem:[%s1578_s8 + $0x180] sm:$0xff] %v433_v48  ;;  %436 = vst [vmem:[%s1578_s8 + $0x188] sm:$0xff] %v435_v49  ;;  %v439_v51 = vld [vmem:[%s1573_s7 + $0x330] sm:$0xff] }
  0x30   : > { %438 = vst [vmem:[%s1578_s8 + $0x190] sm:$0xff] %v437_v50  ;;  %v441_v52 = vld [vmem:[%s1573_s7 + $0x340] sm:$0xff]  ;;  %v443_v53 = vld [vmem:[%s1573_s7 + $0x350] sm:$0xff]  ;;  %440 = vst [vmem:[%s1578_s8 + $0x198] sm:$0xff] %v439_v51 }
  0x31   : > { %442 = vst [vmem:[%s1578_s8 + $0x1a0] sm:$0xff] %v441_v52  ;;  %444 = vst [vmem:[%s1578_s8 + $0x1a8] sm:$0xff] %v443_v53  ;;  %v445_v54 = vld [vmem:[%s1573_s7 + $0x360] sm:$0xff]  ;;  %v447_v55 = vld [vmem:[%s1573_s7 + $0x370] sm:$0xff] }
  0x32   : > { %v449_v56 = vld [vmem:[%s1573_s7 + $0x380] sm:$0xff]  ;;  %446 = vst [vmem:[%s1578_s8 + $0x1b0] sm:$0xff] %v445_v54  ;;  %448 = vst [vmem:[%s1578_s8 + $0x1b8] sm:$0xff] %v447_v55  ;;  %v451_v57 = vld [vmem:[%s1573_s7 + $0x390] sm:$0xff] }
  0x33   : > { %450 = vst [vmem:[%s1578_s8 + $0x1c0] sm:$0xff] %v449_v56  ;;  %v453_v58 = vld [vmem:[%s1573_s7 + $0x3a0] sm:$0xff]  ;;  %v455_v59 = vld [vmem:[%s1573_s7 + $0x3b0] sm:$0xff]  ;;  %452 = vst [vmem:[%s1578_s8 + $0x1c8] sm:$0xff] %v451_v57 }
  0x34   : > { %454 = vst [vmem:[%s1578_s8 + $0x1d0] sm:$0xff] %v453_v58  ;;  %456 = vst [vmem:[%s1578_s8 + $0x1d8] sm:$0xff] %v455_v59  ;;  %v457_v60 = vld [vmem:[%s1573_s7 + $0x3c0] sm:$0xff]  ;;  %v459_v61 = vld [vmem:[%s1573_s7 + $0x3d0] sm:$0xff] }
  0x35   : > { %v461_v62 = vld [vmem:[%s1573_s7 + $0x3e0] sm:$0xff]  ;;  %458 = vst [vmem:[%s1578_s8 + $0x1e0] sm:$0xff] %v457_v60  ;;  %460 = vst [vmem:[%s1578_s8 + $0x1e8] sm:$0xff] %v459_v61  ;;  %v463_v63 = vld [vmem:[%s1573_s7 + $0x3f0] sm:$0xff] }
  0x36   : > { %462 = vst [vmem:[%s1578_s8 + $0x1f0] sm:$0xff] %v461_v62  ;;  %464 = vst [vmem:[%s1578_s8 + $0x1f8] sm:$0xff] %v463_v63 }
  0x37 PF: > { %p1199_p7 = scmp.ge.s32.totalorder %s1490_s18, 1  ;;  %p477_p8 = scmp.lt.s32.totalorder %s1490_s18, 5 }
  0x39   : > { %p478_p9 = pnand %p1199_p7, %p477_p8 }
  0x3a   : > { %s484_s9 = sand.u32 (!%p478_p9), 1, %s1466_s12   ;;  %s1201_s10 = sshll.u32 (!%p478_p9), %s1474_s14, 2 }
  0x3b   : > { %481 = sbr.rel (%p478_p9) target bundleno = 351 (0x15f), region = 66  ;;  %s1200_s11 = sshll.u32 (!%p478_p9), %s484_s9, 9 }
  0x3c   : > { %p527_p10 = scmp.lt.s32.totalorder (!%p478_p9), %s1201_s10, 7  ;;  %s1203_s21 = sshll.u32 (!%p478_p9), %s1478_s15, 1 }
  0x3d   : > { %p537_p11 = scmp.lt.s32.totalorder (!%p478_p9), %s1203_s21, 3  ;;  %s1727_s5 = scalar_lea.vmem (!%p478_p9), [#allocation3], %s1200_s11 }
  0x3e   : > { %p1206_p12 = scmp.ne.s32.totalorder (!%p478_p9), %s1474_s14, 0 }
  0x40   : > { %s1842_s10 = smov (!%p527_p10, %s1201_s10), 7  ;;  %s1844_s21 = smov (!%p537_p11, %s1203_s21), 3 }
  0x41   : > { %s1202_s22 = sshll.u32 %s1842_s10, 2  ;;  %s539_s12 = scalar_lea.vmem %s1827_s2, %s1844_s21 }
  0x42   : > { %s1713_s26 = scalar_lea.vmem %s1825_s0, %s1202_s22  ;;  %s1205_s29 = sshll.u32 %s1844_s21, 3 }
  0x43   : > { %s1725_s15 = scalar_lea.vmem %s1828_s3, %s1205_s29  ;;  %554 = sbr.rel (%p1206_p12) target bundleno = 74 (0x4a), region = 74 }
  0x48   : > { %v1492_v0 = vmov 0.0  }
  0x49   : > { %555 = vst [vmem:[#allocation2] sm:$0xff] %v1492_v0  ;;  %556 = vst [vmem:[#allocation2 + $0x8] sm:$0xff] %v1492_v0 }
  0x4a PF: > { %v1336_v1 = vld [vmem:[%s1727_s5 + $0x74] ss:$8 sps:$4 sm:$0xff]   ;;  %v1340_v3 = vld [vmem:[%s1727_s5 + $0x70] ss:$8 sps:$4 sm:$0xff]   ;;  %v1342_v5 = vld [vmem:[%s1727_s5 + $0x64] ss:$8 sps:$4 sm:$0xff]  }
  0x4b   : > { %v1338_v2 = vld [vmem:[%s1727_s5 + $0x174] ss:$8 sps:$4 sm:$0xff]   ;;  %959 = vmatprep.subr.bf16.mxu0 %v1336_v1  ;;  %v1341_v4 = vld [vmem:[%s1727_s5 + $0x170] ss:$8 sps:$4 sm:$0xff]   ;;  %v1344_v6 = vld [vmem:[%s1727_s5 + $0x164] ss:$8 sps:$4 sm:$0xff]  }
  0x4c   : > { %1000 = vmatprep.subr.bf16.mxu1 %v1338_v2  ;;  %960 = vmatpush1.bf16.msra.mxu0 %v1340_v3  ;;  %v1346_v7 = vld [vmem:[%s1727_s5 + $0x60] ss:$8 sps:$4 sm:$0xff]   ;;  %v1348_v9 = vld [vmem:[%s1727_s5 + $0x54] ss:$8 sps:$4 sm:$0xff]   ;;  %v1352_v11 = vld [vmem:[%s1727_s5 + $0x50] ss:$8 sps:$4 sm:$0xff]  }
  0x4d   : > { %1001 = vmatpush1.bf16.msra.mxu1 %v1341_v4  ;;  %961 = vmatprep.subr.bf16.mxu0 %v1342_v5  ;;  %v1347_v8 = vld [vmem:[%s1727_s5 + $0x160] ss:$8 sps:$4 sm:$0xff]   ;;  %v1350_v10 = vld [vmem:[%s1727_s5 + $0x154] ss:$8 sps:$4 sm:$0xff]   ;;  %v1353_v12 = vld [vmem:[%s1727_s5 + $0x150] ss:$8 sps:$4 sm:$0xff]  }
  0x4e   : > { %1002 = vmatprep.subr.bf16.mxu1 %v1344_v6  ;;  %v1354_v13 = vld [vmem:[%s1727_s5 + $0x44] ss:$8 sps:$4 sm:$0xff]   ;;  %v1358_v15 = vld [vmem:[%s1727_s5 + $0x40] ss:$8 sps:$4 sm:$0xff]   ;;  %v1360_v17 = vld [vmem:[%s1727_s5 + $0x34] ss:$8 sps:$4 sm:$0xff]  }
  0x4f   : > { %v1356_v14 = vld [vmem:[%s1727_s5 + $0x144] ss:$8 sps:$4 sm:$0xff]   ;;  %v1359_v16 = vld [vmem:[%s1727_s5 + $0x140] ss:$8 sps:$4 sm:$0xff]   ;;  %v1362_v18 = vld [vmem:[%s1727_s5 + $0x134] ss:$8 sps:$4 sm:$0xff]  }
  0x50   : > { %962 = vmatpush1.bf16.msra.mxu0 %v1346_v7  ;;  %v1364_v19 = vld [vmem:[%s1727_s5 + $0x30] ss:$8 sps:$4 sm:$0xff]   ;;  %v1366_v21 = vld [vmem:[%s1727_s5 + $0x24] ss:$8 sps:$4 sm:$0xff]   ;;  %v1370_v23 = vld [vmem:[%s1727_s5 + $0x20] ss:$8 sps:$4 sm:$0xff]  }
  0x51   : > { %1003 = vmatpush1.bf16.msra.mxu1 %v1347_v8  ;;  %963 = vmatprep.subr.bf16.mxu0 %v1348_v9  ;;  %v1365_v20 = vld [vmem:[%s1727_s5 + $0x130] ss:$8 sps:$4 sm:$0xff]   ;;  %v1368_v22 = vld [vmem:[%s1727_s5 + $0x124] ss:$8 sps:$4 sm:$0xff]   ;;  %v1371_v24 = vld [vmem:[%s1727_s5 + $0x120] ss:$8 sps:$4 sm:$0xff]  }
  0x52   : > { %1004 = vmatprep.subr.bf16.mxu1 %v1350_v10  ;;  %v1372_v25 = vld [vmem:[%s1727_s5 + $0x14] ss:$8 sps:$4 sm:$0xff]   ;;  %v1376_v27 = vld [vmem:[%s1727_s5 + $0x10] ss:$8 sps:$4 sm:$0xff]   ;;  %v1378_v29 = vld [vmem:[%s1727_s5 + $0x4] ss:$8 sps:$4 sm:$0xff]  }
  0x53   : > { %v1374_v26 = vld [vmem:[%s1727_s5 + $0x114] ss:$8 sps:$4 sm:$0xff]   ;;  %v1377_v28 = vld [vmem:[%s1727_s5 + $0x110] ss:$8 sps:$4 sm:$0xff]   ;;  %v1380_v30 = vld [vmem:[%s1727_s5 + $0x104] ss:$8 sps:$4 sm:$0xff]  }
  0x54   : > { %964 = vmatpush1.bf16.msra.mxu0 %v1352_v11  ;;  %v1382_v31 = vld [vmem:[%s1727_s5] ss:$8 sps:$4 sm:$0xff]   ;;  %v1384_v33 = vld [vmem:[%s1727_s5 + $0xf4] ss:$8 sps:$4 sm:$0xff]   ;;  %v1388_v35 = vld [vmem:[%s1727_s5 + $0xf0] ss:$8 sps:$4 sm:$0xff]  }
  0x55   : > { %1005 = vmatpush1.bf16.msra.mxu1 %v1353_v12  ;;  %965 = vmatprep.subr.bf16.mxu0 %v1354_v13  ;;  %v1383_v32 = vld [vmem:[%s1727_s5 + $0x100] ss:$8 sps:$4 sm:$0xff]   ;;  %v1386_v34 = vld [vmem:[%s1727_s5 + $0x1f4] ss:$8 sps:$4 sm:$0xff]   ;;  %v1389_v36 = vld [vmem:[%s1727_s5 + $0x1f0] ss:$8 sps:$4 sm:$0xff]  }
  0x56   : > { %1006 = vmatprep.subr.bf16.mxu1 %v1356_v14  ;;  %v1390_v37 = vld [vmem:[%s1727_s5 + $0xe4] ss:$8 sps:$4 sm:$0xff]   ;;  %v1394_v39 = vld [vmem:[%s1727_s5 + $0xe0] ss:$8 sps:$4 sm:$0xff]   ;;  %v1396_v41 = vld [vmem:[%s1727_s5 + $0xd4] ss:$8 sps:$4 sm:$0xff]  }
  0x57   : > { %v1392_v38 = vld [vmem:[%s1727_s5 + $0x1e4] ss:$8 sps:$4 sm:$0xff]   ;;  %v1395_v40 = vld [vmem:[%s1727_s5 + $0x1e0] ss:$8 sps:$4 sm:$0xff]   ;;  %v1398_v42 = vld [vmem:[%s1727_s5 + $0x1d4] ss:$8 sps:$4 sm:$0xff]  }
  0x58   : > { %966 = vmatpush1.bf16.msra.mxu0 %v1358_v15  ;;  %v1400_v43 = vld [vmem:[%s1727_s5 + $0xd0] ss:$8 sps:$4 sm:$0xff]   ;;  %v1402_v45 = vld [vmem:[%s1727_s5 + $0xc4] ss:$8 sps:$4 sm:$0xff]   ;;  %v1406_v50 = vld [vmem:[%s1727_s5 + $0xc0] ss:$8 sps:$4 sm:$0xff]  }
  0x59   : > { %1007 = vmatpush1.bf16.msra.mxu1 %v1359_v16  ;;  %967 = vmatprep.subr.bf16.mxu0 %v1360_v17  ;;  %v1401_v44 = vld [vmem:[%s1727_s5 + $0x1d0] ss:$8 sps:$4 sm:$0xff]   ;;  %v1404_v46 = vld [vmem:[%s1727_s5 + $0x1c4] ss:$8 sps:$4 sm:$0xff]   ;;  %v1407_v51 = vld [vmem:[%s1727_s5 + $0x1c0] ss:$8 sps:$4 sm:$0xff]  }
  0x5a   : > { %1008 = vmatprep.subr.bf16.mxu1 %v1362_v18  ;;  %v559_v47 = vld [vmem:[%s1713_s26] sm:$0xff]  ;;  %v560_v49 = vld [vmem:[%s1713_s26 + $0x8] sm:$0xff]  ;;  %v1414_v57 = vld [vmem:[%s1727_s5 + $0xa4] ss:$8 sps:$4 sm:$0xff]   ;;  %p1275_p13 = scmp.ne.s32.totalorder %s1474_s14, 1 }
  0x5b   : > { %v1208_v48 = vcombine.high %v559_v47, %v559_v47  ;;  %v1210_v52 = vcombine.high %v560_v49, %v560_v49  ;;  %v1408_v53 = vld [vmem:[%s1727_s5 + $0xb4] ss:$8 sps:$4 sm:$0xff]   ;;  %v1412_v55 = vld [vmem:[%s1727_s5 + $0xb0] ss:$8 sps:$4 sm:$0xff]   ;;  %v1416_v58 = vld [vmem:[%s1727_s5 + $0x1a4] ss:$8 sps:$4 sm:$0xff]   ;;  %v1207_v5 = vcombine.low %v559_v47, %v559_v47  ;;  %v1209_v6 = vcombine.low %v560_v49, %v560_v49 }
  0x5c   : > { %968 = vmatpush1.bf16.msra.mxu0 %v1364_v19  ;;  %v1410_v54 = vld [vmem:[%s1727_s5 + $0x1b4] ss:$8 sps:$4 sm:$0xff]   ;;  %v1413_v56 = vld [vmem:[%s1727_s5 + $0x1b0] ss:$8 sps:$4 sm:$0xff]   ;;  %v1418_v59 = vld [vmem:[%s1727_s5 + $0xa0] ss:$8 sps:$4 sm:$0xff]  }
  0x5d   : > { %1009 = vmatpush1.bf16.msra.mxu1 %v1365_v20  ;;  %969 = vmatprep.subr.bf16.mxu0 %v1366_v21  ;;  %v1419_v60 = vld [vmem:[%s1727_s5 + $0x1a0] ss:$8 sps:$4 sm:$0xff]   ;;  %v1420_v61 = vld [vmem:[%s1727_s5 + $0x94] ss:$8 sps:$4 sm:$0xff]   ;;  %v1424_v63 = vld [vmem:[%s1727_s5 + $0x90] ss:$8 sps:$4 sm:$0xff]  }
  0x5e   : > { %1010 = vmatprep.subr.bf16.mxu1 %v1368_v22  ;;  %991 = vmatprep.mubr.bf16.mxu0 %v1208_v48  ;;  %v1422_v62 = vld [vmem:[%s1727_s5 + $0x194] ss:$8 sps:$4 sm:$0xff]   ;;  %v1425_v0 = vld [vmem:[%s1727_s5 + $0x190] ss:$8 sps:$4 sm:$0xff]   ;;  %v1426_v1 = vld [vmem:[%s1727_s5 + $0x84] ss:$8 sps:$4 sm:$0xff]  }
  0x5f   : > { %1032 = vmatprep.mubr.bf16.mxu1 %v1210_v52  ;;  %v1428_v2 = vld [vmem:[%s1727_s5 + $0x184] ss:$8 sps:$4 sm:$0xff]   ;;  %v1430_v3 = vld [vmem:[%s1727_s5 + $0x80] ss:$8 sps:$4 sm:$0xff]   ;;  %v557_v8 = vld [vmem:[#allocation2] sm:$0xff] }
  0x60   : > { %970 = vmatpush1.bf16.msra.mxu0 %v1370_v23  ;;  %v1431_v4 = vld [vmem:[%s1727_s5 + $0x180] ss:$8 sps:$4 sm:$0xff]   ;;  %v558_v12 = vld [vmem:[#allocation2 + $0x8] sm:$0xff] }
  0x61   : > { %1011 = vmatpush1.bf16.msra.mxu1 %v1371_v24  ;;  %971 = vmatprep.subr.bf16.mxu0 %v1372_v25 }
  0x62   : > { %1012 = vmatprep.subr.bf16.mxu1 %v1374_v26 }
  0x64   : > { %972 = vmatpush1.bf16.msra.mxu0 %v1376_v27 }
  0x65   : > { %1013 = vmatpush1.bf16.msra.mxu1 %v1377_v28  ;;  %973 = vmatprep.subr.bf16.mxu0 %v1378_v29 }
  0x66   : > { %1014 = vmatprep.subr.bf16.mxu1 %v1380_v30 }
  0x68   : > { %974 = vmatpush1.bf16.msra.mxu0 %v1382_v31 }
  0x69   : > { %1015 = vmatpush1.bf16.msra.mxu1 %v1383_v32  ;;  %975 = vmatprep.subr.bf16.mxu0 %v1384_v33 }
  0x6a   : > { %1016 = vmatprep.subr.bf16.mxu1 %v1386_v34 }
  0x6c   : > { %976 = vmatpush2.bf16.msra.mxu0 %v1388_v35 }
  0x6d   : > { %1017 = vmatpush2.bf16.msra.mxu1 %v1389_v36  ;;  %977 = vmatprep.subr.bf16.mxu0 %v1390_v37 }
  0x6e   : > { %1018 = vmatprep.subr.bf16.mxu1 %v1392_v38 }
  0x70   : > { %978 = vmatpush2.bf16.msra.mxu0 %v1394_v39 }
  0x71   : > { %1019 = vmatpush2.bf16.msra.mxu1 %v1395_v40  ;;  %979 = vmatprep.subr.bf16.mxu0 %v1396_v41 }
  0x72   : > { %1020 = vmatprep.subr.bf16.mxu1 %v1398_v42 }
  0x74   : > { %980 = vmatpush2.bf16.msra.mxu0 %v1400_v43 }
  0x75   : > { %1021 = vmatpush2.bf16.msra.mxu1 %v1401_v44  ;;  %981 = vmatprep.subr.bf16.mxu0 %v1402_v45 }
  0x76   : > { %1022 = vmatprep.subr.bf16.mxu1 %v1404_v46 }
  0x78   : > { %982 = vmatpush2.bf16.msra.mxu0 %v1406_v50 }
  0x79   : > { %1023 = vmatpush2.bf16.msra.mxu1 %v1407_v51  ;;  %983 = vmatprep.subr.bf16.mxu0 %v1408_v53 }
  0x7a   : > { %1024 = vmatprep.subr.bf16.mxu1 %v1410_v54 }
  0x7c   : > { %984 = vmatpush2.bf16.msra.mxu0 %v1412_v55 }
  0x7d   : > { %1025 = vmatpush2.bf16.msra.mxu1 %v1413_v56  ;;  %985 = vmatprep.subr.bf16.mxu0 %v1414_v57 }
  0x7e   : > { %1026 = vmatprep.subr.bf16.mxu1 %v1416_v58 }
  0x80   : > { %986 = vmatpush2.bf16.msra.mxu0 %v1418_v59 }
  0x81   : > { %1027 = vmatpush2.bf16.msra.mxu1 %v1419_v60  ;;  %987 = vmatprep.subr.bf16.mxu0 %v1420_v61 }
  0x82   : > { %1028 = vmatprep.subr.bf16.mxu1 %v1422_v62 }
  0x84   : > { %988 = vmatpush2.bf16.msra.mxu0 %v1424_v63 }
  0x85   : > { %1029 = vmatpush2.bf16.msra.mxu1 %v1425_v0  ;;  %989 = vmatprep.subr.bf16.mxu0 %v1426_v1 }
  0x86   : > { %1030 = vmatprep.subr.bf16.mxu1 %v1428_v2 }
  0x88   : > { %990 = vmatpush2.bf16.msra.mxu0 %v1430_v3 }
  0x89   : > { %1031 = vmatpush2.bf16.msra.mxu1 %v1431_v4 }
  0x8b   : > { %992 = vmatmul.mubr.bf16.vlgmr.msra.gmra.mxu0 %v1207_v5 }
  0x8c   : > { %1033 = vmatmul.mubr.bf16.vlgmr.msra.gmra.mxu1 %v1209_v6 }
 0x14b   : > { %v993_v7 = vpop.f32.mrf.mxu0 }
 0x14c   : > { %v1034_v9 = vpop.f32.mrf.mxu1 }
 0x14d   : > { %v1035_v10 = vadd.f32 %v1034_v9, %v993_v7  ;;  %v995_v11 = vpop.f32.mrf.mxu0 }
 0x14e   : > { %v1036_v13 = vpop.f32.mrf.mxu1 }
 0x14f   : > { %v1041_v14 = vadd.f32 %v1035_v10, %v557_v8  ;;  %v1037_v15 = vadd.f32 %v1036_v13, %v995_v11  ;;  %v997_v16 = vpop.f32.mrf.mxu0  ;;  %1048 = sbr.rel (%p1275_p13) target bundleno = 351 (0x15f), region = 78 }
 0x150   : > { %v1038_v17 = vpop.f32.mrf.mxu1 }
 0x151   : > { %1043 = vst [vmem:[#allocation2] sm:$0xff] %v1041_v14  ;;  %v1042_v18 = vadd.f32 %v1037_v15, %v558_v12  ;;  %v998_v19 = vpop.f32.mrf.mxu0 }
 0x152   : > { %v1039_v20 = vpop.f32.mrf.mxu1 }
 0x153   : > { %1044 = vst [vmem:[#allocation2 + $0x8] sm:$0xff] %v1042_v18 }
 0x154   : > { %v1053_v21 = vlaneseq  ;;  %v1051_v23 = vld [vmem:[%s539_s12] sm:$0x3] }
 0x156   : > { %v1054_v22 = vshrl.u32 %v1053_v21, 7 }
 0x158   : > { %v1055_v24 = vsub.s32 0, %v1054_v22  ;;  %v1059_v25 = vsub.s32 1, %v1054_v22  ;;  %v1049_v26 = vld [vmem:[#allocation2] sm:$0xff] }
 0x15a   : > { %v1050_v27 = vld [vmem:[#allocation2 + $0x8] sm:$0xff]  ;;  %v1056_v28 = vrot.slane %v1051_v23, %v1055_v24  ;;  %v1060_v29 = vrot.slane %v1051_v23, %v1059_v25 }
 0x15c   : > { %v1063_v30 = vadd.f32 %v1056_v28, %v1049_v26  ;;  %v1064_v31 = vadd.f32 %v1060_v29, %v1050_v27 }
 0x15e   : > { %1065 = vst [vmem:[%s1725_s15] sm:$0xff] %v1063_v30  ;;  %1066 = vst [vmem:[%s1725_s15 + $0x8] sm:$0xff] %v1064_v31 }
 0x15f PF: > { %s13_s18 = sadd.s32 1, %s1490_s18   ;;  %s1829_s12 = smov %s1470_s13 }
 0x160   : > { %p10_p0 = scmp.ge.s32.totalorder %s13_s18, 6   ;;  %s1830_s13 = smov %s1564_s25 }
 0x161   : > { %s1831_s14 = smov %s1482_s16  ;;  %s1832_s15 = smov %s1486_s17 }
 0x162   : > { %s1833_s16 = smov %s1836_s19  ;;  %s1834_s17 = smov %s1840_s20 }
 0x163   :  { %12 = sbr.rel (!%p10_p0) target bundleno = 4 (0x4), region = 119 }

// kernel: generator_forward.34
= control target key start
LH: loop header
LB: loop body
LE: loop exit
PB: predicated region body
PF: predicated region fallthrough
CT: control target
= control target key end

     0   :  { %v20_v0 = vlaneseq  ;;  %s132_s1 = inlined_call_operand.vmem [shape: f32[1,512], index: 1, kind: input, shape index: {}]   ;;  %s133_s2 = inlined_call_operand.vmem [shape: f32[1,512], index: 2, kind: input, shape index: {}]   ;;  %s134_s0 = inlined_call_operand.vmem [shape: f32[8,512], index: 0, kind: input, shape index: {}]   ;;  %s135_s3 = inlined_call_operand.vmem [shape: f32[8,512], index: 3, kind: output, shape index: {}]  }
   0x1   :  { %v18_v2 = vld [vmem:[%s132_s1] sm:$0xf]  ;;  %v15_v9 = vld [vmem:[%s134_s0 + $0x8] sm:$0xff]  ;;  %v16_v14 = vld [vmem:[%s134_s0 + $0x10] sm:$0xff] }
   0x2   :  { %v21_v1 = vshrl.u32 %v20_v0, 7  ;;  %v44_v3 = vld [vmem:[%s133_s2] sm:$0xf]  ;;  %v17_v15 = vld [vmem:[%s134_s0 + $0x18] sm:$0xff] }
   0x3   :  { %v14_v8 = vld [vmem:[%s134_s0] sm:$0xff] }
   0x4   :  { %v22_v4 = vsub.s32 0, %v21_v1  ;;  %v26_v5 = vsub.s32 1, %v21_v1  ;;  %v30_v6 = vsub.s32 2, %v21_v1  ;;  %v34_v7 = vsub.s32 3, %v21_v1 }
   0x6   :  { %v23_v10 = vrot.slane %v18_v2, %v22_v4  ;;  %v49_v11 = vrot.slane %v44_v3, %v22_v4  ;;  %v27_v12 = vrot.slane %v18_v2, %v26_v5  ;;  %v53_v13 = vrot.slane %v44_v3, %v26_v5 }
   0x7   :  { %v31_v16 = vrot.slane %v18_v2, %v30_v6  ;;  %v57_v17 = vrot.slane %v44_v3, %v30_v6  ;;  %v35_v18 = vrot.slane %v18_v2, %v34_v7  ;;  %v61_v19 = vrot.slane %v44_v3, %v34_v7 }
   0x8   :  { %v40_v20 = vmul.f32 %v23_v10, %v14_v8  ;;  %v41_v21 = vmul.f32 %v27_v12, %v15_v9 }
   0x9   :  { %v42_v22 = vmul.f32 %v31_v16, %v16_v14  ;;  %v43_v23 = vmul.f32 %v35_v18, %v17_v15 }
   0xa   :  { %v66_v24 = vadd.f32 %v49_v11, %v40_v20  ;;  %v67_v25 = vadd.f32 %v53_v13, %v41_v21 }
   0xb   :  { %v68_v26 = vadd.f32 %v57_v17, %v42_v22  ;;  %v69_v27 = vadd.f32 %v61_v19, %v43_v23 }
   0xc   :  { %v70_v28 = vmax.f32 %v66_v24, 0.0  ;;  %v71_v29 = vmax.f32 %v67_v25, 0.0 }
   0xd   :  { %v72_v30 = vmax.f32 %v68_v26, 0.0  ;;  %v73_v31 = vmax.f32 %v69_v27, 0.0 }
   0xe   :  { %74 = vst [vmem:[%s135_s3] sm:$0xff] %v70_v28  ;;  %75 = vst [vmem:[%s135_s3 + $0x8] sm:$0xff] %v71_v29 }
   0xf   :  { %76 = vst [vmem:[%s135_s3 + $0x10] sm:$0xff] %v72_v30  ;;  %77 = vst [vmem:[%s135_s3 + $0x18] sm:$0xff] %v73_v31 }

// kernel: generator_forward.35
= control target key start
LH: loop header
LB: loop body
LE: loop exit
PB: predicated region body
PF: predicated region fallthrough
CT: control target
= control target key end

     0   :  { %s1513_s12 = smov 0   ;;  %s1515_s13 = smov 0   ;;  %s1825_s0 = inlined_call_operand.vmem [shape: bf16[8,4608], index: 0, kind: input, shape index: {}]   ;;  %s1826_s1 = inlined_call_operand.vmem [shape: bf16[4608,512], index: 1, kind: input, shape index: {}]   ;;  %s1827_s2 = inlined_call_operand.vmem [shape: f32[1,512], index: 2, kind: input, shape index: {}]   ;;  %s1828_s3 = inlined_call_operand.vmem [shape: f32[8,512], index: 3, kind: output, shape index: {}]  }
   0x1   :  { %s1517_s14 = smov 0   ;;  %s1519_s15 = smov 0  }
   0x2   :  { %s1521_s16 = smov 0   ;;  %s1523_s17 = smov 0  }
   0x3   :  { %s1525_s18 = smov 0  }
   0x4 LB: > { %s25_s19 = sadd.s32 1, %s1482_s16  ;;  %s28_s20 = sadd.s32 1, %s1486_s17  ;;  %s1490_s18 = sphi %s1525_s18, %s13_s18   ;;  %s1486_s17 = sphi %s1523_s17, %s1834_s17   ;;  %s1482_s16 = sphi %s1521_s16, %s1833_s16   ;;  %s1478_s15 = sphi %s1519_s15, %s1832_s15   ;;  %s1474_s14 = sphi %s1517_s14, %s1831_s14   ;;  %s1470_s13 = sphi %s1515_s13, %s1830_s13   ;;  %s1466_s12 = sphi %s1513_s12, %s1829_s12  }
   0x5   : > { %p26_p0 = scmp.ge.s32.totalorder %s25_s19, 9  ;;  %p76_p1 = scmp.ne.s32.totalorder %s1470_s13, %s1466_s12 }
   0x6   : > { %p77_p2 = scmp.eq.s32.totalorder %s1490_s18, 0  ;;  %s69_s24 = sadd.s32 1, %s1470_s13 }
   0x7   : > { %s1836_s19 = smov (%p26_p0, %s25_s19), 0  ;;  %s1838_s20 = smov (!%p26_p0, %s28_s20), %s1486_s17 }
   0x8   : > { %p78_p3 = por %p77_p2, %p76_p1  ;;  %p30_p4 = scmp.ge.s32.totalorder %s1838_s20, 2 }
   0x9   : > { %s64_s21 = ssub.s32 %s1482_s16, %s1836_s19  ;;  %p1193_p6 = scmp.ge.s32.totalorder %s1490_s18, 18 }
   0xa   : > { %s1840_s20 = smov (%p30_p4, %s1838_s20), 0 }
   0xb   : > { %s65_s22 = ssub.s32 %s1486_s17, %s1840_s20  ;;  %156 = sbr.rel (%p1193_p6) target bundleno = 55 (0x37), region = 16 }
   0xc   : > { %s66_s23 = sor.u32 %s65_s22, %s64_s21 }
   0xd   : > { %p67_p5 = scmp.eq.s32.totalorder %s66_s23, 0 }
   0xf   : > { %s1564_s25 = scalar_select %p67_p5, %s1470_s13, %s69_s24  }
  0x10   : > { %172 = sbr.rel (!%p78_p3) target bundleno = 55 (0x37), region = 24  ;;  %s174_s26 = sand.u32 (%p78_p3), 1, %s1470_s13  }
  0x11   : > { %s1196_s27 = sshll.u32 (%p78_p3), %s1486_s17, 1  ;;  %s1194_s28 = sshll.u32 (%p78_p3), %s174_s26, 9 }
  0x12   : > { %s1278_s29 = sshll.u32 (%p78_p3), %s1482_s16, 8  ;;  %s1578_s8 = scalar_lea.vmem (%p78_p3), [#allocation3], %s1194_s28 }
  0x13   : > { %s180_s30 = sadd.s32 (%p78_p3), %s1278_s29, %s1196_s27 }
  0x14   : > { %s1198_s4 = sshll.u32 (%p78_p3), %s180_s30, 2 }
  0x15   : > { %s1573_s7 = scalar_lea.vmem %s1826_s1, %s1198_s4 }
  0x16   : > { %v337_v0 = vld [vmem:[%s1573_s7] sm:$0xff]  ;;  %v339_v1 = vld [vmem:[%s1573_s7 + $0x10] sm:$0xff] }
  0x17   : > { %v341_v2 = vld [vmem:[%s1573_s7 + $0x20] sm:$0xff]  ;;  %338 = vst [vmem:[%s1578_s8] sm:$0xff] %v337_v0  ;;  %340 = vst [vmem:[%s1578_s8 + $0x8] sm:$0xff] %v339_v1  ;;  %v343_v3 = vld [vmem:[%s1573_s7 + $0x30] sm:$0xff] }
  0x18   : > { %342 = vst [vmem:[%s1578_s8 + $0x10] sm:$0xff] %v341_v2  ;;  %v345_v4 = vld [vmem:[%s1573_s7 + $0x40] sm:$0xff]  ;;  %v347_v5 = vld [vmem:[%s1573_s7 + $0x50] sm:$0xff]  ;;  %344 = vst [vmem:[%s1578_s8 + $0x18] sm:$0xff] %v343_v3 }
  0x19   : > { %346 = vst [vmem:[%s1578_s8 + $0x20] sm:$0xff] %v345_v4  ;;  %348 = vst [vmem:[%s1578_s8 + $0x28] sm:$0xff] %v347_v5  ;;  %v349_v6 = vld [vmem:[%s1573_s7 + $0x60] sm:$0xff]  ;;  %v351_v7 = vld [vmem:[%s1573_s7 + $0x70] sm:$0xff] }
  0x1a   : > { %v353_v8 = vld [vmem:[%s1573_s7 + $0x80] sm:$0xff]  ;;  %350 = vst [vmem:[%s1578_s8 + $0x30] sm:$0xff] %v349_v6  ;;  %352 = vst [vmem:[%s1578_s8 + $0x38] sm:$0xff] %v351_v7  ;;  %v355_v9 = vld [vmem:[%s1573_s7 + $0x90] sm:$0xff] }
  0x1b   : > { %354 = vst [vmem:[%s1578_s8 + $0x40] sm:$0xff] %v353_v8  ;;  %v357_v10 = vld [vmem:[%s1573_s7 + $0xa0] sm:$0xff]  ;;  %v359_v11 = vld [vmem:[%s1573_s7 + $0xb0] sm:$0xff]  ;;  %356 = vst [vmem:[%s1578_s8 + $0x48] sm:$0xff] %v355_v9 }
  0x1c   : > { %358 = vst [vmem:[%s1578_s8 + $0x50] sm:$0xff] %v357_v10  ;;  %360 = vst [vmem:[%s1578_s8 + $0x58] sm:$0xff] %v359_v11  ;;  %v361_v12 = vld [vmem:[%s1573_s7 + $0xc0] sm:$0xff]  ;;  %v363_v13 = vld [vmem:[%s1573_s7 + $0xd0] sm:$0xff] }
  0x1d   : > { %v365_v14 = vld [vmem:[%s1573_s7 + $0xe0] sm:$0xff]  ;;  %362 = vst [vmem:[%s1578_s8 + $0x60] sm:$0xff] %v361_v12  ;;  %364 = vst [vmem:[%s1578_s8 + $0x68] sm:$0xff] %v363_v13  ;;  %v367_v15 = vld [vmem:[%s1573_s7 + $0xf0] sm:$0xff] }
  0x1e   : > { %366 = vst [vmem:[%s1578_s8 + $0x70] sm:$0xff] %v365_v14  ;;  %v369_v16 = vld [vmem:[%s1573_s7 + $0x100] sm:$0xff]  ;;  %v371_v17 = vld [vmem:[%s1573_s7 + $0x110] sm:$0xff]  ;;  %368 = vst [vmem:[%s1578_s8 + $0x78] sm:$0xff] %v367_v15 }
  0x1f   : > { %370 = vst [vmem:[%s1578_s8 + $0x80] sm:$0xff] %v369_v16  ;;  %372 = vst [vmem:[%s1578_s8 + $0x88] sm:$0xff] %v371_v17  ;;  %v373_v18 = vld [vmem:[%s1573_s7 + $0x120] sm:$0xff]  ;;  %v375_v19 = vld [vmem:[%s1573_s7 + $0x130] sm:$0xff] }
  0x20   : > { %v377_v20 = vld [vmem:[%s1573_s7 + $0x140] sm:$0xff]  ;;  %374 = vst [vmem:[%s1578_s8 + $0x90] sm:$0xff] %v373_v18  ;;  %376 = vst [vmem:[%s1578_s8 + $0x98] sm:$0xff] %v375_v19  ;;  %v379_v21 = vld [vmem:[%s1573_s7 + $0x150] sm:$0xff] }
  0x21   : > { %378 = vst [vmem:[%s1578_s8 + $0xa0] sm:$0xff] %v377_v20  ;;  %v381_v22 = vld [vmem:[%s1573_s7 + $0x160] sm:$0xff]  ;;  %v383_v23 = vld [vmem:[%s1573_s7 + $0x170] sm:$0xff]  ;;  %380 = vst [vmem:[%s1578_s8 + $0xa8] sm:$0xff] %v379_v21 }
  0x22   : > { %382 = vst [vmem:[%s1578_s8 + $0xb0] sm:$0xff] %v381_v22  ;;  %384 = vst [vmem:[%s1578_s8 + $0xb8] sm:$0xff] %v383_v23  ;;  %v385_v24 = vld [vmem:[%s1573_s7 + $0x180] sm:$0xff]  ;;  %v387_v25 = vld [vmem:[%s1573_s7 + $0x190] sm:$0xff] }
  0x23   : > { %v389_v26 = vld [vmem:[%s1573_s7 + $0x1a0] sm:$0xff]  ;;  %386 = vst [vmem:[%s1578_s8 + $0xc0] sm:$0xff] %v385_v24  ;;  %388 = vst [vmem:[%s1578_s8 + $0xc8] sm:$0xff] %v387_v25  ;;  %v391_v27 = vld [vmem:[%s1573_s7 + $0x1b0] sm:$0xff] }
  0x24   : > { %390 = vst [vmem:[%s1578_s8 + $0xd0] sm:$0xff] %v389_v26  ;;  %v393_v28 = vld [vmem:[%s1573_s7 + $0x1c0] sm:$0xff]  ;;  %v395_v29 = vld [vmem:[%s1573_s7 + $0x1d0] sm:$0xff]  ;;  %392 = vst [vmem:[%s1578_s8 + $0xd8] sm:$0xff] %v391_v27 }
  0x25   : > { %394 = vst [vmem:[%s1578_s8 + $0xe0] sm:$0xff] %v393_v28  ;;  %396 = vst [vmem:[%s1578_s8 + $0xe8] sm:$0xff] %v395_v29  ;;  %v397_v30 = vld [vmem:[%s1573_s7 + $0x1e0] sm:$0xff]  ;;  %v399_v31 = vld [vmem:[%s1573_s7 + $0x1f0] sm:$0xff] }
  0x26   : > { %v401_v32 = vld [vmem:[%s1573_s7 + $0x200] sm:$0xff]  ;;  %398 = vst [vmem:[%s1578_s8 + $0xf0] sm:$0xff] %v397_v30  ;;  %400 = vst [vmem:[%s1578_s8 + $0xf8] sm:$0xff] %v399_v31  ;;  %v403_v33 = vld [vmem:[%s1573_s7 + $0x210] sm:$0xff] }
  0x27   : > { %402 = vst [vmem:[%s1578_s8 + $0x100] sm:$0xff] %v401_v32  ;;  %v405_v34 = vld [vmem:[%s1573_s7 + $0x220] sm:$0xff]  ;;  %v407_v35 = vld [vmem:[%s1573_s7 + $0x230] sm:$0xff]  ;;  %404 = vst [vmem:[%s1578_s8 + $0x108] sm:$0xff] %v403_v33 }
  0x28   : > { %406 = vst [vmem:[%s1578_s8 + $0x110] sm:$0xff] %v405_v34  ;;  %408 = vst [vmem:[%s1578_s8 + $0x118] sm:$0xff] %v407_v35  ;;  %v409_v36 = vld [vmem:[%s1573_s7 + $0x240] sm:$0xff]  ;;  %v411_v37 = vld [vmem:[%s1573_s7 + $0x250] sm:$0xff] }
  0x29   : > { %v413_v38 = vld [vmem:[%s1573_s7 + $0x260] sm:$0xff]  ;;  %410 = vst [vmem:[%s1578_s8 + $0x120] sm:$0xff] %v409_v36  ;;  %412 = vst [vmem:[%s1578_s8 + $0x128] sm:$0xff] %v411_v37  ;;  %v415_v39 = vld [vmem:[%s1573_s7 + $0x270] sm:$0xff] }
  0x2a   : > { %414 = vst [vmem:[%s1578_s8 + $0x130] sm:$0xff] %v413_v38  ;;  %v417_v40 = vld [vmem:[%s1573_s7 + $0x280] sm:$0xff]  ;;  %v419_v41 = vld [vmem:[%s1573_s7 + $0x290] sm:$0xff]  ;;  %416 = vst [vmem:[%s1578_s8 + $0x138] sm:$0xff] %v415_v39 }
  0x2b   : > { %418 = vst [vmem:[%s1578_s8 + $0x140] sm:$0xff] %v417_v40  ;;  %420 = vst [vmem:[%s1578_s8 + $0x148] sm:$0xff] %v419_v41  ;;  %v421_v42 = vld [vmem:[%s1573_s7 + $0x2a0] sm:$0xff]  ;;  %v423_v43 = vld [vmem:[%s1573_s7 + $0x2b0] sm:$0xff] }
  0x2c   : > { %v425_v44 = vld [vmem:[%s1573_s7 + $0x2c0] sm:$0xff]  ;;  %422 = vst [vmem:[%s1578_s8 + $0x150] sm:$0xff] %v421_v42  ;;  %424 = vst [vmem:[%s1578_s8 + $0x158] sm:$0xff] %v423_v43  ;;  %v427_v45 = vld [vmem:[%s1573_s7 + $0x2d0] sm:$0xff] }
  0x2d   : > { %426 = vst [vmem:[%s1578_s8 + $0x160] sm:$0xff] %v425_v44  ;;  %v429_v46 = vld [vmem:[%s1573_s7 + $0x2e0] sm:$0xff]  ;;  %v431_v47 = vld [vmem:[%s1573_s7 + $0x2f0] sm:$0xff]  ;;  %428 = vst [vmem:[%s1578_s8 + $0x168] sm:$0xff] %v427_v45 }
  0x2e   : > { %430 = vst [vmem:[%s1578_s8 + $0x170] sm:$0xff] %v429_v46  ;;  %432 = vst [vmem:[%s1578_s8 + $0x178] sm:$0xff] %v431_v47  ;;  %v433_v48 = vld [vmem:[%s1573_s7 + $0x300] sm:$0xff]  ;;  %v435_v49 = vld [vmem:[%s1573_s7 + $0x310] sm:$0xff] }
  0x2f   : > { %v437_v50 = vld [vmem:[%s1573_s7 + $0x320] sm:$0xff]  ;;  %434 = vst [vmem:[%s1578_s8 + $0x180] sm:$0xff] %v433_v48  ;;  %436 = vst [vmem:[%s1578_s8 + $0x188] sm:$0xff] %v435_v49  ;;  %v439_v51 = vld [vmem:[%s1573_s7 + $0x330] sm:$0xff] }
  0x30   : > { %438 = vst [vmem:[%s1578_s8 + $0x190] sm:$0xff] %v437_v50  ;;  %v441_v52 = vld [vmem:[%s1573_s7 + $0x340] sm:$0xff]  ;;  %v443_v53 = vld [vmem:[%s1573_s7 + $0x350] sm:$0xff]  ;;  %440 = vst [vmem:[%s1578_s8 + $0x198] sm:$0xff] %v439_v51 }
  0x31   : > { %442 = vst [vmem:[%s1578_s8 + $0x1a0] sm:$0xff] %v441_v52  ;;  %444 = vst [vmem:[%s1578_s8 + $0x1a8] sm:$0xff] %v443_v53  ;;  %v445_v54 = vld [vmem:[%s1573_s7 + $0x360] sm:$0xff]  ;;  %v447_v55 = vld [vmem:[%s1573_s7 + $0x370] sm:$0xff] }
  0x32   : > { %v449_v56 = vld [vmem:[%s1573_s7 + $0x380] sm:$0xff]  ;;  %446 = vst [vmem:[%s1578_s8 + $0x1b0] sm:$0xff] %v445_v54  ;;  %448 = vst [vmem:[%s1578_s8 + $0x1b8] sm:$0xff] %v447_v55  ;;  %v451_v57 = vld [vmem:[%s1573_s7 + $0x390] sm:$0xff] }
  0x33   : > { %450 = vst [vmem:[%s1578_s8 + $0x1c0] sm:$0xff] %v449_v56  ;;  %v453_v58 = vld [vmem:[%s1573_s7 + $0x3a0] sm:$0xff]  ;;  %v455_v59 = vld [vmem:[%s1573_s7 + $0x3b0] sm:$0xff]  ;;  %452 = vst [vmem:[%s1578_s8 + $0x1c8] sm:$0xff] %v451_v57 }
  0x34   : > { %454 = vst [vmem:[%s1578_s8 + $0x1d0] sm:$0xff] %v453_v58  ;;  %456 = vst [vmem:[%s1578_s8 + $0x1d8] sm:$0xff] %v455_v59  ;;  %v457_v60 = vld [vmem:[%s1573_s7 + $0x3c0] sm:$0xff]  ;;  %v459_v61 = vld [vmem:[%s1573_s7 + $0x3d0] sm:$0xff] }
  0x35   : > { %v461_v62 = vld [vmem:[%s1573_s7 + $0x3e0] sm:$0xff]  ;;  %458 = vst [vmem:[%s1578_s8 + $0x1e0] sm:$0xff] %v457_v60  ;;  %460 = vst [vmem:[%s1578_s8 + $0x1e8] sm:$0xff] %v459_v61  ;;  %v463_v63 = vld [vmem:[%s1573_s7 + $0x3f0] sm:$0xff] }
  0x36   : > { %462 = vst [vmem:[%s1578_s8 + $0x1f0] sm:$0xff] %v461_v62  ;;  %464 = vst [vmem:[%s1578_s8 + $0x1f8] sm:$0xff] %v463_v63 }
  0x37 PF: > { %p1199_p7 = scmp.ge.s32.totalorder %s1490_s18, 1  ;;  %p477_p8 = scmp.lt.s32.totalorder %s1490_s18, 19 }
  0x39   : > { %p478_p9 = pnand %p1199_p7, %p477_p8 }
  0x3a   : > { %s484_s9 = sand.u32 (!%p478_p9), 1, %s1466_s12   ;;  %s1201_s10 = sshll.u32 (!%p478_p9), %s1474_s14, 2 }
  0x3b   : > { %481 = sbr.rel (%p478_p9) target bundleno = 351 (0x15f), region = 66  ;;  %s1200_s11 = sshll.u32 (!%p478_p9), %s484_s9, 9 }
  0x3c   : > { %p527_p10 = scmp.lt.s32.totalorder (!%p478_p9), %s1201_s10, 35  ;;  %s1203_s21 = sshll.u32 (!%p478_p9), %s1478_s15, 1 }
  0x3d   : > { %p537_p11 = scmp.lt.s32.totalorder (!%p478_p9), %s1203_s21, 3  ;;  %s1727_s5 = scalar_lea.vmem (!%p478_p9), [#allocation3], %s1200_s11 }
  0x3e   : > { %p1206_p12 = scmp.ne.s32.totalorder (!%p478_p9), %s1474_s14, 0 }
  0x40   : > { %s1842_s10 = smov (!%p527_p10, %s1201_s10), 35  ;;  %s1844_s21 = smov (!%p537_p11, %s1203_s21), 3 }
  0x41   : > { %s1202_s22 = sshll.u32 %s1842_s10, 2  ;;  %s539_s12 = scalar_lea.vmem %s1827_s2, %s1844_s21 }
  0x42   : > { %s1713_s26 = scalar_lea.vmem %s1825_s0, %s1202_s22  ;;  %s1205_s29 = sshll.u32 %s1844_s21, 3 }
  0x43   : > { %s1725_s15 = scalar_lea.vmem %s1828_s3, %s1205_s29  ;;  %554 = sbr.rel (%p1206_p12) target bundleno = 74 (0x4a), region = 74 }
  0x48   : > { %v1492_v0 = vmov 0.0  }
  0x49   : > { %555 = vst [vmem:[#allocation2] sm:$0xff] %v1492_v0  ;;  %556 = vst [vmem:[#allocation2 + $0x8] sm:$0xff] %v1492_v0 }
  0x4a PF: > { %v1336_v1 = vld [vmem:[%s1727_s5 + $0x74] ss:$8 sps:$4 sm:$0xff]   ;;  %v1340_v3 = vld [vmem:[%s1727_s5 + $0x70] ss:$8 sps:$4 sm:$0xff]   ;;  %v1342_v5 = vld [vmem:[%s1727_s5 + $0x64] ss:$8 sps:$4 sm:$0xff]  }
  0x4b   : > { %v1338_v2 = vld [vmem:[%s1727_s5 + $0x174] ss:$8 sps:$4 sm:$0xff]   ;;  %959 = vmatprep.subr.bf16.mxu0 %v1336_v1  ;;  %v1341_v4 = vld [vmem:[%s1727_s5 + $0x170] ss:$8 sps:$4 sm:$0xff]   ;;  %v1344_v6 = vld [vmem:[%s1727_s5 + $0x164] ss:$8 sps:$4 sm:$0xff]  }
  0x4c   : > { %1000 = vmatprep.subr.bf16.mxu1 %v1338_v2  ;;  %960 = vmatpush1.bf16.msra.mxu0 %v1340_v3  ;;  %v1346_v7 = vld [vmem:[%s1727_s5 + $0x60] ss:$8 sps:$4 sm:$0xff]   ;;  %v1348_v9 = vld [vmem:[%s1727_s5 + $0x54] ss:$8 sps:$4 sm:$0xff]   ;;  %v1352_v11 = vld [vmem:[%s1727_s5 + $0x50] ss:$8 sps:$4 sm:$0xff]  }
  0x4d   : > { %1001 = vmatpush1.bf16.msra.mxu1 %v1341_v4  ;;  %961 = vmatprep.subr.bf16.mxu0 %v1342_v5  ;;  %v1347_v8 = vld [vmem:[%s1727_s5 + $0x160] ss:$8 sps:$4 sm:$0xff]   ;;  %v1350_v10 = vld [vmem:[%s1727_s5 + $0x154] ss:$8 sps:$4 sm:$0xff]   ;;  %v1353_v12 = vld [vmem:[%s1727_s5 + $0x150] ss:$8 sps:$4 sm:$0xff]  }
  0x4e   : > { %1002 = vmatprep.subr.bf16.mxu1 %v1344_v6  ;;  %v1354_v13 = vld [vmem:[%s1727_s5 + $0x44] ss:$8 sps:$4 sm:$0xff]   ;;  %v1358_v15 = vld [vmem:[%s1727_s5 + $0x40] ss:$8 sps:$4 sm:$0xff]   ;;  %v1360_v17 = vld [vmem:[%s1727_s5 + $0x34] ss:$8 sps:$4 sm:$0xff]  }
  0x4f   : > { %v1356_v14 = vld [vmem:[%s1727_s5 + $0x144] ss:$8 sps:$4 sm:$0xff]   ;;  %v1359_v16 = vld [vmem:[%s1727_s5 + $0x140] ss:$8 sps:$4 sm:$0xff]   ;;  %v1362_v18 = vld [vmem:[%s1727_s5 + $0x134] ss:$8 sps:$4 sm:$0xff]  }
  0x50   : > { %962 = vmatpush1.bf16.msra.mxu0 %v1346_v7  ;;  %v1364_v19 = vld [vmem:[%s1727_s5 + $0x30] ss:$8 sps:$4 sm:$0xff]   ;;  %v1366_v21 = vld [vmem:[%s1727_s5 + $0x24] ss:$8 sps:$4 sm:$0xff]   ;;  %v1370_v23 = vld [vmem:[%s1727_s5 + $0x20] ss:$8 sps:$4 sm:$0xff]  }
  0x51   : > { %1003 = vmatpush1.bf16.msra.mxu1 %v1347_v8  ;;  %963 = vmatprep.subr.bf16.mxu0 %v1348_v9  ;;  %v1365_v20 = vld [vmem:[%s1727_s5 + $0x130] ss:$8 sps:$4 sm:$0xff]   ;;  %v1368_v22 = vld [vmem:[%s1727_s5 + $0x124] ss:$8 sps:$4 sm:$0xff]   ;;  %v1371_v24 = vld [vmem:[%s1727_s5 + $0x120] ss:$8 sps:$4 sm:$0xff]  }
  0x52   : > { %1004 = vmatprep.subr.bf16.mxu1 %v1350_v10  ;;  %v1372_v25 = vld [vmem:[%s1727_s5 + $0x14] ss:$8 sps:$4 sm:$0xff]   ;;  %v1376_v27 = vld [vmem:[%s1727_s5 + $0x10] ss:$8 sps:$4 sm:$0xff]   ;;  %v1378_v29 = vld [vmem:[%s1727_s5 + $0x4] ss:$8 sps:$4 sm:$0xff]  }
  0x53   : > { %v1374_v26 = vld [vmem:[%s1727_s5 + $0x114] ss:$8 sps:$4 sm:$0xff]   ;;  %v1377_v28 = vld [vmem:[%s1727_s5 + $0x110] ss:$8 sps:$4 sm:$0xff]   ;;  %v1380_v30 = vld [vmem:[%s1727_s5 + $0x104] ss:$8 sps:$4 sm:$0xff]  }
  0x54   : > { %964 = vmatpush1.bf16.msra.mxu0 %v1352_v11  ;;  %v1382_v31 = vld [vmem:[%s1727_s5] ss:$8 sps:$4 sm:$0xff]   ;;  %v1384_v33 = vld [vmem:[%s1727_s5 + $0xf4] ss:$8 sps:$4 sm:$0xff]   ;;  %v1388_v35 = vld [vmem:[%s1727_s5 + $0xf0] ss:$8 sps:$4 sm:$0xff]  }
  0x55   : > { %1005 = vmatpush1.bf16.msra.mxu1 %v1353_v12  ;;  %965 = vmatprep.subr.bf16.mxu0 %v1354_v13  ;;  %v1383_v32 = vld [vmem:[%s1727_s5 + $0x100] ss:$8 sps:$4 sm:$0xff]   ;;  %v1386_v34 = vld [vmem:[%s1727_s5 + $0x1f4] ss:$8 sps:$4 sm:$0xff]   ;;  %v1389_v36 = vld [vmem:[%s1727_s5 + $0x1f0] ss:$8 sps:$4 sm:$0xff]  }
  0x56   : > { %1006 = vmatprep.subr.bf16.mxu1 %v1356_v14  ;;  %v1390_v37 = vld [vmem:[%s1727_s5 + $0xe4] ss:$8 sps:$4 sm:$0xff]   ;;  %v1394_v39 = vld [vmem:[%s1727_s5 + $0xe0] ss:$8 sps:$4 sm:$0xff]   ;;  %v1396_v41 = vld [vmem:[%s1727_s5 + $0xd4] ss:$8 sps:$4 sm:$0xff]  }
  0x57   : > { %v1392_v38 = vld [vmem:[%s1727_s5 + $0x1e4] ss:$8 sps:$4 sm:$0xff]   ;;  %v1395_v40 = vld [vmem:[%s1727_s5 + $0x1e0] ss:$8 sps:$4 sm:$0xff]   ;;  %v1398_v42 = vld [vmem:[%s1727_s5 + $0x1d4] ss:$8 sps:$4 sm:$0xff]  }
  0x58   : > { %966 = vmatpush1.bf16.msra.mxu0 %v1358_v15  ;;  %v1400_v43 = vld [vmem:[%s1727_s5 + $0xd0] ss:$8 sps:$4 sm:$0xff]   ;;  %v1402_v45 = vld [vmem:[%s1727_s5 + $0xc4] ss:$8 sps:$4 sm:$0xff]   ;;  %v1406_v50 = vld [vmem:[%s1727_s5 + $0xc0] ss:$8 sps:$4 sm:$0xff]  }
  0x59   : > { %1007 = vmatpush1.bf16.msra.mxu1 %v1359_v16  ;;  %967 = vmatprep.subr.bf16.mxu0 %v1360_v17  ;;  %v1401_v44 = vld [vmem:[%s1727_s5 + $0x1d0] ss:$8 sps:$4 sm:$0xff]   ;;  %v1404_v46 = vld [vmem:[%s1727_s5 + $0x1c4] ss:$8 sps:$4 sm:$0xff]   ;;  %v1407_v51 = vld [vmem:[%s1727_s5 + $0x1c0] ss:$8 sps:$4 sm:$0xff]  }
  0x5a   : > { %1008 = vmatprep.subr.bf16.mxu1 %v1362_v18  ;;  %v559_v47 = vld [vmem:[%s1713_s26] sm:$0xff]  ;;  %v560_v49 = vld [vmem:[%s1713_s26 + $0x8] sm:$0xff]  ;;  %v1414_v57 = vld [vmem:[%s1727_s5 + $0xa4] ss:$8 sps:$4 sm:$0xff]   ;;  %p1275_p13 = scmp.ne.s32.totalorder %s1474_s14, 8 }
  0x5b   : > { %v1208_v48 = vcombine.high %v559_v47, %v559_v47  ;;  %v1210_v52 = vcombine.high %v560_v49, %v560_v49  ;;  %v1408_v53 = vld [vmem:[%s1727_s5 + $0xb4] ss:$8 sps:$4 sm:$0xff]   ;;  %v1412_v55 = vld [vmem:[%s1727_s5 + $0xb0] ss:$8 sps:$4 sm:$0xff]   ;;  %v1416_v58 = vld [vmem:[%s1727_s5 + $0x1a4] ss:$8 sps:$4 sm:$0xff]   ;;  %v1207_v5 = vcombine.low %v559_v47, %v559_v47  ;;  %v1209_v6 = vcombine.low %v560_v49, %v560_v49 }
  0x5c   : > { %968 = vmatpush1.bf16.msra.mxu0 %v1364_v19  ;;  %v1410_v54 = vld [vmem:[%s1727_s5 + $0x1b4] ss:$8 sps:$4 sm:$0xff]   ;;  %v1413_v56 = vld [vmem:[%s1727_s5 + $0x1b0] ss:$8 sps:$4 sm:$0xff]   ;;  %v1418_v59 = vld [vmem:[%s1727_s5 + $0xa0] ss:$8 sps:$4 sm:$0xff]  }
  0x5d   : > { %1009 = vmatpush1.bf16.msra.mxu1 %v1365_v20  ;;  %969 = vmatprep.subr.bf16.mxu0 %v1366_v21  ;;  %v1419_v60 = vld [vmem:[%s1727_s5 + $0x1a0] ss:$8 sps:$4 sm:$0xff]   ;;  %v1420_v61 = vld [vmem:[%s1727_s5 + $0x94] ss:$8 sps:$4 sm:$0xff]   ;;  %v1424_v63 = vld [vmem:[%s1727_s5 + $0x90] ss:$8 sps:$4 sm:$0xff]  }
  0x5e   : > { %1010 = vmatprep.subr.bf16.mxu1 %v1368_v22  ;;  %991 = vmatprep.mubr.bf16.mxu0 %v1208_v48  ;;  %v1422_v62 = vld [vmem:[%s1727_s5 + $0x194] ss:$8 sps:$4 sm:$0xff]   ;;  %v1425_v0 = vld [vmem:[%s1727_s5 + $0x190] ss:$8 sps:$4 sm:$0xff]   ;;  %v1426_v1 = vld [vmem:[%s1727_s5 + $0x84] ss:$8 sps:$4 sm:$0xff]  }
  0x5f   : > { %1032 = vmatprep.mubr.bf16.mxu1 %v1210_v52  ;;  %v1428_v2 = vld [vmem:[%s1727_s5 + $0x184] ss:$8 sps:$4 sm:$0xff]   ;;  %v1430_v3 = vld [vmem:[%s1727_s5 + $0x80] ss:$8 sps:$4 sm:$0xff]   ;;  %v557_v8 = vld [vmem:[#allocation2] sm:$0xff] }
  0x60   : > { %970 = vmatpush1.bf16.msra.mxu0 %v1370_v23  ;;  %v1431_v4 = vld [vmem:[%s1727_s5 + $0x180] ss:$8 sps:$4 sm:$0xff]   ;;  %v558_v12 = vld [vmem:[#allocation2 + $0x8] sm:$0xff] }
  0x61   : > { %1011 = vmatpush1.bf16.msra.mxu1 %v1371_v24  ;;  %971 = vmatprep.subr.bf16.mxu0 %v1372_v25 }
  0x62   : > { %1012 = vmatprep.subr.bf16.mxu1 %v1374_v26 }
  0x64   : > { %972 = vmatpush1.bf16.msra.mxu0 %v1376_v27 }
  0x65   : > { %1013 = vmatpush1.bf16.msra.mxu1 %v1377_v28  ;;  %973 = vmatprep.subr.bf16.mxu0 %v1378_v29 }
  0x66   : > { %1014 = vmatprep.subr.bf16.mxu1 %v1380_v30 }
  0x68   : > { %974 = vmatpush1.bf16.msra.mxu0 %v1382_v31 }
  0x69   : > { %1015 = vmatpush1.bf16.msra.mxu1 %v1383_v32  ;;  %975 = vmatprep.subr.bf16.mxu0 %v1384_v33 }
  0x6a   : > { %1016 = vmatprep.subr.bf16.mxu1 %v1386_v34 }
  0x6c   : > { %976 = vmatpush2.bf16.msra.mxu0 %v1388_v35 }
  0x6d   : > { %1017 = vmatpush2.bf16.msra.mxu1 %v1389_v36  ;;  %977 = vmatprep.subr.bf16.mxu0 %v1390_v37 }
  0x6e   : > { %1018 = vmatprep.subr.bf16.mxu1 %v1392_v38 }
  0x70   : > { %978 = vmatpush2.bf16.msra.mxu0 %v1394_v39 }
  0x71   : > { %1019 = vmatpush2.bf16.msra.mxu1 %v1395_v40  ;;  %979 = vmatprep.subr.bf16.mxu0 %v1396_v41 }
  0x72   : > { %1020 = vmatprep.subr.bf16.mxu1 %v1398_v42 }
  0x74   : > { %980 = vmatpush2.bf16.msra.mxu0 %v1400_v43 }
  0x75   : > { %1021 = vmatpush2.bf16.msra.mxu1 %v1401_v44  ;;  %981 = vmatprep.subr.bf16.mxu0 %v1402_v45 }
  0x76   : > { %1022 = vmatprep.subr.bf16.mxu1 %v1404_v46 }
  0x78   : > { %982 = vmatpush2.bf16.msra.mxu0 %v1406_v50 }
  0x79   : > { %1023 = vmatpush2.bf16.msra.mxu1 %v1407_v51  ;;  %983 = vmatprep.subr.bf16.mxu0 %v1408_v53 }
  0x7a   : > { %1024 = vmatprep.subr.bf16.mxu1 %v1410_v54 }
  0x7c   : > { %984 = vmatpush2.bf16.msra.mxu0 %v1412_v55 }
  0x7d   : > { %1025 = vmatpush2.bf16.msra.mxu1 %v1413_v56  ;;  %985 = vmatprep.subr.bf16.mxu0 %v1414_v57 }
  0x7e   : > { %1026 = vmatprep.subr.bf16.mxu1 %v1416_v58 }
  0x80   : > { %986 = vmatpush2.bf16.msra.mxu0 %v1418_v59 }
  0x81   : > { %1027 = vmatpush2.bf16.msra.mxu1 %v1419_v60  ;;  %987 = vmatprep.subr.bf16.mxu0 %v1420_v61 }
  0x82   : > { %1028 = vmatprep.subr.bf16.mxu1 %v1422_v62 }
  0x84   : > { %988 = vmatpush2.bf16.msra.mxu0 %v1424_v63 }
  0x85   : > { %1029 = vmatpush2.bf16.msra.mxu1 %v1425_v0  ;;  %989 = vmatprep.subr.bf16.mxu0 %v1426_v1 }
  0x86   : > { %1030 = vmatprep.subr.bf16.mxu1 %v1428_v2 }
  0x88   : > { %990 = vmatpush2.bf16.msra.mxu0 %v1430_v3 }
  0x89   : > { %1031 = vmatpush2.bf16.msra.mxu1 %v1431_v4 }
  0x8b   : > { %992 = vmatmul.mubr.bf16.vlgmr.msra.gmra.mxu0 %v1207_v5 }
  0x8c   : > { %1033 = vmatmul.mubr.bf16.vlgmr.msra.gmra.mxu1 %v1209_v6 }
 0x14b   : > { %v993_v7 = vpop.f32.mrf.mxu0 }
 0x14c   : > { %v1034_v9 = vpop.f32.mrf.mxu1 }
 0x14d   : > { %v1035_v10 = vadd.f32 %v1034_v9, %v993_v7  ;;  %v995_v11 = vpop.f32.mrf.mxu0 }
 0x14e   : > { %v1036_v13 = vpop.f32.mrf.mxu1 }
 0x14f   : > { %v1041_v14 = vadd.f32 %v1035_v10, %v557_v8  ;;  %v1037_v15 = vadd.f32 %v1036_v13, %v995_v11  ;;  %v997_v16 = vpop.f32.mrf.mxu0  ;;  %1048 = sbr.rel (%p1275_p13) target bundleno = 351 (0x15f), region = 78 }
 0x150   : > { %v1038_v17 = vpop.f32.mrf.mxu1 }
 0x151   : > { %1043 = vst [vmem:[#allocation2] sm:$0xff] %v1041_v14  ;;  %v1042_v18 = vadd.f32 %v1037_v15, %v558_v12  ;;  %v998_v19 = vpop.f32.mrf.mxu0 }
 0x152   : > { %v1039_v20 = vpop.f32.mrf.mxu1 }
 0x153   : > { %1044 = vst [vmem:[#allocation2 + $0x8] sm:$0xff] %v1042_v18 }
 0x154   : > { %v1053_v21 = vlaneseq  ;;  %v1051_v23 = vld [vmem:[%s539_s12] sm:$0x3] }
 0x156   : > { %v1054_v22 = vshrl.u32 %v1053_v21, 7 }
 0x158   : > { %v1055_v24 = vsub.s32 0, %v1054_v22  ;;  %v1059_v25 = vsub.s32 1, %v1054_v22  ;;  %v1049_v26 = vld [vmem:[#allocation2] sm:$0xff] }
 0x15a   : > { %v1050_v27 = vld [vmem:[#allocation2 + $0x8] sm:$0xff]  ;;  %v1056_v28 = vrot.slane %v1051_v23, %v1055_v24  ;;  %v1060_v29 = vrot.slane %v1051_v23, %v1059_v25 }
 0x15c   : > { %v1063_v30 = vadd.f32 %v1056_v28, %v1049_v26  ;;  %v1064_v31 = vadd.f32 %v1060_v29, %v1050_v27 }
 0x15e   : > { %1065 = vst [vmem:[%s1725_s15] sm:$0xff] %v1063_v30  ;;  %1066 = vst [vmem:[%s1725_s15 + $0x8] sm:$0xff] %v1064_v31 }
 0x15f PF: > { %s13_s18 = sadd.s32 1, %s1490_s18   ;;  %s1829_s12 = smov %s1470_s13 }
 0x160   : > { %p10_p0 = scmp.ge.s32.totalorder %s13_s18, 20   ;;  %s1830_s13 = smov %s1564_s25 }
 0x161   : > { %s1831_s14 = smov %s1482_s16  ;;  %s1832_s15 = smov %s1486_s17 }
 0x162   : > { %s1833_s16 = smov %s1836_s19  ;;  %s1834_s17 = smov %s1840_s20 }
 0x163   :  { %12 = sbr.rel (!%p10_p0) target bundleno = 4 (0x4), region = 119 }

// kernel: generator_forward.38
= control target key start
LH: loop header
LB: loop body
LE: loop exit
PB: predicated region body
PF: predicated region fallthrough
CT: control target
= control target key end

     0   :  { %v23_v0 = vlaneseq  ;;  %s156_s1 = inlined_call_operand.vmem [shape: f32[1,512], index: 1, kind: input, shape index: {}]   ;;  %s157_s2 = inlined_call_operand.vmem [shape: f32[1,512], index: 2, kind: input, shape index: {}]   ;;  %s158_s0 = inlined_call_operand.vmem [shape: f32[8,512], index: 0, kind: input, shape index: {}]   ;;  %s159_s3 = inlined_call_operand.vmem [shape: f32[8,512], index: 3, kind: input, shape index: {}]   ;;  %s160_s4 = inlined_call_operand.vmem [shape: f32[8,512], index: 4, kind: output, shape index: {}]  }
   0x1   :  { %v21_v2 = vld [vmem:[%s156_s1] sm:$0xf]  ;;  %v18_v9 = vld [vmem:[%s158_s0 + $0x8] sm:$0xff]  ;;  %v19_v14 = vld [vmem:[%s158_s0 + $0x10] sm:$0xff] }
   0x2   :  { %v24_v1 = vshrl.u32 %v23_v0, 7  ;;  %v47_v3 = vld [vmem:[%s157_s2] sm:$0xf]  ;;  %v20_v15 = vld [vmem:[%s158_s0 + $0x18] sm:$0xff]  ;;  %v74_v23 = vld [vmem:[%s159_s3 + $0x8] sm:$0xff] }
   0x3   :  { %v17_v8 = vld [vmem:[%s158_s0] sm:$0xff]  ;;  %v75_v28 = vld [vmem:[%s159_s3 + $0x10] sm:$0xff]  ;;  %v76_v29 = vld [vmem:[%s159_s3 + $0x18] sm:$0xff] }
   0x4   :  { %v25_v4 = vsub.s32 0, %v24_v1  ;;  %v29_v5 = vsub.s32 1, %v24_v1  ;;  %v33_v6 = vsub.s32 2, %v24_v1  ;;  %v37_v7 = vsub.s32 3, %v24_v1  ;;  %v73_v22 = vld [vmem:[%s159_s3] sm:$0xff] }
   0x6   :  { %v26_v10 = vrot.slane %v21_v2, %v25_v4  ;;  %v52_v11 = vrot.slane %v47_v3, %v25_v4  ;;  %v30_v12 = vrot.slane %v21_v2, %v29_v5  ;;  %v56_v13 = vrot.slane %v47_v3, %v29_v5 }
   0x7   :  { %v34_v16 = vrot.slane %v21_v2, %v33_v6  ;;  %v60_v17 = vrot.slane %v47_v3, %v33_v6  ;;  %v38_v18 = vrot.slane %v21_v2, %v37_v7  ;;  %v64_v19 = vrot.slane %v47_v3, %v37_v7 }
   0x8   :  { %v43_v20 = vmul.f32 %v26_v10, %v17_v8  ;;  %v44_v21 = vmul.f32 %v30_v12, %v18_v9 }
   0x9   :  { %v45_v24 = vmul.f32 %v34_v16, %v19_v14  ;;  %v46_v25 = vmul.f32 %v38_v18, %v20_v15 }
   0xa   :  { %v69_v26 = vadd.f32 %v52_v11, %v43_v20  ;;  %v70_v27 = vadd.f32 %v56_v13, %v44_v21 }
   0xb   :  { %v71_v30 = vadd.f32 %v60_v17, %v45_v24  ;;  %v72_v31 = vadd.f32 %v64_v19, %v46_v25 }
   0xc   :  { %v77_v32 = vadd.f32 %v73_v22, %v69_v26  ;;  %v78_v33 = vadd.f32 %v74_v23, %v70_v27 }
   0xd   :  { %v79_v34 = vadd.f32 %v75_v28, %v71_v30  ;;  %v80_v35 = vadd.f32 %v76_v29, %v72_v31 }
   0xe   :  { %81 = vst [vmem:[%s160_s4] sm:$0xff] %v77_v32  ;;  %82 = vst [vmem:[%s160_s4 + $0x8] sm:$0xff] %v78_v33 }
   0xf   :  { %83 = vst [vmem:[%s160_s4 + $0x10] sm:$0xff] %v79_v34  ;;  %84 = vst [vmem:[%s160_s4 + $0x18] sm:$0xff] %v80_v35 }

// kernel: generator_forward.46
= control target key start
LH: loop header
LB: loop body
LE: loop exit
PB: predicated region body
PF: predicated region fallthrough
CT: control target
= control target key end

     0   :  { %v26_v0 = vlaneseq  ;;  %s184_s1 = inlined_call_operand.vmem [shape: f32[1,512], index: 1, kind: input, shape index: {}]   ;;  %s185_s2 = inlined_call_operand.vmem [shape: f32[1,512], index: 2, kind: input, shape index: {}]   ;;  %s186_s0 = inlined_call_operand.vmem [shape: f32[8,512], index: 0, kind: input, shape index: {}]   ;;  %s187_s3 = inlined_call_operand.vmem [shape: f32[8,512], index: 3, kind: input, shape index: {}]   ;;  %s188_s4 = inlined_call_operand.vmem [shape: f32[8,512], index: 4, kind: input, shape index: {}]   ;;  %s189_s5 = inlined_call_operand.vmem [shape: f32[8,512], index: 5, kind: output, shape index: {}]  }
   0x1   :  { %v24_v2 = vld [vmem:[%s184_s1] sm:$0xf]  ;;  %v21_v8 = vld [vmem:[%s186_s0 + $0x8] sm:$0xff]  ;;  %v22_v14 = vld [vmem:[%s186_s0 + $0x10] sm:$0xff] }
   0x2   :  { %v27_v1 = vshrl.u32 %v26_v0, 7  ;;  %v50_v3 = vld [vmem:[%s185_s2] sm:$0xf]  ;;  %v23_v15 = vld [vmem:[%s186_s0 + $0x18] sm:$0xff]  ;;  %v77_v23 = vld [vmem:[%s187_s3 + $0x8] sm:$0xff] }
   0x3   :  { %v20_v7 = vld [vmem:[%s186_s0] sm:$0xff]  ;;  %v78_v28 = vld [vmem:[%s187_s3 + $0x10] sm:$0xff]  ;;  %v79_v29 = vld [vmem:[%s187_s3 + $0x18] sm:$0xff] }
   0x4   :  { %v28_v4 = vsub.s32 0, %v27_v1  ;;  %v32_v5 = vsub.s32 1, %v27_v1  ;;  %v36_v6 = vsub.s32 2, %v27_v1  ;;  %v40_v9 = vsub.s32 3, %v27_v1  ;;  %v76_v22 = vld [vmem:[%s187_s3] sm:$0xff]  ;;  %v85_v31 = vld [vmem:[%s188_s4 + $0x8] sm:$0xff] }
   0x5   :  { %v84_v30 = vld [vmem:[%s188_s4] sm:$0xff]  ;;  %v86_v36 = vld [vmem:[%s188_s4 + $0x10] sm:$0xff]  ;;  %v87_v37 = vld [vmem:[%s188_s4 + $0x18] sm:$0xff] }
   0x6   :  { %v29_v10 = vrot.slane %v24_v2, %v28_v4  ;;  %v55_v11 = vrot.slane %v50_v3, %v28_v4  ;;  %v33_v12 = vrot.slane %v24_v2, %v32_v5  ;;  %v59_v13 = vrot.slane %v50_v3, %v32_v5 }
   0x7   :  { %v37_v16 = vrot.slane %v24_v2, %v36_v6  ;;  %v63_v17 = vrot.slane %v50_v3, %v36_v6  ;;  %v41_v18 = vrot.slane %v24_v2, %v40_v9  ;;  %v67_v19 = vrot.slane %v50_v3, %v40_v9 }
   0x8   :  { %v46_v20 = vmul.f32 %v29_v10, %v20_v7  ;;  %v47_v21 = vmul.f32 %v33_v12, %v21_v8 }
   0x9   :  { %v48_v24 = vmul.f32 %v37_v16, %v22_v14  ;;  %v49_v25 = vmul.f32 %v41_v18, %v23_v15 }
   0xa   :  { %v72_v26 = vadd.f32 %v55_v11, %v46_v20  ;;  %v73_v27 = vadd.f32 %v59_v13, %v47_v21 }
   0xb   :  { %v74_v32 = vadd.f32 %v63_v17, %v48_v24  ;;  %v75_v33 = vadd.f32 %v67_v19, %v49_v25 }
   0xc   :  { %v80_v34 = vadd.f32 %v76_v22, %v72_v26  ;;  %v81_v35 = vadd.f32 %v77_v23, %v73_v27 }
   0xd   :  { %v82_v38 = vadd.f32 %v78_v28, %v74_v32  ;;  %v83_v39 = vadd.f32 %v79_v29, %v75_v33 }
   0xe   :  { %v88_v40 = vadd.f32 %v84_v30, %v80_v34  ;;  %v89_v41 = vadd.f32 %v85_v31, %v81_v35 }
   0xf   :  { %v90_v42 = vadd.f32 %v86_v36, %v82_v38  ;;  %v91_v43 = vadd.f32 %v87_v37, %v83_v39 }
  0x10   :  { %92 = vst [vmem:[%s189_s5] sm:$0xff] %v88_v40  ;;  %93 = vst [vmem:[%s189_s5 + $0x8] sm:$0xff] %v89_v41 }
  0x11   :  { %94 = vst [vmem:[%s189_s5 + $0x10] sm:$0xff] %v90_v42  ;;  %95 = vst [vmem:[%s189_s5 + $0x18] sm:$0xff] %v91_v43 }

// kernel: generator_forward.47
= control target key start
LH: loop header
LB: loop body
LE: loop exit
PB: predicated region body
PF: predicated region fallthrough
CT: control target
= control target key end

     0   :  { %s1473_s12 = smov 0   ;;  %s1475_s13 = smov 0   ;;  %s1757_s0 = inlined_call_operand.vmem [shape: bf16[8,512], index: 0, kind: input, shape index: {}]   ;;  %s1758_s1 = inlined_call_operand.vmem [shape: bf16[512,1024], index: 1, kind: input, shape index: {}]   ;;  %s1759_s2 = inlined_call_operand.vmem [shape: f32[1,1024], index: 2, kind: input, shape index: {}]   ;;  %s1760_s3 = inlined_call_operand.vmem [shape: f32[8,1024], index: 3, kind: output, shape index: {}]  }
   0x1   :  { %s1477_s14 = smov 0   ;;  %s1479_s15 = smov 0  }
   0x2   :  { %s1481_s16 = smov 0  }
   0x3 LB: > { %s28_s17 = sadd.s32 1, %s1447_s15  ;;  %p76_p1 = scmp.ne.s32.totalorder %s1439_s13, %s1435_s12  ;;  %s1451_s16 = sphi %s1481_s16, %s13_s16   ;;  %s1447_s15 = sphi %s1479_s15, %s1764_s15   ;;  %s1443_s14 = sphi %s1477_s14, %s1763_s14   ;;  %s1439_s13 = sphi %s1475_s13, %s1762_s13   ;;  %s1435_s12 = sphi %s1473_s12, %s1761_s12  }
   0x4   : > { %p30_p0 = scmp.ge.s32.totalorder %s28_s17, 4  ;;  %p77_p2 = scmp.eq.s32.totalorder %s1451_s16, 0 }
   0x5   : > { %s69_s19 = sadd.s32 1, %s1439_s13  ;;  %p1193_p5 = scmp.ge.s32.totalorder %s1451_s16, 4 }
   0x6   : > { %s1766_s17 = smov (%p30_p0, %s28_s17), 0  ;;  %p78_p3 = por %p77_p2, %p76_p1 }
   0x7   : > { %s65_s18 = ssub.s32 %s1447_s15, %s1766_s17  ;;  %169 = sbr.rel (%p1193_p5) target bundleno = 80 (0x50), region = 20 }
   0x8   : > { %p67_p4 = scmp.eq.s32.totalorder %s65_s18, 0 }
   0xa   : > { %s1508_s20 = scalar_select %p67_p4, %s1439_s13, %s69_s19  }
   0xc   : > { %172 = sbr.rel (!%p78_p3) target bundleno = 80 (0x50), region = 24  ;;  %s174_s21 = sand.u32 (%p78_p3), 1, %s1439_s13  }
   0xd   : > { %s1272_s22 = sshll.u32 (%p78_p3), %s1447_s15, 3  ;;  %s1194_s23 = sshll.u32 (%p78_p3), %s174_s21, 9 }
   0xe   : > { %s1516_s26 = scalar_lea.vmem (%p78_p3), %s1758_s1, %s1272_s22  ;;  %s1521_s27 = scalar_lea.vmem (%p78_p3), [#allocation3], %s1194_s23 }
   0xf   : > { %v337_v0 = vld [vmem:[%s1516_s26] sm:$0xff] (%p78_p3) }
  0x10   : > { %v339_v1 = vld [vmem:[%s1516_s26 + $0x20] sm:$0xff] (%p78_p3)  ;;  %338 = vst [vmem:[%s1521_s27] sm:$0xff] (%p78_p3), %v337_v0 }
  0x11   : > { %v341_v2 = vld [vmem:[%s1516_s26 + $0x40] sm:$0xff]  ;;  %340 = vst [vmem:[%s1521_s27 + $0x8] sm:$0xff] %v339_v1 }
  0x12   : > { %342 = vst [vmem:[%s1521_s27 + $0x10] sm:$0xff] %v341_v2  ;;  %v343_v3 = vld [vmem:[%s1516_s26 + $0x60] sm:$0xff] }
  0x13   : > { %v345_v4 = vld [vmem:[%s1516_s26 + $0x80] sm:$0xff]  ;;  %344 = vst [vmem:[%s1521_s27 + $0x18] sm:$0xff] %v343_v3 }
  0x14   : > { %v347_v5 = vld [vmem:[%s1516_s26 + $0xa0] sm:$0xff]  ;;  %346 = vst [vmem:[%s1521_s27 + $0x20] sm:$0xff] %v345_v4 }
  0x15   : > { %348 = vst [vmem:[%s1521_s27 + $0x28] sm:$0xff] %v347_v5  ;;  %v349_v6 = vld [vmem:[%s1516_s26 + $0xc0] sm:$0xff] }
  0x16   : > { %v351_v7 = vld [vmem:[%s1516_s26 + $0xe0] sm:$0xff]  ;;  %350 = vst [vmem:[%s1521_s27 + $0x30] sm:$0xff] %v349_v6 }
  0x17   : > { %v353_v8 = vld [vmem:[%s1516_s26 + $0x100] sm:$0xff]  ;;  %352 = vst [vmem:[%s1521_s27 + $0x38] sm:$0xff] %v351_v7 }
  0x18   : > { %354 = vst [vmem:[%s1521_s27 + $0x40] sm:$0xff] %v353_v8  ;;  %v355_v9 = vld [vmem:[%s1516_s26 + $0x120] sm:$0xff] }
  0x19   : > { %v357_v10 = vld [vmem:[%s1516_s26 + $0x140] sm:$0xff]  ;;  %356 = vst [vmem:[%s1521_s27 + $0x48] sm:$0xff] %v355_v9 }
  0x1a   : > { %v359_v11 = vld [vmem:[%s1516_s26 + $0x160] sm:$0xff]  ;;  %358 = vst [vmem:[%s1521_s27 + $0x50] sm:$0xff] %v357_v10 }
  0x1b   : > { %360 = vst [vmem:[%s1521_s27 + $0x58] sm:$0xff] %v359_v11  ;;  %v361_v12 = vld [vmem:[%s1516_s26 + $0x180] sm:$0xff] }
  0x1c   : > { %v363_v13 = vld [vmem:[%s1516_s26 + $0x1a0] sm:$0xff]  ;;  %362 = vst [vmem:[%s1521_s27 + $0x60] sm:$0xff] %v361_v12 }
  0x1d   : > { %v365_v14 = vld [vmem:[%s1516_s26 + $0x1c0] sm:$0xff]  ;;  %364 = vst [vmem:[%s1521_s27 + $0x68] sm:$0xff] %v363_v13 }
  0x1e   : > { %366 = vst [vmem:[%s1521_s27 + $0x70] sm:$0xff] %v365_v14  ;;  %v367_v15 = vld [vmem:[%s1516_s26 + $0x1e0] sm:$0xff] }
  0x1f   : > { %v369_v16 = vld [vmem:[%s1516_s26 + $0x200] sm:$0xff]  ;;  %368 = vst [vmem:[%s1521_s27 + $0x78] sm:$0xff] %v367_v15 }
  0x20   : > { %v371_v17 = vld [vmem:[%s1516_s26 + $0x220] sm:$0xff]  ;;  %370 = vst [vmem:[%s1521_s27 + $0x80] sm:$0xff] %v369_v16 }
  0x21   : > { %372 = vst [vmem:[%s1521_s27 + $0x88] sm:$0xff] %v371_v17  ;;  %v373_v18 = vld [vmem:[%s1516_s26 + $0x240] sm:$0xff] }
  0x22   : > { %v375_v19 = vld [vmem:[%s1516_s26 + $0x260] sm:$0xff]  ;;  %374 = vst [vmem:[%s1521_s27 + $0x90] sm:$0xff] %v373_v18 }
  0x23   : > { %v377_v20 = vld [vmem:[%s1516_s26 + $0x280] sm:$0xff]  ;;  %376 = vst [vmem:[%s1521_s27 + $0x98] sm:$0xff] %v375_v19 }
  0x24   : > { %378 = vst [vmem:[%s1521_s27 + $0xa0] sm:$0xff] %v377_v20  ;;  %v379_v21 = vld [vmem:[%s1516_s26 + $0x2a0] sm:$0xff] }
  0x25   : > { %v381_v22 = vld [vmem:[%s1516_s26 + $0x2c0] sm:$0xff]  ;;  %380 = vst [vmem:[%s1521_s27 + $0xa8] sm:$0xff] %v379_v21 }
  0x26   : > { %v383_v23 = vld [vmem:[%s1516_s26 + $0x2e0] sm:$0xff]  ;;  %382 = vst [vmem:[%s1521_s27 + $0xb0] sm:$0xff] %v381_v22 }
  0x27   : > { %384 = vst [vmem:[%s1521_s27 + $0xb8] sm:$0xff] %v383_v23  ;;  %v385_v24 = vld [vmem:[%s1516_s26 + $0x300] sm:$0xff] }
  0x28   : > { %v387_v25 = vld [vmem:[%s1516_s26 + $0x320] sm:$0xff]  ;;  %386 = vst [vmem:[%s1521_s27 + $0xc0] sm:$0xff] %v385_v24 }
  0x29   : > { %v389_v26 = vld [vmem:[%s1516_s26 + $0x340] sm:$0xff]  ;;  %388 = vst [vmem:[%s1521_s27 + $0xc8] sm:$0xff] %v387_v25 }
  0x2a   : > { %390 = vst [vmem:[%s1521_s27 + $0xd0] sm:$0xff] %v389_v26  ;;  %v391_v27 = vld [vmem:[%s1516_s26 + $0x360] sm:$0xff] }
  0x2b   : > { %v393_v28 = vld [vmem:[%s1516_s26 + $0x380] sm:$0xff]  ;;  %392 = vst [vmem:[%s1521_s27 + $0xd8] sm:$0xff] %v391_v27 }
  0x2c   : > { %v395_v29 = vld [vmem:[%s1516_s26 + $0x3a0] sm:$0xff]  ;;  %394 = vst [vmem:[%s1521_s27 + $0xe0] sm:$0xff] %v393_v28 }
  0x2d   : > { %396 = vst [vmem:[%s1521_s27 + $0xe8] sm:$0xff] %v395_v29  ;;  %v397_v30 = vld [vmem:[%s1516_s26 + $0x3c0] sm:$0xff] }
  0x2e   : > { %v399_v31 = vld [vmem:[%s1516_s26 + $0x3e0] sm:$0xff]  ;;  %398 = vst [vmem:[%s1521_s27 + $0xf0] sm:$0xff] %v397_v30 }
  0x2f   : > { %v401_v32 = vld [vmem:[%s1516_s26 + $0x400] sm:$0xff]  ;;  %400 = vst [vmem:[%s1521_s27 + $0xf8] sm:$0xff] %v399_v31 }
  0x30   : > { %402 = vst [vmem:[%s1521_s27 + $0x100] sm:$0xff] %v401_v32  ;;  %v403_v33 = vld [vmem:[%s1516_s26 + $0x420] sm:$0xff] }
  0x31   : > { %v405_v34 = vld [vmem:[%s1516_s26 + $0x440] sm:$0xff]  ;;  %404 = vst [vmem:[%s1521_s27 + $0x108] sm:$0xff] %v403_v33 }
  0x32   : > { %v407_v35 = vld [vmem:[%s1516_s26 + $0x460] sm:$0xff]  ;;  %406 = vst [vmem:[%s1521_s27 + $0x110] sm:$0xff] %v405_v34 }
  0x33   : > { %408 = vst [vmem:[%s1521_s27 + $0x118] sm:$0xff] %v407_v35  ;;  %v409_v36 = vld [vmem:[%s1516_s26 + $0x480] sm:$0xff] }
  0x34   : > { %v411_v37 = vld [vmem:[%s1516_s26 + $0x4a0] sm:$0xff]  ;;  %410 = vst [vmem:[%s1521_s27 + $0x120] sm:$0xff] %v409_v36 }
  0x35   : > { %v413_v38 = vld [vmem:[%s1516_s26 + $0x4c0] sm:$0xff]  ;;  %412 = vst [vmem:[%s1521_s27 + $0x128] sm:$0xff] %v411_v37 }
  0x36   : > { %414 = vst [vmem:[%s1521_s27 + $0x130] sm:$0xff] %v413_v38  ;;  %v415_v39 = vld [vmem:[%s1516_s26 + $0x4e0] sm:$0xff] }
  0x37   : > { %v417_v40 = vld [vmem:[%s1516_s26 + $0x500] sm:$0xff]  ;;  %416 = vst [vmem:[%s1521_s27 + $0x138] sm:$0xff] %v415_v39 }
  0x38   : > { %v419_v41 = vld [vmem:[%s1516_s26 + $0x520] sm:$0xff]  ;;  %418 = vst [vmem:[%s1521_s27 + $0x140] sm:$0xff] %v417_v40 }
  0x39   : > { %420 = vst [vmem:[%s1521_s27 + $0x148] sm:$0xff] %v419_v41  ;;  %v421_v42 = vld [vmem:[%s1516_s26 + $0x540] sm:$0xff] }
  0x3a   : > { %v423_v43 = vld [vmem:[%s1516_s26 + $0x560] sm:$0xff]  ;;  %422 = vst [vmem:[%s1521_s27 + $0x150] sm:$0xff] %v421_v42 }
  0x3b   : > { %v425_v44 = vld [vmem:[%s1516_s26 + $0x580] sm:$0xff]  ;;  %424 = vst [vmem:[%s1521_s27 + $0x158] sm:$0xff] %v423_v43 }
  0x3c   : > { %426 = vst [vmem:[%s1521_s27 + $0x160] sm:$0xff] %v425_v44  ;;  %v427_v45 = vld [vmem:[%s1516_s26 + $0x5a0] sm:$0xff] }
  0x3d   : > { %v429_v46 = vld [vmem:[%s1516_s26 + $0x5c0] sm:$0xff]  ;;  %428 = vst [vmem:[%s1521_s27 + $0x168] sm:$0xff] %v427_v45 }
  0x3e   : > { %v431_v47 = vld [vmem:[%s1516_s26 + $0x5e0] sm:$0xff]  ;;  %430 = vst [vmem:[%s1521_s27 + $0x170] sm:$0xff] %v429_v46 }
  0x3f   : > { %432 = vst [vmem:[%s1521_s27 + $0x178] sm:$0xff] %v431_v47  ;;  %v433_v48 = vld [vmem:[%s1516_s26 + $0x600] sm:$0xff] }
  0x40   : > { %v435_v49 = vld [vmem:[%s1516_s26 + $0x620] sm:$0xff]  ;;  %434 = vst [vmem:[%s1521_s27 + $0x180] sm:$0xff] %v433_v48 }
  0x41   : > { %v437_v50 = vld [vmem:[%s1516_s26 + $0x640] sm:$0xff]  ;;  %436 = vst [vmem:[%s1521_s27 + $0x188] sm:$0xff] %v435_v49 }
  0x42   : > { %438 = vst [vmem:[%s1521_s27 + $0x190] sm:$0xff] %v437_v50  ;;  %v439_v51 = vld [vmem:[%s1516_s26 + $0x660] sm:$0xff] }
  0x43   : > { %v441_v52 = vld [vmem:[%s1516_s26 + $0x680] sm:$0xff]  ;;  %440 = vst [vmem:[%s1521_s27 + $0x198] sm:$0xff] %v439_v51 }
  0x44   : > { %v443_v53 = vld [vmem:[%s1516_s26 + $0x6a0] sm:$0xff]  ;;  %442 = vst [vmem:[%s1521_s27 + $0x1a0] sm:$0xff] %v441_v52 }
  0x45   : > { %444 = vst [vmem:[%s1521_s27 + $0x1a8] sm:$0xff] %v443_v53  ;;  %v445_v54 = vld [vmem:[%s1516_s26 + $0x6c0] sm:$0xff] }
  0x46   : > { %v447_v55 = vld [vmem:[%s1516_s26 + $0x6e0] sm:$0xff]  ;;  %446 = vst [vmem:[%s1521_s27 + $0x1b0] sm:$0xff] %v445_v54 }
  0x47   : > { %v449_v56 = vld [vmem:[%s1516_s26 + $0x700] sm:$0xff]  ;;  %448 = vst [vmem:[%s1521_s27 + $0x1b8] sm:$0xff] %v447_v55 }
  0x48   : > { %450 = vst [vmem:[%s1521_s27 + $0x1c0] sm:$0xff] %v449_v56  ;;  %v451_v57 = vld [vmem:[%s1516_s26 + $0x720] sm:$0xff] }
  0x49   : > { %v453_v58 = vld [vmem:[%s1516_s26 + $0x740] sm:$0xff]  ;;  %452 = vst [vmem:[%s1521_s27 + $0x1c8] sm:$0xff] %v451_v57 }
  0x4a   : > { %v455_v59 = vld [vmem:[%s1516_s26 + $0x760] sm:$0xff]  ;;  %454 = vst [vmem:[%s1521_s27 + $0x1d0] sm:$0xff] %v453_v58 }
  0x4b   : > { %456 = vst [vmem:[%s1521_s27 + $0x1d8] sm:$0xff] %v455_v59  ;;  %v457_v60 = vld [vmem:[%s1516_s26 + $0x780] sm:$0xff] }
  0x4c   : > { %v459_v61 = vld [vmem:[%s1516_s26 + $0x7a0] sm:$0xff]  ;;  %458 = vst [vmem:[%s1521_s27 + $0x1e0] sm:$0xff] %v457_v60 }
  0x4d   : > { %v461_v62 = vld [vmem:[%s1516_s26 + $0x7c0] sm:$0xff]  ;;  %460 = vst [vmem:[%s1521_s27 + $0x1e8] sm:$0xff] %v459_v61 }
  0x4e   : > { %462 = vst [vmem:[%s1521_s27 + $0x1f0] sm:$0xff] %v461_v62  ;;  %v463_v63 = vld [vmem:[%s1516_s26 + $0x7e0] sm:$0xff] }
  0x4f   : > { %464 = vst [vmem:[%s1521_s27 + $0x1f8] sm:$0xff] %v463_v63 }
  0x50 PF: > { %p1197_p6 = scmp.ge.s32.totalorder %s1451_s16, 1  ;;  %p477_p7 = scmp.lt.s32.totalorder %s1451_s16, 5 }
  0x52   : > { %p478_p8 = pnand %p1197_p6, %p477_p7 }
  0x53   : > { %s484_s28 = sand.u32 (!%p478_p8), 1, %s1435_s12   ;;  %s1199_s8 = sshll.u32 (!%p478_p8), %s1443_s14, 1 }
  0x54   : > { %481 = sbr.rel (%p478_p8) target bundleno = 356 (0x164), region = 66  ;;  %s1198_s6 = sshll.u32 (!%p478_p8), %s484_s28, 9 }
  0x55   : > { %s1665_s7 = scalar_lea.vmem (!%p478_p8), [#allocation3], %s1198_s6  ;;  %p537_p9 = scmp.lt.s32.totalorder (!%p478_p8), %s1199_s8, 7 }
  0x59   : > { %v1654_v0 = vld [vmem:[%s1757_s0] sm:$0xff]  ;;  %v1659_v1 = vld [vmem:[%s1757_s0 + $0x8] sm:$0xff]  ;;  %v1313_v4 = vld [vmem:[%s1665_s7 + $0x74] ss:$8 sps:$4 sm:$0xff]   ;;  %s1768_s8 = smov (!%p537_p9, %s1199_s8), 7 }
  0x5a   : > { %v1203_v2 = vcombine.high %v1654_v0, %v1654_v0  ;;  %v1205_v3 = vcombine.high %v1659_v1, %v1659_v1  ;;  %v1315_v5 = vld [vmem:[%s1665_s7 + $0x174] ss:$8 sps:$4 sm:$0xff]   ;;  %959 = vmatprep.subr.bf16.mxu0 %v1313_v4  ;;  %v1317_v6 = vld [vmem:[%s1665_s7 + $0x70] ss:$8 sps:$4 sm:$0xff]   ;;  %v1319_v8 = vld [vmem:[%s1665_s7 + $0x64] ss:$8 sps:$4 sm:$0xff]   ;;  %s539_s11 = scalar_lea.vmem %s1759_s2, %s1768_s8 }
  0x5b   : > { %v1318_v7 = vld [vmem:[%s1665_s7 + $0x170] ss:$8 sps:$4 sm:$0xff]   ;;  %1000 = vmatprep.subr.bf16.mxu1 %v1315_v5  ;;  %960 = vmatpush1.bf16.msra.mxu0 %v1317_v6  ;;  %v1321_v9 = vld [vmem:[%s1665_s7 + $0x164] ss:$8 sps:$4 sm:$0xff]   ;;  %v1323_v10 = vld [vmem:[%s1665_s7 + $0x60] ss:$8 sps:$4 sm:$0xff]   ;;  %v1202_v6 = vcombine.low %v1654_v0, %v1654_v0 }
  0x5c   : > { %991 = vmatprep.mubr.bf16.mxu0 %v1203_v2  ;;  %1032 = vmatprep.mubr.bf16.mxu1 %v1205_v3  ;;  %v1324_v11 = vld [vmem:[%s1665_s7 + $0x160] ss:$8 sps:$4 sm:$0xff]   ;;  %v1325_v12 = vld [vmem:[%s1665_s7 + $0x54] ss:$8 sps:$4 sm:$0xff]   ;;  %v1329_v14 = vld [vmem:[%s1665_s7 + $0x50] ss:$8 sps:$4 sm:$0xff]  }
  0x5d   : > { %1001 = vmatpush1.bf16.msra.mxu1 %v1318_v7  ;;  %961 = vmatprep.subr.bf16.mxu0 %v1319_v8  ;;  %v1327_v13 = vld [vmem:[%s1665_s7 + $0x154] ss:$8 sps:$4 sm:$0xff]   ;;  %v1330_v15 = vld [vmem:[%s1665_s7 + $0x150] ss:$8 sps:$4 sm:$0xff]   ;;  %v1331_v16 = vld [vmem:[%s1665_s7 + $0x44] ss:$8 sps:$4 sm:$0xff]   ;;  %v1204_v7 = vcombine.low %v1659_v1, %v1659_v1  ;;  %v1052_v8 = vlaneseq }
  0x5e   : > { %1002 = vmatprep.subr.bf16.mxu1 %v1321_v9  ;;  %v1333_v17 = vld [vmem:[%s1665_s7 + $0x144] ss:$8 sps:$4 sm:$0xff]   ;;  %v1335_v18 = vld [vmem:[%s1665_s7 + $0x40] ss:$8 sps:$4 sm:$0xff]   ;;  %v1337_v20 = vld [vmem:[%s1665_s7 + $0x34] ss:$8 sps:$4 sm:$0xff]  }
  0x5f   : > { %962 = vmatpush1.bf16.msra.mxu0 %v1323_v10  ;;  %v1336_v19 = vld [vmem:[%s1665_s7 + $0x140] ss:$8 sps:$4 sm:$0xff]   ;;  %v1339_v21 = vld [vmem:[%s1665_s7 + $0x134] ss:$8 sps:$4 sm:$0xff]   ;;  %v1341_v22 = vld [vmem:[%s1665_s7 + $0x30] ss:$8 sps:$4 sm:$0xff]  }
  0x60   : > { %963 = vmatprep.subr.bf16.mxu0 %v1325_v12  ;;  %v1342_v23 = vld [vmem:[%s1665_s7 + $0x130] ss:$8 sps:$4 sm:$0xff]   ;;  %v1343_v24 = vld [vmem:[%s1665_s7 + $0x24] ss:$8 sps:$4 sm:$0xff]   ;;  %v1347_v26 = vld [vmem:[%s1665_s7 + $0x20] ss:$8 sps:$4 sm:$0xff]  }
  0x61   : > { %1003 = vmatpush1.bf16.msra.mxu1 %v1324_v11  ;;  %v1345_v25 = vld [vmem:[%s1665_s7 + $0x124] ss:$8 sps:$4 sm:$0xff]   ;;  %v1348_v27 = vld [vmem:[%s1665_s7 + $0x120] ss:$8 sps:$4 sm:$0xff]   ;;  %v1349_v28 = vld [vmem:[%s1665_s7 + $0x14] ss:$8 sps:$4 sm:$0xff]  }
  0x62   : > { %1004 = vmatprep.subr.bf16.mxu1 %v1327_v13  ;;  %v1351_v29 = vld [vmem:[%s1665_s7 + $0x114] ss:$8 sps:$4 sm:$0xff]   ;;  %v1353_v30 = vld [vmem:[%s1665_s7 + $0x10] ss:$8 sps:$4 sm:$0xff]   ;;  %v1355_v32 = vld [vmem:[%s1665_s7 + $0x4] ss:$8 sps:$4 sm:$0xff]  }
  0x63   : > { %964 = vmatpush1.bf16.msra.mxu0 %v1329_v14  ;;  %v1354_v31 = vld [vmem:[%s1665_s7 + $0x110] ss:$8 sps:$4 sm:$0xff]   ;;  %v1357_v33 = vld [vmem:[%s1665_s7 + $0x104] ss:$8 sps:$4 sm:$0xff]   ;;  %v1359_v34 = vld [vmem:[%s1665_s7] ss:$8 sps:$4 sm:$0xff]  }
  0x64   : > { %965 = vmatprep.subr.bf16.mxu0 %v1331_v16  ;;  %v1360_v35 = vld [vmem:[%s1665_s7 + $0x100] ss:$8 sps:$4 sm:$0xff]   ;;  %v1361_v36 = vld [vmem:[%s1665_s7 + $0xf4] ss:$8 sps:$4 sm:$0xff]   ;;  %v1365_v38 = vld [vmem:[%s1665_s7 + $0xf0] ss:$8 sps:$4 sm:$0xff]  }
  0x65   : > { %1005 = vmatpush1.bf16.msra.mxu1 %v1330_v15  ;;  %v1363_v37 = vld [vmem:[%s1665_s7 + $0x1f4] ss:$8 sps:$4 sm:$0xff]   ;;  %v1366_v39 = vld [vmem:[%s1665_s7 + $0x1f0] ss:$8 sps:$4 sm:$0xff]   ;;  %v1367_v40 = vld [vmem:[%s1665_s7 + $0xe4] ss:$8 sps:$4 sm:$0xff]  }
  0x66   : > { %1006 = vmatprep.subr.bf16.mxu1 %v1333_v17  ;;  %v1369_v41 = vld [vmem:[%s1665_s7 + $0x1e4] ss:$8 sps:$4 sm:$0xff]   ;;  %v1371_v42 = vld [vmem:[%s1665_s7 + $0xe0] ss:$8 sps:$4 sm:$0xff]   ;;  %v1373_v44 = vld [vmem:[%s1665_s7 + $0xd4] ss:$8 sps:$4 sm:$0xff]  }
  0x67   : > { %966 = vmatpush1.bf16.msra.mxu0 %v1335_v18  ;;  %v1372_v43 = vld [vmem:[%s1665_s7 + $0x1e0] ss:$8 sps:$4 sm:$0xff]   ;;  %v1375_v45 = vld [vmem:[%s1665_s7 + $0x1d4] ss:$8 sps:$4 sm:$0xff]   ;;  %v1377_v46 = vld [vmem:[%s1665_s7 + $0xd0] ss:$8 sps:$4 sm:$0xff]  }
  0x68   : > { %967 = vmatprep.subr.bf16.mxu0 %v1337_v20  ;;  %v1378_v47 = vld [vmem:[%s1665_s7 + $0x1d0] ss:$8 sps:$4 sm:$0xff]   ;;  %v1379_v48 = vld [vmem:[%s1665_s7 + $0xc4] ss:$8 sps:$4 sm:$0xff]   ;;  %v1383_v50 = vld [vmem:[%s1665_s7 + $0xc0] ss:$8 sps:$4 sm:$0xff]  }
  0x69   : > { %1007 = vmatpush1.bf16.msra.mxu1 %v1336_v19  ;;  %v1381_v49 = vld [vmem:[%s1665_s7 + $0x1c4] ss:$8 sps:$4 sm:$0xff]   ;;  %v1384_v51 = vld [vmem:[%s1665_s7 + $0x1c0] ss:$8 sps:$4 sm:$0xff]   ;;  %v1385_v52 = vld [vmem:[%s1665_s7 + $0xb4] ss:$8 sps:$4 sm:$0xff]  }
  0x6a   : > { %1008 = vmatprep.subr.bf16.mxu1 %v1339_v21  ;;  %v1387_v53 = vld [vmem:[%s1665_s7 + $0x1b4] ss:$8 sps:$4 sm:$0xff]   ;;  %v1389_v54 = vld [vmem:[%s1665_s7 + $0xb0] ss:$8 sps:$4 sm:$0xff]   ;;  %v1391_v56 = vld [vmem:[%s1665_s7 + $0xa4] ss:$8 sps:$4 sm:$0xff]  }
  0x6b   : > { %968 = vmatpush1.bf16.msra.mxu0 %v1341_v22  ;;  %v1390_v55 = vld [vmem:[%s1665_s7 + $0x1b0] ss:$8 sps:$4 sm:$0xff]   ;;  %v1393_v57 = vld [vmem:[%s1665_s7 + $0x1a4] ss:$8 sps:$4 sm:$0xff]   ;;  %v1395_v58 = vld [vmem:[%s1665_s7 + $0xa0] ss:$8 sps:$4 sm:$0xff]  }
  0x6c   : > { %969 = vmatprep.subr.bf16.mxu0 %v1343_v24  ;;  %v1396_v59 = vld [vmem:[%s1665_s7 + $0x1a0] ss:$8 sps:$4 sm:$0xff]   ;;  %v1397_v60 = vld [vmem:[%s1665_s7 + $0x94] ss:$8 sps:$4 sm:$0xff]   ;;  %v1401_v62 = vld [vmem:[%s1665_s7 + $0x90] ss:$8 sps:$4 sm:$0xff]  }
  0x6d   : > { %1009 = vmatpush1.bf16.msra.mxu1 %v1342_v23  ;;  %v1399_v61 = vld [vmem:[%s1665_s7 + $0x194] ss:$8 sps:$4 sm:$0xff]   ;;  %v1402_v63 = vld [vmem:[%s1665_s7 + $0x190] ss:$8 sps:$4 sm:$0xff]   ;;  %v1403_v2 = vld [vmem:[%s1665_s7 + $0x84] ss:$8 sps:$4 sm:$0xff]  }
  0x6e   : > { %1010 = vmatprep.subr.bf16.mxu1 %v1345_v25  ;;  %v1405_v3 = vld [vmem:[%s1665_s7 + $0x184] ss:$8 sps:$4 sm:$0xff]   ;;  %v1407_v4 = vld [vmem:[%s1665_s7 + $0x80] ss:$8 sps:$4 sm:$0xff]   ;;  %v1053_v9 = vshrl.u32 %v1052_v8, 7  ;;  %s1201_s12 = sshll.u32 %s1768_s8, 3 }
  0x6f   : > { %970 = vmatpush1.bf16.msra.mxu0 %v1347_v26  ;;  %v1408_v5 = vld [vmem:[%s1665_s7 + $0x180] ss:$8 sps:$4 sm:$0xff]   ;;  %s549_s14 = scalar_lea.vmem %s1760_s3, %s1201_s12 }
  0x70   : > { %971 = vmatprep.subr.bf16.mxu0 %v1349_v28  ;;  %v1054_v10 = vsub.s32 0, %v1053_v9  ;;  %v1050_v11 = vld [vmem:[%s539_s11] sm:$0x3]  ;;  %v1058_v12 = vsub.s32 1, %v1053_v9 }
  0x71   : > { %1011 = vmatpush1.bf16.msra.mxu1 %v1348_v27 }
  0x72   : > { %1012 = vmatprep.subr.bf16.mxu1 %v1351_v29  ;;  %v1055_v0 = vrot.slane %v1050_v11, %v1054_v10  ;;  %v1059_v15 = vrot.slane %v1050_v11, %v1058_v12 }
  0x73   : > { %972 = vmatpush1.bf16.msra.mxu0 %v1353_v30 }
  0x74   : > { %973 = vmatprep.subr.bf16.mxu0 %v1355_v32 }
  0x75   : > { %1013 = vmatpush1.bf16.msra.mxu1 %v1354_v31 }
  0x76   : > { %1014 = vmatprep.subr.bf16.mxu1 %v1357_v33 }
  0x77   : > { %974 = vmatpush1.bf16.msra.mxu0 %v1359_v34 }
  0x78   : > { %975 = vmatprep.subr.bf16.mxu0 %v1361_v36 }
  0x79   : > { %1015 = vmatpush1.bf16.msra.mxu1 %v1360_v35 }
  0x7a   : > { %1016 = vmatprep.subr.bf16.mxu1 %v1363_v37 }
  0x7b   : > { %976 = vmatpush2.bf16.msra.mxu0 %v1365_v38 }
  0x7c   : > { %977 = vmatprep.subr.bf16.mxu0 %v1367_v40 }
  0x7d   : > { %1017 = vmatpush2.bf16.msra.mxu1 %v1366_v39 }
  0x7e   : > { %1018 = vmatprep.subr.bf16.mxu1 %v1369_v41 }
  0x7f   : > { %978 = vmatpush2.bf16.msra.mxu0 %v1371_v42 }
  0x80   : > { %979 = vmatprep.subr.bf16.mxu0 %v1373_v44 }
  0x81   : > { %1019 = vmatpush2.bf16.msra.mxu1 %v1372_v43 }
  0x82   : > { %1020 = vmatprep.subr.bf16.mxu1 %v1375_v45 }
  0x83   : > { %980 = vmatpush2.bf16.msra.mxu0 %v1377_v46 }
  0x84   : > { %981 = vmatprep.subr.bf16.mxu0 %v1379_v48 }
  0x85   : > { %1021 = vmatpush2.bf16.msra.mxu1 %v1378_v47 }
  0x86   : > { %1022 = vmatprep.subr.bf16.mxu1 %v1381_v49 }
  0x87   : > { %982 = vmatpush2.bf16.msra.mxu0 %v1383_v50 }
  0x88   : > { %983 = vmatprep.subr.bf16.mxu0 %v1385_v52 }
  0x89   : > { %1023 = vmatpush2.bf16.msra.mxu1 %v1384_v51 }
  0x8a   : > { %1024 = vmatprep.subr.bf16.mxu1 %v1387_v53 }
  0x8b   : > { %984 = vmatpush2.bf16.msra.mxu0 %v1389_v54 }
  0x8c   : > { %985 = vmatprep.subr.bf16.mxu0 %v1391_v56 }
  0x8d   : > { %1025 = vmatpush2.bf16.msra.mxu1 %v1390_v55 }
  0x8e   : > { %1026 = vmatprep.subr.bf16.mxu1 %v1393_v57 }
  0x8f   : > { %986 = vmatpush2.bf16.msra.mxu0 %v1395_v58 }
  0x90   : > { %987 = vmatprep.subr.bf16.mxu0 %v1397_v60 }
  0x91   : > { %1027 = vmatpush2.bf16.msra.mxu1 %v1396_v59 }
  0x92   : > { %1028 = vmatprep.subr.bf16.mxu1 %v1399_v61 }
  0x93   : > { %988 = vmatpush2.bf16.msra.mxu0 %v1401_v62 }
  0x94   : > { %989 = vmatprep.subr.bf16.mxu0 %v1403_v2 }
  0x95   : > { %1029 = vmatpush2.bf16.msra.mxu1 %v1402_v63 }
  0x96   : > { %1030 = vmatprep.subr.bf16.mxu1 %v1405_v3 }
  0x97   : > { %990 = vmatpush2.bf16.msra.mxu0 %v1407_v4 }
  0x99   : > { %1031 = vmatpush2.bf16.msra.mxu1 %v1408_v5 }
  0x9a   : > { %992 = vmatmul.mubr.bf16.vlgmr.msra.gmra.mxu0 %v1202_v6 }
  0x9c   : > { %1033 = vmatmul.mubr.bf16.vlgmr.msra.gmra.mxu1 %v1204_v7 }
 0x15a   : > { %v993_v13 = vpop.f32.mrf.mxu0 }
 0x15c   : > { %v1034_v1 = vpop.f32.mrf.mxu1  ;;  %v995_v16 = vpop.f32.mrf.mxu0 }
 0x15d   : > { %v1035_v14 = vadd.f32 %v1034_v1, %v993_v13 }
 0x15e   : > { %v1036_v17 = vpop.f32.mrf.mxu1  ;;  %v997_v20 = vpop.f32.mrf.mxu0 }
 0x15f   : > { %v1062_v18 = vadd.f32 %v1055_v0, %v1035_v14  ;;  %v1037_v19 = vadd.f32 %v1036_v17, %v995_v16 }
 0x160   : > { %v1038_v21 = vpop.f32.mrf.mxu1  ;;  %v998_v23 = vpop.f32.mrf.mxu0 }
 0x161   : > { %1064 = vst [vmem:[%s549_s14] sm:$0xff] %v1062_v18  ;;  %v1063_v22 = vadd.f32 %v1059_v15, %v1037_v19 }
 0x162   : > { %v1039_v24 = vpop.f32.mrf.mxu1 }
 0x163   : > { %1065 = vst [vmem:[%s549_s14 + $0x8] sm:$0xff] %v1063_v22 }
 0x164 PF: > { %s13_s16 = sadd.s32 1, %s1451_s16   ;;  %s1761_s12 = smov %s1439_s13 }
 0x165   : > { %p10_p10 = scmp.ge.s32.totalorder %s13_s16, 6   ;;  %s1762_s13 = smov %s1508_s20 }
 0x166   : > { %s1763_s14 = smov %s1447_s15  ;;  %s1764_s15 = smov %s1766_s17 }
 0x167   :  { %12 = sbr.rel (!%p10_p10) target bundleno = 3 (0x3), region = 119 }

// kernel: generator_forward.48
= control target key start
LH: loop header
LB: loop body
LE: loop exit
PB: predicated region body
PF: predicated region fallthrough
CT: control target
= control target key end

     0   :  { %v21_v0 = vlaneseq  ;;  %s108_s1 = inlined_call_operand.vmem [shape: f32[1,256], index: 1, kind: input, shape index: {}]   ;;  %s109_s2 = inlined_call_operand.vmem [shape: f32[1,256], index: 2, kind: input, shape index: {}]   ;;  %s110_s0 = inlined_call_operand.vmem [shape: f32[8,256], index: 0, kind: input, shape index: {}]   ;;  %s111_s3 = inlined_call_operand.vmem [shape: f32[8,256], index: 3, kind: input, shape index: {}]   ;;  %s112_s4 = inlined_call_operand.vmem [shape: f32[8,256], index: 4, kind: output, shape index: {}]  }
   0x1   :  { %v19_v2 = vld [vmem:[%s108_s1] sm:$0x3]  ;;  %v18_v7 = vld [vmem:[%s110_s0 + $0x8] sm:$0xff] }
   0x2   :  { %v22_v1 = vshrl.u32 %v21_v0, 7  ;;  %v33_v3 = vld [vmem:[%s109_s2] sm:$0x3]  ;;  %v50_v17 = vld [vmem:[%s111_s3 + $0x8] sm:$0xff] }
   0x3   :  { %v17_v6 = vld [vmem:[%s110_s0] sm:$0xff] }
   0x4   :  { %v23_v4 = vsub.s32 0, %v22_v1  ;;  %v27_v5 = vsub.s32 1, %v22_v1  ;;  %v49_v16 = vld [vmem:[%s111_s3] sm:$0xff] }
   0x6   :  { %v24_v8 = vrot.slane %v19_v2, %v23_v4  ;;  %v38_v9 = vrot.slane %v33_v3, %v23_v4  ;;  %v28_v10 = vrot.slane %v19_v2, %v27_v5  ;;  %v42_v11 = vrot.slane %v33_v3, %v27_v5 }
   0x8   :  { %v31_v12 = vmul.f32 %v24_v8, %v17_v6  ;;  %v32_v13 = vmul.f32 %v28_v10, %v18_v7 }
   0xa   :  { %v45_v14 = vadd.f32 %v38_v9, %v31_v12  ;;  %v46_v15 = vadd.f32 %v42_v11, %v32_v13 }
   0xc   :  { %v47_v18 = vmax.f32 %v45_v14, 0.0  ;;  %v48_v19 = vmax.f32 %v46_v15, 0.0 }
   0xe   :  { %v51_v20 = vadd.f32 %v49_v16, %v47_v18  ;;  %v52_v21 = vadd.f32 %v50_v17, %v48_v19 }
  0x10   :  { %53 = vst [vmem:[%s112_s4] sm:$0xff] %v51_v20  ;;  %54 = vst [vmem:[%s112_s4 + $0x8] sm:$0xff] %v52_v21 }

// kernel: generator_forward.49
= control target key start
LH: loop header
LB: loop body
LE: loop exit
PB: predicated region body
PF: predicated region fallthrough
CT: control target
= control target key end

     0   :  { %s1020_s12 = smov 0   ;;  %s1022_s13 = smov 0   ;;  %s1199_s0 = inlined_call_operand.vmem [shape: bf16[8,256], index: 0, kind: input, shape index: {}]   ;;  %s1200_s1 = inlined_call_operand.vmem [shape: bf16[256,512], index: 1, kind: input, shape index: {}]   ;;  %s1201_s2 = inlined_call_operand.vmem [shape: f32[1,512], index: 2, kind: input, shape index: {}]   ;;  %s1202_s3 = inlined_call_operand.vmem [shape: f32[8,512], index: 3, kind: output, shape index: {}]  }
   0x1   :  { %s1024_s14 = smov 0   ;;  %s1026_s15 = smov 0  }
   0x2   :  { %s1028_s16 = smov 0  }
   0x3 LB: > { %s28_s17 = sadd.s32 1, %s994_s15  ;;  %p76_p1 = scmp.ne.s32.totalorder %s986_s13, %s982_s12  ;;  %s998_s16 = sphi %s1028_s16, %s13_s16   ;;  %s994_s15 = sphi %s1026_s15, %s1206_s15   ;;  %s990_s14 = sphi %s1024_s14, %s1205_s14   ;;  %s986_s13 = sphi %s1022_s13, %s1204_s13   ;;  %s982_s12 = sphi %s1020_s12, %s1203_s12  }
   0x4   : > { %p30_p0 = scmp.ge.s32.totalorder %s28_s17, 2  ;;  %p77_p2 = scmp.eq.s32.totalorder %s998_s16, 0 }
   0x5   : > { %s69_s19 = sadd.s32 1, %s986_s13  ;;  %p824_p5 = scmp.ge.s32.totalorder %s998_s16, 2 }
   0x6   : > { %s1208_s17 = smov (%p30_p0, %s28_s17), 0  ;;  %p78_p3 = por %p77_p2, %p76_p1 }
   0x7   : > { %s65_s18 = ssub.s32 %s994_s15, %s1208_s17  ;;  %169 = sbr.rel (%p824_p5) target bundleno = 32 (0x20), region = 20 }
   0x8   : > { %p67_p4 = scmp.eq.s32.totalorder %s65_s18, 0 }
   0xa   : > { %s1055_s20 = scalar_select %p67_p4, %s986_s13, %s69_s19  }
   0xc   : > { %172 = sbr.rel (!%p78_p3) target bundleno = 32 (0x20), region = 24  ;;  %s174_s21 = sand.u32 (%p78_p3), 1, %s986_s13  }
   0xd   : > { %s869_s22 = sshll.u32 (%p78_p3), %s994_s15, 3  ;;  %s825_s23 = sshll.u32 (%p78_p3), %s174_s21, 8 }
   0xe   : > { %s1063_s26 = scalar_lea.vmem (%p78_p3), %s1200_s1, %s869_s22  ;;  %s1068_s27 = scalar_lea.vmem (%p78_p3), [#allocation3], %s825_s23 }
   0xf   : > { %v273_v0 = vld [vmem:[%s1063_s26] sm:$0xff] (%p78_p3)  ;;  %v275_v1 = vld [vmem:[%s1063_s26 + $0x10] sm:$0xff] (%p78_p3) }
  0x10   : > { %v277_v2 = vld [vmem:[%s1063_s26 + $0x20] sm:$0xff] (%p78_p3)  ;;  %274 = vst [vmem:[%s1068_s27] sm:$0xff] (%p78_p3), %v273_v0  ;;  %276 = vst [vmem:[%s1068_s27 + $0x8] sm:$0xff] (%p78_p3), %v275_v1  ;;  %v279_v3 = vld [vmem:[%s1063_s26 + $0x30] sm:$0xff] (%p78_p3) }
  0x11   : > { %278 = vst [vmem:[%s1068_s27 + $0x10] sm:$0xff] %v277_v2  ;;  %v281_v4 = vld [vmem:[%s1063_s26 + $0x40] sm:$0xff]  ;;  %v283_v5 = vld [vmem:[%s1063_s26 + $0x50] sm:$0xff]  ;;  %280 = vst [vmem:[%s1068_s27 + $0x18] sm:$0xff] %v279_v3 }
  0x12   : > { %282 = vst [vmem:[%s1068_s27 + $0x20] sm:$0xff] %v281_v4  ;;  %284 = vst [vmem:[%s1068_s27 + $0x28] sm:$0xff] %v283_v5  ;;  %v285_v6 = vld [vmem:[%s1063_s26 + $0x60] sm:$0xff]  ;;  %v287_v7 = vld [vmem:[%s1063_s26 + $0x70] sm:$0xff] }
  0x13   : > { %v289_v8 = vld [vmem:[%s1063_s26 + $0x80] sm:$0xff]  ;;  %286 = vst [vmem:[%s1068_s27 + $0x30] sm:$0xff] %v285_v6  ;;  %288 = vst [vmem:[%s1068_s27 + $0x38] sm:$0xff] %v287_v7  ;;  %v291_v9 = vld [vmem:[%s1063_s26 + $0x90] sm:$0xff] }
  0x14   : > { %290 = vst [vmem:[%s1068_s27 + $0x40] sm:$0xff] %v289_v8  ;;  %v293_v10 = vld [vmem:[%s1063_s26 + $0xa0] sm:$0xff]  ;;  %v295_v11 = vld [vmem:[%s1063_s26 + $0xb0] sm:$0xff]  ;;  %292 = vst [vmem:[%s1068_s27 + $0x48] sm:$0xff] %v291_v9 }
  0x15   : > { %294 = vst [vmem:[%s1068_s27 + $0x50] sm:$0xff] %v293_v10  ;;  %296 = vst [vmem:[%s1068_s27 + $0x58] sm:$0xff] %v295_v11  ;;  %v297_v12 = vld [vmem:[%s1063_s26 + $0xc0] sm:$0xff]  ;;  %v299_v13 = vld [vmem:[%s1063_s26 + $0xd0] sm:$0xff] }
  0x16   : > { %v301_v14 = vld [vmem:[%s1063_s26 + $0xe0] sm:$0xff]  ;;  %298 = vst [vmem:[%s1068_s27 + $0x60] sm:$0xff] %v297_v12  ;;  %300 = vst [vmem:[%s1068_s27 + $0x68] sm:$0xff] %v299_v13  ;;  %v303_v15 = vld [vmem:[%s1063_s26 + $0xf0] sm:$0xff] }
  0x17   : > { %302 = vst [vmem:[%s1068_s27 + $0x70] sm:$0xff] %v301_v14  ;;  %v305_v16 = vld [vmem:[%s1063_s26 + $0x100] sm:$0xff]  ;;  %v307_v17 = vld [vmem:[%s1063_s26 + $0x110] sm:$0xff]  ;;  %304 = vst [vmem:[%s1068_s27 + $0x78] sm:$0xff] %v303_v15 }
  0x18   : > { %306 = vst [vmem:[%s1068_s27 + $0x80] sm:$0xff] %v305_v16  ;;  %308 = vst [vmem:[%s1068_s27 + $0x88] sm:$0xff] %v307_v17  ;;  %v309_v18 = vld [vmem:[%s1063_s26 + $0x120] sm:$0xff]  ;;  %v311_v19 = vld [vmem:[%s1063_s26 + $0x130] sm:$0xff] }
  0x19   : > { %v313_v20 = vld [vmem:[%s1063_s26 + $0x140] sm:$0xff]  ;;  %310 = vst [vmem:[%s1068_s27 + $0x90] sm:$0xff] %v309_v18  ;;  %312 = vst [vmem:[%s1068_s27 + $0x98] sm:$0xff] %v311_v19  ;;  %v315_v21 = vld [vmem:[%s1063_s26 + $0x150] sm:$0xff] }
  0x1a   : > { %314 = vst [vmem:[%s1068_s27 + $0xa0] sm:$0xff] %v313_v20  ;;  %v317_v22 = vld [vmem:[%s1063_s26 + $0x160] sm:$0xff]  ;;  %v319_v23 = vld [vmem:[%s1063_s26 + $0x170] sm:$0xff]  ;;  %316 = vst [vmem:[%s1068_s27 + $0xa8] sm:$0xff] %v315_v21 }
  0x1b   : > { %318 = vst [vmem:[%s1068_s27 + $0xb0] sm:$0xff] %v317_v22  ;;  %320 = vst [vmem:[%s1068_s27 + $0xb8] sm:$0xff] %v319_v23  ;;  %v321_v24 = vld [vmem:[%s1063_s26 + $0x180] sm:$0xff]  ;;  %v323_v25 = vld [vmem:[%s1063_s26 + $0x190] sm:$0xff] }
  0x1c   : > { %v325_v26 = vld [vmem:[%s1063_s26 + $0x1a0] sm:$0xff]  ;;  %322 = vst [vmem:[%s1068_s27 + $0xc0] sm:$0xff] %v321_v24  ;;  %324 = vst [vmem:[%s1068_s27 + $0xc8] sm:$0xff] %v323_v25  ;;  %v327_v27 = vld [vmem:[%s1063_s26 + $0x1b0] sm:$0xff] }
  0x1d   : > { %326 = vst [vmem:[%s1068_s27 + $0xd0] sm:$0xff] %v325_v26  ;;  %v329_v28 = vld [vmem:[%s1063_s26 + $0x1c0] sm:$0xff]  ;;  %v331_v29 = vld [vmem:[%s1063_s26 + $0x1d0] sm:$0xff]  ;;  %328 = vst [vmem:[%s1068_s27 + $0xd8] sm:$0xff] %v327_v27 }
  0x1e   : > { %330 = vst [vmem:[%s1068_s27 + $0xe0] sm:$0xff] %v329_v28  ;;  %332 = vst [vmem:[%s1068_s27 + $0xe8] sm:$0xff] %v331_v29  ;;  %v333_v30 = vld [vmem:[%s1063_s26 + $0x1e0] sm:$0xff]  ;;  %v335_v31 = vld [vmem:[%s1063_s26 + $0x1f0] sm:$0xff] }
  0x1f   : > { %334 = vst [vmem:[%s1068_s27 + $0xf0] sm:$0xff] %v333_v30  ;;  %336 = vst [vmem:[%s1068_s27 + $0xf8] sm:$0xff] %v335_v31 }
  0x20 PF: > { %p828_p6 = scmp.ge.s32.totalorder %s998_s16, 1  ;;  %p349_p7 = scmp.lt.s32.totalorder %s998_s16, 3 }
  0x22   : > { %p350_p8 = pnand %p828_p6, %p349_p7 }
  0x23   : > { %s356_s28 = sand.u32 (!%p350_p8), 1, %s982_s12   ;;  %s830_s6 = sshll.u32 (!%p350_p8), %s990_s14, 1 }
  0x24   : > { %353 = sbr.rel (%p350_p8) target bundleno = 305 (0x131), region = 66  ;;  %s829_s4 = sshll.u32 (!%p350_p8), %s356_s28, 8 }
  0x25   : > { %s1141_s5 = scalar_lea.vmem (!%p350_p8), [#allocation3], %s829_s4  ;;  %p409_p9 = scmp.lt.s32.totalorder (!%p350_p8), %s830_s6, 3 }
  0x29   : > { %v1137_v32 = vld [vmem:[%s1199_s0] sm:$0xff]  ;;  %v910_v34 = vld [vmem:[%s1141_s5 + $0x74] ss:$8 sps:$4 sm:$0xff]   ;;  %v912_v35 = vld [vmem:[%s1141_s5 + $0x70] ss:$8 sps:$4 sm:$0xff]   ;;  %v683_v3 = vlaneseq  ;;  %s1210_s6 = smov (!%p409_p9, %s830_s6), 3 }
  0x2a   : > { %v834_v33 = vcombine.high %v1137_v32, %v1137_v32  ;;  %631 = vmatprep.subr.bf16.mxu0 %v910_v34  ;;  %v913_v36 = vld [vmem:[%s1141_s5 + $0x64] ss:$8 sps:$4 sm:$0xff]   ;;  %v915_v37 = vld [vmem:[%s1141_s5 + $0x60] ss:$8 sps:$4 sm:$0xff]   ;;  %v916_v38 = vld [vmem:[%s1141_s5 + $0x54] ss:$8 sps:$4 sm:$0xff]   ;;  %v833_v2 = vcombine.low %v1137_v32, %v1137_v32  ;;  %s411_s9 = scalar_lea.vmem %s1201_s2, %s1210_s6 }
  0x2b   : > { %632 = vmatpush1.bf16.msra.mxu0 %v912_v35  ;;  %v918_v39 = vld [vmem:[%s1141_s5 + $0x50] ss:$8 sps:$4 sm:$0xff]   ;;  %v919_v40 = vld [vmem:[%s1141_s5 + $0x44] ss:$8 sps:$4 sm:$0xff]   ;;  %v921_v41 = vld [vmem:[%s1141_s5 + $0x40] ss:$8 sps:$4 sm:$0xff]  }
  0x2c   : > { %663 = vmatprep.mubr.bf16.mxu0 %v834_v33  ;;  %633 = vmatprep.subr.bf16.mxu0 %v913_v36  ;;  %v922_v42 = vld [vmem:[%s1141_s5 + $0x34] ss:$8 sps:$4 sm:$0xff]   ;;  %v924_v43 = vld [vmem:[%s1141_s5 + $0x30] ss:$8 sps:$4 sm:$0xff]   ;;  %v925_v44 = vld [vmem:[%s1141_s5 + $0x24] ss:$8 sps:$4 sm:$0xff]  }
  0x2d   : > { %v927_v45 = vld [vmem:[%s1141_s5 + $0x20] ss:$8 sps:$4 sm:$0xff]   ;;  %v928_v46 = vld [vmem:[%s1141_s5 + $0x14] ss:$8 sps:$4 sm:$0xff]   ;;  %v930_v47 = vld [vmem:[%s1141_s5 + $0x10] ss:$8 sps:$4 sm:$0xff]  }
  0x2e   : > { %v931_v48 = vld [vmem:[%s1141_s5 + $0x4] ss:$8 sps:$4 sm:$0xff]   ;;  %v933_v49 = vld [vmem:[%s1141_s5] ss:$8 sps:$4 sm:$0xff]   ;;  %v934_v50 = vld [vmem:[%s1141_s5 + $0xf4] ss:$8 sps:$4 sm:$0xff]  }
  0x2f   : > { %634 = vmatpush1.bf16.msra.mxu0 %v915_v37  ;;  %v936_v51 = vld [vmem:[%s1141_s5 + $0xf0] ss:$8 sps:$4 sm:$0xff]   ;;  %v937_v52 = vld [vmem:[%s1141_s5 + $0xe4] ss:$8 sps:$4 sm:$0xff]   ;;  %v939_v53 = vld [vmem:[%s1141_s5 + $0xe0] ss:$8 sps:$4 sm:$0xff]  }
  0x30   : > { %635 = vmatprep.subr.bf16.mxu0 %v916_v38  ;;  %v940_v54 = vld [vmem:[%s1141_s5 + $0xd4] ss:$8 sps:$4 sm:$0xff]   ;;  %v942_v55 = vld [vmem:[%s1141_s5 + $0xd0] ss:$8 sps:$4 sm:$0xff]   ;;  %v943_v56 = vld [vmem:[%s1141_s5 + $0xc4] ss:$8 sps:$4 sm:$0xff]  }
  0x31   : > { %v945_v57 = vld [vmem:[%s1141_s5 + $0xc0] ss:$8 sps:$4 sm:$0xff]   ;;  %v946_v58 = vld [vmem:[%s1141_s5 + $0xb4] ss:$8 sps:$4 sm:$0xff]   ;;  %v948_v59 = vld [vmem:[%s1141_s5 + $0xb0] ss:$8 sps:$4 sm:$0xff]  }
  0x32   : > { %v949_v60 = vld [vmem:[%s1141_s5 + $0xa4] ss:$8 sps:$4 sm:$0xff]   ;;  %v951_v61 = vld [vmem:[%s1141_s5 + $0xa0] ss:$8 sps:$4 sm:$0xff]   ;;  %v952_v62 = vld [vmem:[%s1141_s5 + $0x94] ss:$8 sps:$4 sm:$0xff]  }
  0x33   : > { %636 = vmatpush1.bf16.msra.mxu0 %v918_v39  ;;  %v954_v63 = vld [vmem:[%s1141_s5 + $0x90] ss:$8 sps:$4 sm:$0xff]   ;;  %v955_v0 = vld [vmem:[%s1141_s5 + $0x84] ss:$8 sps:$4 sm:$0xff]   ;;  %v957_v1 = vld [vmem:[%s1141_s5 + $0x80] ss:$8 sps:$4 sm:$0xff]  }
  0x34   : > { %637 = vmatprep.subr.bf16.mxu0 %v919_v40  ;;  %v684_v4 = vshrl.u32 %v683_v3, 7  ;;  %v681_v6 = vld [vmem:[%s411_s9] sm:$0x3]  ;;  %s832_s10 = sshll.u32 %s1210_s6, 3 }
  0x35   : > { %s421_s18 = scalar_lea.vmem %s1202_s3, %s832_s10 }
  0x36   : > { %v685_v5 = vsub.s32 0, %v684_v4  ;;  %v689_v7 = vsub.s32 1, %v684_v4 }
  0x37   : > { %638 = vmatpush1.bf16.msra.mxu0 %v921_v41 }
  0x38   : > { %639 = vmatprep.subr.bf16.mxu0 %v922_v42  ;;  %v686_v8 = vrot.slane %v681_v6, %v685_v5  ;;  %v690_v9 = vrot.slane %v681_v6, %v689_v7 }
  0x3b   : > { %640 = vmatpush1.bf16.msra.mxu0 %v924_v43 }
  0x3c   : > { %641 = vmatprep.subr.bf16.mxu0 %v925_v44 }
  0x3f   : > { %642 = vmatpush1.bf16.msra.mxu0 %v927_v45 }
  0x40   : > { %643 = vmatprep.subr.bf16.mxu0 %v928_v46 }
  0x43   : > { %644 = vmatpush1.bf16.msra.mxu0 %v930_v47 }
  0x44   : > { %645 = vmatprep.subr.bf16.mxu0 %v931_v48 }
  0x47   : > { %646 = vmatpush1.bf16.msra.mxu0 %v933_v49 }
  0x48   : > { %647 = vmatprep.subr.bf16.mxu0 %v934_v50 }
  0x4b   : > { %648 = vmatpush2.bf16.msra.mxu0 %v936_v51 }
  0x4c   : > { %649 = vmatprep.subr.bf16.mxu0 %v937_v52 }
  0x4f   : > { %650 = vmatpush2.bf16.msra.mxu0 %v939_v53 }
  0x50   : > { %651 = vmatprep.subr.bf16.mxu0 %v940_v54 }
  0x53   : > { %652 = vmatpush2.bf16.msra.mxu0 %v942_v55 }
  0x54   : > { %653 = vmatprep.subr.bf16.mxu0 %v943_v56 }
  0x57   : > { %654 = vmatpush2.bf16.msra.mxu0 %v945_v57 }
  0x58   : > { %655 = vmatprep.subr.bf16.mxu0 %v946_v58 }
  0x5b   : > { %656 = vmatpush2.bf16.msra.mxu0 %v948_v59 }
  0x5c   : > { %657 = vmatprep.subr.bf16.mxu0 %v949_v60 }
  0x5f   : > { %658 = vmatpush2.bf16.msra.mxu0 %v951_v61 }
  0x60   : > { %659 = vmatprep.subr.bf16.mxu0 %v952_v62 }
  0x63   : > { %660 = vmatpush2.bf16.msra.mxu0 %v954_v63 }
  0x64   : > { %661 = vmatprep.subr.bf16.mxu0 %v955_v0 }
  0x67   : > { %662 = vmatpush2.bf16.msra.mxu0 %v957_v1 }
  0x6a   : > { %664 = vmatmul.mubr.bf16.vlgmr.msra.gmra.mxu0 %v833_v2 }
 0x12a   : > { %v665_v10 = vpop.f32.mrf.mxu0 }
 0x12b   : > { %v693_v11 = vadd.f32 %v686_v8, %v665_v10 }
 0x12c   : > { %v667_v12 = vpop.f32.mrf.mxu0 }
 0x12d   : > { %695 = vst [vmem:[%s421_s18] sm:$0xff] %v693_v11  ;;  %v694_v13 = vadd.f32 %v690_v9, %v667_v12 }
 0x12e   : > { %v669_v14 = vpop.f32.mrf.mxu0 }
 0x12f   : > { %696 = vst [vmem:[%s421_s18 + $0x8] sm:$0xff] %v694_v13 }
 0x130   : > { %v670_v15 = vpop.f32.mrf.mxu0 }
 0x131 PF: > { %s13_s16 = sadd.s32 1, %s998_s16   ;;  %s1203_s12 = smov %s986_s13 }
 0x132   : > { %p10_p10 = scmp.ge.s32.totalorder %s13_s16, 4   ;;  %s1204_s13 = smov %s1055_s20 }
 0x133   : > { %s1205_s14 = smov %s994_s15  ;;  %s1206_s15 = smov %s1208_s17 }
 0x134   :  { %12 = sbr.rel (!%p10_p10) target bundleno = 3 (0x3), region = 119 }

// kernel: generator_forward.50
= control target key start
LH: loop header
LB: loop body
LE: loop exit
PB: predicated region body
PF: predicated region fallthrough
CT: control target
= control target key end

     0   :  { %s132_s0 = inlined_call_operand.vmem [shape: f32[32,128], index: 0, kind: input, shape index: {}]   ;;  %s133_s1 = inlined_call_operand.vmem [shape: f32[1,128], index: 1, kind: input, shape index: {}]   ;;  %s134_s2 = inlined_call_operand.vmem [shape: f32[1,128], index: 2, kind: input, shape index: {}]   ;;  %s135_s3 = inlined_call_operand.vmem [shape: f32[32,128], index: 3, kind: input, shape index: {}]   ;;  %s136_s4 = inlined_call_operand.vmem [shape: f32[32,128], index: 4, kind: output, shape index: {}]  }
   0x1   :  { %v17_v0 = vld [vmem:[%s132_s0] sm:$0xff]  ;;  %v18_v4 = vld [vmem:[%s132_s0 + $0x8] sm:$0xff]  ;;  %v19_v6 = vld [vmem:[%s132_s0 + $0x10] sm:$0xff] }
   0x2   :  { %v63_v1 = vld [vmem:[%s133_s1] ss:$0 sm:$0xff]  ;;  %v20_v7 = vld [vmem:[%s132_s0 + $0x18] sm:$0xff]  ;;  %v48_v14 = vld [vmem:[%s135_s3 + $0x8] sm:$0xff] }
   0x3   :  { %v64_v2 = vld [vmem:[%s134_s2] ss:$0 sm:$0xff]  ;;  %v28_v3 = vmul.f32 %v63_v1, %v17_v0  ;;  %v29_v5 = vmul.f32 %v63_v1, %v18_v4  ;;  %v30_v9 = vmul.f32 %v63_v1, %v19_v6  ;;  %v31_v10 = vmul.f32 %v63_v1, %v20_v7  ;;  %v49_v18 = vld [vmem:[%s135_s3 + $0x10] sm:$0xff]  ;;  %v50_v19 = vld [vmem:[%s135_s3 + $0x18] sm:$0xff] }
   0x4   :  { %v47_v11 = vld [vmem:[%s135_s3] sm:$0xff] }
   0x5   :  { %v39_v8 = vadd.f32 %v64_v2, %v28_v3  ;;  %v40_v12 = vadd.f32 %v64_v2, %v29_v5  ;;  %v41_v15 = vadd.f32 %v64_v2, %v30_v9  ;;  %v42_v16 = vadd.f32 %v64_v2, %v31_v10 }
   0x7   :  { %v43_v13 = vmax.f32 %v39_v8, 0.0  ;;  %v44_v17 = vmax.f32 %v40_v12, 0.0  ;;  %v45_v21 = vmax.f32 %v41_v15, 0.0  ;;  %v46_v22 = vmax.f32 %v42_v16, 0.0 }
   0x9   :  { %v51_v20 = vadd.f32 %v47_v11, %v43_v13  ;;  %v52_v23 = vadd.f32 %v48_v14, %v44_v17  ;;  %v53_v24 = vadd.f32 %v49_v18, %v45_v21  ;;  %v54_v25 = vadd.f32 %v50_v19, %v46_v22 }
   0xb   :  { %55 = vst [vmem:[%s136_s4] sm:$0xff] %v51_v20  ;;  %56 = vst [vmem:[%s136_s4 + $0x8] sm:$0xff] %v52_v23 }
   0xc   :  { %57 = vst [vmem:[%s136_s4 + $0x10] sm:$0xff] %v53_v24  ;;  %58 = vst [vmem:[%s136_s4 + $0x18] sm:$0xff] %v54_v25 }

// kernel: generator_forward.51
= control target key start
LH: loop header
LB: loop body
LE: loop exit
PB: predicated region body
PF: predicated region fallthrough
CT: control target
= control target key end

     0   :  { %v320_v1 = vmov 0   ;;  %v229_v19 = vlaneseq  ;;  %s422_s1 = inlined_call_operand.vmem [shape: bf16[128,256], index: 1, kind: input, shape index: {}]   ;;  %s423_s0 = inlined_call_operand.vmem [shape: bf16[32,128], index: 0, kind: input, shape index: {}]   ;;  %s424_s2 = inlined_call_operand.vmem [shape: f32[1,256], index: 2, kind: input, shape index: {}]   ;;  %s425_s3 = inlined_call_operand.vmem [shape: f32[32,256], index: 3, kind: output, shape index: {}]  }
   0x1   :  { %v294_v0 = vld [vmem:[%s422_s1 + $0x74] ss:$8 sps:$4 sm:$0xff]   ;;  %179 = vmatprep.mubr.bf16.mxu0 %v320_v1  ;;  %189 = vmatprep.mubr.bf16.mxu1 %v320_v1  ;;  %v296_v2 = vld [vmem:[%s422_s1 + $0x70] ss:$8 sps:$4 sm:$0xff]   ;;  %v297_v3 = vld [vmem:[%s422_s1 + $0x64] ss:$8 sps:$4 sm:$0xff]  }
   0x2   :  { %147 = vmatprep.subr.bf16.mxu0 %v294_v0  ;;  %277 = vmatprep.subr.bf16.mxu1 %v294_v0  ;;  %v299_v4 = vld [vmem:[%s422_s1 + $0x60] ss:$8 sps:$4 sm:$0xff]   ;;  %v300_v5 = vld [vmem:[%s422_s1 + $0x54] ss:$8 sps:$4 sm:$0xff]   ;;  %v302_v6 = vld [vmem:[%s422_s1 + $0x50] ss:$8 sps:$4 sm:$0xff]  }
   0x3   :  { %148 = vmatpush1.bf16.msra.mxu0 %v296_v2  ;;  %285 = vmatpush1.bf16.msra.mxu1 %v296_v2  ;;  %v303_v7 = vld [vmem:[%s422_s1 + $0x44] ss:$8 sps:$4 sm:$0xff]   ;;  %v305_v8 = vld [vmem:[%s422_s1 + $0x40] ss:$8 sps:$4 sm:$0xff]   ;;  %v306_v9 = vld [vmem:[%s422_s1 + $0x34] ss:$8 sps:$4 sm:$0xff]  }
   0x4   :  { %149 = vmatprep.subr.bf16.mxu0 %v297_v3  ;;  %278 = vmatprep.subr.bf16.mxu1 %v297_v3  ;;  %v308_v10 = vld [vmem:[%s422_s1 + $0x30] ss:$8 sps:$4 sm:$0xff]   ;;  %v309_v11 = vld [vmem:[%s422_s1 + $0x24] ss:$8 sps:$4 sm:$0xff]   ;;  %v311_v12 = vld [vmem:[%s422_s1 + $0x20] ss:$8 sps:$4 sm:$0xff]  }
   0x5   :  { %v312_v13 = vld [vmem:[%s422_s1 + $0x14] ss:$8 sps:$4 sm:$0xff]   ;;  %v314_v14 = vld [vmem:[%s422_s1 + $0x10] ss:$8 sps:$4 sm:$0xff]   ;;  %v315_v15 = vld [vmem:[%s422_s1 + $0x4] ss:$8 sps:$4 sm:$0xff]  }
   0x6   :  { %v317_v16 = vld [vmem:[%s422_s1] ss:$8 sps:$4 sm:$0xff]   ;;  %v230_v20 = vshrl.u32 %v229_v19, 7 }
   0x7   :  { %150 = vmatpush1.bf16.msra.mxu0 %v299_v4  ;;  %286 = vmatpush1.bf16.msra.mxu1 %v299_v4  ;;  %v318_v17 = vld [vmem:[%s423_s0] sm:$0xff]   ;;  %v319_v18 = vld [vmem:[%s423_s0 + $0x8] sm:$0xff]  }
   0x8   :  { %151 = vmatprep.subr.bf16.mxu0 %v300_v5  ;;  %279 = vmatprep.subr.bf16.mxu1 %v300_v5  ;;  %v231_v21 = vsub.s32 0, %v230_v20  ;;  %v227_v22 = vld [vmem:[%s424_s2] sm:$0x3]  ;;  %v235_v23 = vsub.s32 1, %v230_v20 }
   0xa   :  { %v232_v24 = vrot.slane %v227_v22, %v231_v21  ;;  %v236_v25 = vrot.slane %v227_v22, %v235_v23 }
   0xb   :  { %152 = vmatpush1.bf16.msra.mxu0 %v302_v6  ;;  %287 = vmatpush1.bf16.msra.mxu1 %v302_v6 }
   0xc   :  { %153 = vmatprep.subr.bf16.mxu0 %v303_v7  ;;  %280 = vmatprep.subr.bf16.mxu1 %v303_v7 }
   0xf   :  { %154 = vmatpush1.bf16.msra.mxu0 %v305_v8  ;;  %288 = vmatpush1.bf16.msra.mxu1 %v305_v8 }
  0x10   :  { %155 = vmatprep.subr.bf16.mxu0 %v306_v9  ;;  %281 = vmatprep.subr.bf16.mxu1 %v306_v9 }
  0x13   :  { %156 = vmatpush1.bf16.msra.mxu0 %v308_v10  ;;  %289 = vmatpush1.bf16.msra.mxu1 %v308_v10 }
  0x14   :  { %157 = vmatprep.subr.bf16.mxu0 %v309_v11  ;;  %282 = vmatprep.subr.bf16.mxu1 %v309_v11 }
  0x17   :  { %158 = vmatpush1.bf16.msra.mxu0 %v311_v12  ;;  %290 = vmatpush1.bf16.msra.mxu1 %v311_v12 }
  0x18   :  { %159 = vmatprep.subr.bf16.mxu0 %v312_v13  ;;  %283 = vmatprep.subr.bf16.mxu1 %v312_v13 }
  0x1b   :  { %160 = vmatpush1.bf16.msra.mxu0 %v314_v14  ;;  %291 = vmatpush1.bf16.msra.mxu1 %v314_v14 }
  0x1c   :  { %161 = vmatprep.subr.bf16.mxu0 %v315_v15  ;;  %284 = vmatprep.subr.bf16.mxu1 %v315_v15 }
  0x1f   :  { %162 = vmatpush1.bf16.msra.mxu0 %v317_v16  ;;  %292 = vmatpush1.bf16.msra.mxu1 %v317_v16 }
  0x22   :  { %180 = vmatmul.mubr.bf16.vlgmr.msra.gmra.mxu0 %v318_v17  ;;  %190 = vmatmul.mubr.bf16.vlgmr.msra.gmra.mxu1 %v319_v18 }
  0xe2   :  { %v181_v26 = vpop.f32.mrf.mxu0  ;;  %v191_v27 = vpop.f32.mrf.mxu1 }
  0xe3   :  { %v239_v28 = vadd.f32 %v232_v24, %v181_v26  ;;  %v243_v29 = vadd.f32 %v232_v24, %v191_v27 }
  0xe4   :  { %v183_v30 = vpop.f32.mrf.mxu0  ;;  %v193_v31 = vpop.f32.mrf.mxu1 }
  0xe5   :  { %247 = vst [vmem:[%s425_s3] sm:$0xff] %v239_v28  ;;  %251 = vst [vmem:[%s425_s3 + $0x20] sm:$0xff] %v243_v29  ;;  %v240_v32 = vadd.f32 %v236_v25, %v183_v30  ;;  %v244_v33 = vadd.f32 %v236_v25, %v193_v31 }
  0xe6   :  { %v185_v34 = vpop.f32.mrf.mxu0  ;;  %v195_v35 = vpop.f32.mrf.mxu1 }
  0xe7   :  { %248 = vst [vmem:[%s425_s3 + $0x8] sm:$0xff] %v240_v32  ;;  %252 = vst [vmem:[%s425_s3 + $0x28] sm:$0xff] %v244_v33  ;;  %v241_v36 = vadd.f32 %v232_v24, %v185_v34  ;;  %v245_v37 = vadd.f32 %v232_v24, %v195_v35 }
  0xe8   :  { %v187_v38 = vpop.f32.mrf.mxu0  ;;  %v197_v39 = vpop.f32.mrf.mxu1 }
  0xe9   :  { %249 = vst [vmem:[%s425_s3 + $0x10] sm:$0xff] %v241_v36  ;;  %253 = vst [vmem:[%s425_s3 + $0x30] sm:$0xff] %v245_v37  ;;  %v242_v40 = vadd.f32 %v236_v25, %v187_v38  ;;  %v246_v41 = vadd.f32 %v236_v25, %v197_v39 }
  0xeb   :  { %250 = vst [vmem:[%s425_s3 + $0x18] sm:$0xff] %v242_v40  ;;  %254 = vst [vmem:[%s425_s3 + $0x38] sm:$0xff] %v246_v41 }

// kernel: tile.8
= control target key start
LH: loop header
LB: loop body
LE: loop exit
PB: predicated region body
PF: predicated region fallthrough
CT: control target
= control target key end

     0   :  { %s22_s0 = inlined_call_operand.vmem [shape: f32[4], index: 0, kind: input, shape index: {}]   ;;  %s23_s1 = inlined_call_operand.vmem [shape: f32[4,4], index: 1, kind: output, shape index: {}]  }
   0x1   :  { %v4_v0 = vld [vmem:[%s22_s0] ss:$0 sm:$0xff] }
   0x2   :  { %5 = vst [vmem:[%s23_s1] sm:$0xf] %v4_v0 }

// kernel: tile.9
= control target key start
LH: loop header
LB: loop body
LE: loop exit
PB: predicated region body
PF: predicated region fallthrough
CT: control target
= control target key end

     0   :  { %vm8_vm0 = vcmask 31744   ;;  %s40_s8 = smov 4   ;;  %s41_s9 = smov 8   ;;  %vm14_vm1 = vcmask 130144   ;;  %vm20_vm2 = vcmask 97344   ;;  %vm26_vm3 = vcmask 64544   ;;  %s58_s0 = inlined_call_operand.vmem [shape: f32[4,4], index: 0, kind: input, shape index: {}]   ;;  %s59_s1 = inlined_call_operand.vmem [shape: f32[1,16], index: 1, kind: output, shape index: {}]  }
   0x1   :  { %v5_v0 = vld [vmem:[%s58_s0] sm:$0xf]  ;;  %s39_s0 = smov 12  }
   0x2   :  { %6 = vst [vmem:[#allocation1] sm:$0xf] %v5_v0 }
   0x9   :  { %v11_v1 = vld [vmem:[#allocation1 + $0x3] sm:$0x1]   ;;  %v23_v2 = vld [vmem:[#allocation1 + $0x1] sm:$0x1]   ;;  %v7_v3 = vld [vmem:[#allocation1] sm:$0x1]  }
   0xa   :  { %12 = vrot.lane.b32.xlu0 %v11_v1, %s39_s0  ;;  %24 = vrot.lane.b32.xlu1 %v23_v2, %s40_s8  ;;  %v17_v4 = vld [vmem:[#allocation1 + $0x2] sm:$0x1]   ;;  %9 = vst.msk [vmem:[#allocation0] sm:$0x1] %vm8_vm0, %v7_v3  }
   0xe   :  { %18 = vrot.lane.b32.xlu0 %v17_v4, %s41_s9 }
  0x7c   :  { %v13_v5 = vpop.permute.xlu0 %12   ;;  %v25_v6 = vpop.permute.xlu1 %24  }
  0x7d   :  { %15 = vst.msk [vmem:[#allocation0] sm:$0x1] %vm14_vm1, %v13_v5  }
  0x80   :  { %v19_v7 = vpop.permute.xlu0 %18  }
  0x81   :  { %21 = vst.msk [vmem:[#allocation0] sm:$0x1] %vm20_vm2, %v19_v7  }
  0x82   :  { %27 = vst.msk [vmem:[#allocation0] sm:$0x1] %vm26_vm3, %v25_v6  }
  0x89   :  { %v32_v8 = vld [vmem:[#allocation0] sm:$0x1] }
  0x8a   :  { %35 = vst [vmem:[%s59_s1] sm:$0x1] %v32_v8 }

// kernel: generator_forward.52
= control target key start
LH: loop header
LB: loop body
LE: loop exit
PB: predicated region body
PF: predicated region fallthrough
CT: control target
= control target key end

     0   :  { %vm127_vm0 = vcmask 523264   ;;  %s377_s0 = inlined_call_operand.vmem [shape: f32[128,64], index: 0, kind: input, shape index: {}]   ;;  %s378_s1 = inlined_call_operand.vmem [shape: f32[1,64], index: 1, kind: input, shape index: {}]   ;;  %s379_s2 = inlined_call_operand.vmem [shape: f32[1,64], index: 2, kind: input, shape index: {}]   ;;  %s380_s3 = inlined_call_operand.vmem [shape: f32[128,64], index: 3, kind: input, shape index: {}]   ;;  %s381_s4 = inlined_call_operand.vmem [shape: f32[128,64], index: 4, kind: output, shape index: {}]  }
   0x1   :  { %v17_v0 = vld [vmem:[%s377_s0] sm:$0xff]  ;;  %v18_v4 = vld [vmem:[%s377_s0 + $0x8] sm:$0xff]  ;;  %v19_v6 = vld [vmem:[%s377_s0 + $0x10] sm:$0xff] }
   0x2   :  { %v181_v1 = vld [vmem:[%s378_s1] ss:$0 sm:$0xff]  ;;  %v20_v7 = vld [vmem:[%s377_s0 + $0x18] sm:$0xff]  ;;  %v22_v15 = vld [vmem:[%s377_s0 + $0x28] sm:$0xff] }
   0x3   :  { %v186_v2 = vld [vmem:[%s379_s2] ss:$0 sm:$0xff]  ;;  %v40_v3 = vmul.f32 %v181_v1, %v17_v0  ;;  %v41_v5 = vmul.f32 %v181_v1, %v18_v4  ;;  %v42_v9 = vmul.f32 %v181_v1, %v19_v6  ;;  %v43_v10 = vmul.f32 %v181_v1, %v20_v7  ;;  %v23_v16 = vld [vmem:[%s377_s0 + $0x30] sm:$0xff]  ;;  %v96_v18 = vld [vmem:[%s380_s3 + $0x8] sm:$0xff] }
   0x4   :  { %v21_v11 = vld [vmem:[%s377_s0 + $0x20] sm:$0xff]  ;;  %v45_v21 = vmul.f32 %v181_v1, %v22_v15  ;;  %v24_v22 = vld [vmem:[%s377_s0 + $0x38] sm:$0xff]  ;;  %v97_v24 = vld [vmem:[%s380_s3 + $0x10] sm:$0xff]  ;;  %v46_v27 = vmul.f32 %v181_v1, %v23_v16 }
   0x5   :  { %v63_v8 = vadd.f32 %v186_v2, %v40_v3  ;;  %v95_v12 = vld [vmem:[%s380_s3] sm:$0xff]  ;;  %v64_v13 = vadd.f32 %v186_v2, %v41_v5  ;;  %v44_v14 = vmul.f32 %v181_v1, %v21_v11  ;;  %v65_v19 = vadd.f32 %v186_v2, %v42_v9  ;;  %v98_v25 = vld [vmem:[%s380_s3 + $0x18] sm:$0xff]  ;;  %v26_v35 = vld [vmem:[%s377_s0 + $0x48] sm:$0xff] }
   0x6   :  { %v66_v20 = vadd.f32 %v186_v2, %v43_v10  ;;  %v47_v28 = vmul.f32 %v181_v1, %v24_v22  ;;  %v25_v29 = vld [vmem:[%s377_s0 + $0x40] sm:$0xff]  ;;  %v68_v34 = vadd.f32 %v186_v2, %v45_v21  ;;  %v100_v38 = vld [vmem:[%s380_s3 + $0x28] sm:$0xff]  ;;  %v69_v39 = vadd.f32 %v186_v2, %v46_v27  ;;  %v27_v41 = vld [vmem:[%s377_s0 + $0x50] sm:$0xff] }
   0x7   :  { %v79_v17 = vmax.f32 %v63_v8, 0.0  ;;  %v80_v23 = vmax.f32 %v64_v13, 0.0  ;;  %v67_v26 = vadd.f32 %v186_v2, %v44_v14  ;;  %v81_v31 = vmax.f32 %v65_v19, 0.0  ;;  %v99_v33 = vld [vmem:[%s380_s3 + $0x20] sm:$0xff]  ;;  %v28_v42 = vld [vmem:[%s377_s0 + $0x58] sm:$0xff]  ;;  %v101_v46 = vld [vmem:[%s380_s3 + $0x30] sm:$0xff] }
   0x8   :  { %v82_v32 = vmax.f32 %v66_v20, 0.0  ;;  %v70_v40 = vadd.f32 %v186_v2, %v47_v28  ;;  %v84_v45 = vmax.f32 %v68_v34, 0.0  ;;  %v102_v47 = vld [vmem:[%s380_s3 + $0x38] sm:$0xff]  ;;  %v48_v48 = vmul.f32 %v181_v1, %v25_v29  ;;  %v29_v49 = vld [vmem:[%s377_s0 + $0x60] sm:$0xff]  ;;  %v30_v54 = vld [vmem:[%s377_s0 + $0x68] sm:$0xff] }
   0x9   :  { %v111_v30 = vadd.f32 %v95_v12, %v79_v17  ;;  %v112_v36 = vadd.f32 %v96_v18, %v80_v23  ;;  %v83_v37 = vmax.f32 %v67_v26, 0.0  ;;  %v113_v43 = vadd.f32 %v97_v24, %v81_v31  ;;  %v31_v59 = vld [vmem:[%s377_s0 + $0x70] sm:$0xff]  ;;  %v32_v60 = vld [vmem:[%s377_s0 + $0x78] sm:$0xff]  ;;  %v103_v63 = vld [vmem:[%s380_s3 + $0x40] sm:$0xff] }
   0xa   :  { %v114_v44 = vadd.f32 %v98_v25, %v82_v32  ;;  %v85_v51 = vmax.f32 %v69_v39, 0.0  ;;  %v86_v52 = vmax.f32 %v70_v40, 0.0  ;;  %v49_v53 = vmul.f32 %v181_v1, %v26_v35  ;;  %v104_v5 = vld [vmem:[%s380_s3 + $0x48] sm:$0xff]  ;;  %v105_v10 = vld [vmem:[%s380_s3 + $0x50] sm:$0xff]  ;;  %v106_v11 = vld [vmem:[%s380_s3 + $0x58] sm:$0xff] }
   0xb   :  { %128 = vst.msk [vmem:[%s381_s4] sm:$0xff] %vm127_vm0, %v111_v30  ;;  %129 = vst.msk [vmem:[%s381_s4 + $0x8] sm:$0xff] %vm127_vm0, %v112_v36  ;;  %v115_v50 = vadd.f32 %v99_v33, %v83_v37  ;;  %v116_v55 = vadd.f32 %v100_v38, %v84_v45  ;;  %v71_v56 = vadd.f32 %v186_v2, %v48_v48  ;;  %v107_v18 = vld [vmem:[%s380_s3 + $0x60] sm:$0xff]  ;;  %v108_v22 = vld [vmem:[%s380_s3 + $0x68] sm:$0xff] }
   0xc   :  { %130 = vst.msk [vmem:[%s381_s4 + $0x10] sm:$0xff] %vm127_vm0, %v113_v43  ;;  %131 = vst.msk [vmem:[%s381_s4 + $0x18] sm:$0xff] %vm127_vm0, %v114_v44  ;;  %v50_v57 = vmul.f32 %v181_v1, %v27_v41  ;;  %v51_v58 = vmul.f32 %v181_v1, %v28_v42  ;;  %v117_v61 = vadd.f32 %v101_v46, %v85_v51  ;;  %v109_v27 = vld [vmem:[%s380_s3 + $0x70] sm:$0xff]  ;;  %v110_v28 = vld [vmem:[%s380_s3 + $0x78] sm:$0xff] }
   0xd   :  { %132 = vst.msk [vmem:[%s381_s4 + $0x20] sm:$0xff] %vm127_vm0, %v115_v50  ;;  %v118_v62 = vadd.f32 %v102_v47, %v86_v52  ;;  %v72_v0 = vadd.f32 %v186_v2, %v49_v53  ;;  %v52_v3 = vmul.f32 %v181_v1, %v29_v49  ;;  %133 = vst.msk [vmem:[%s381_s4 + $0x28] sm:$0xff] %vm127_vm0, %v116_v55  ;;  %v87_v4 = vmax.f32 %v71_v56, 0.0 }
   0xe   :  { %v73_v6 = vadd.f32 %v186_v2, %v50_v57  ;;  %v74_v7 = vadd.f32 %v186_v2, %v51_v58  ;;  %v53_v8 = vmul.f32 %v181_v1, %v30_v54  ;;  %134 = vst.msk [vmem:[%s381_s4 + $0x30] sm:$0xff] %vm127_vm0, %v117_v61  ;;  %v54_v13 = vmul.f32 %v181_v1, %v31_v59 }
   0xf   :  { %135 = vst.msk [vmem:[%s381_s4 + $0x38] sm:$0xff] %vm127_vm0, %v118_v62  ;;  %v88_v9 = vmax.f32 %v72_v0, 0.0  ;;  %v75_v12 = vadd.f32 %v186_v2, %v52_v3  ;;  %v55_v14 = vmul.f32 %v181_v1, %v32_v60  ;;  %v119_v15 = vadd.f32 %v103_v63, %v87_v4 }
  0x10   :  { %v89_v16 = vmax.f32 %v73_v6, 0.0  ;;  %v90_v17 = vmax.f32 %v74_v7, 0.0  ;;  %v76_v19 = vadd.f32 %v186_v2, %v53_v8  ;;  %v77_v23 = vadd.f32 %v186_v2, %v54_v13 }
  0x11   :  { %v120_v20 = vadd.f32 %v104_v5, %v88_v9  ;;  %v91_v21 = vmax.f32 %v75_v12, 0.0  ;;  %v78_v24 = vadd.f32 %v186_v2, %v55_v14  ;;  %136 = vst.msk [vmem:[%s381_s4 + $0x40] sm:$0xff] %vm127_vm0, %v119_v15 }
  0x12   :  { %v121_v1 = vadd.f32 %v105_v10, %v89_v16  ;;  %v122_v25 = vadd.f32 %v106_v11, %v90_v17  ;;  %v92_v26 = vmax.f32 %v76_v19, 0.0  ;;  %v93_v29 = vmax.f32 %v77_v23, 0.0 }
  0x13   :  { %137 = vst.msk [vmem:[%s381_s4 + $0x48] sm:$0xff] %vm127_vm0, %v120_v20  ;;  %v123_v2 = vadd.f32 %v107_v18, %v91_v21  ;;  %v94_v30 = vmax.f32 %v78_v24, 0.0 }
  0x14   :  { %138 = vst.msk [vmem:[%s381_s4 + $0x50] sm:$0xff] %vm127_vm0, %v121_v1  ;;  %139 = vst.msk [vmem:[%s381_s4 + $0x58] sm:$0xff] %vm127_vm0, %v122_v25  ;;  %v124_v31 = vadd.f32 %v108_v22, %v92_v26  ;;  %v125_v32 = vadd.f32 %v109_v27, %v93_v29 }
  0x15   :  { %140 = vst.msk [vmem:[%s381_s4 + $0x60] sm:$0xff] %vm127_vm0, %v123_v2  ;;  %v126_v33 = vadd.f32 %v110_v28, %v94_v30 }
  0x16   :  { %141 = vst.msk [vmem:[%s381_s4 + $0x68] sm:$0xff] %vm127_vm0, %v124_v31  ;;  %142 = vst.msk [vmem:[%s381_s4 + $0x70] sm:$0xff] %vm127_vm0, %v125_v32 }
  0x17   :  { %143 = vst.msk [vmem:[%s381_s4 + $0x78] sm:$0xff] %vm127_vm0, %v126_v33 }

// kernel: generator_forward.53
= control target key start
LH: loop header
LB: loop body
LE: loop exit
PB: predicated region body
PF: predicated region fallthrough
CT: control target
= control target key end

     0   :  { %vm139_vm0 = vcmask 523264   ;;  %s595_s1 = inlined_call_operand.vmem [shape: bf16[64,128], index: 1, kind: input, shape index: {}]   ;;  %s596_s0 = inlined_call_operand.vmem [shape: bf16[128,64], index: 0, kind: input, shape index: {}]   ;;  %s597_s2 = inlined_call_operand.vmem [shape: f32[1,128], index: 2, kind: input, shape index: {}]   ;;  %s598_s3 = inlined_call_operand.vmem [shape: f32[128,128], index: 3, kind: output, shape index: {}]  }
   0x1   :  { %v436_v0 = vld [vmem:[%s595_s1 + $0x18] sm:$0xff]   ;;  %v437_v1 = vld [vmem:[%s595_s1 + $0x10] sm:$0xff]   ;;  %v438_v2 = vld [vmem:[%s595_s1 + $0x8] sm:$0xff]  }
   0x2   :  { %404 = vmatprep.subr.bf16.mxu0 %v436_v0  ;;  %428 = vmatprep.subr.bf16.mxu1 %v436_v0  ;;  %v440_v3 = vld [vmem:[%s596_s0] sm:$0xff]   ;;  %v442_v6 = vld [vmem:[%s596_s0 + $0x8] sm:$0xff]   ;;  %v444_v8 = vld [vmem:[%s596_s0 + $0x10] sm:$0xff]  }
   0x3   :  { %405 = vmatpush3.bf16.msra.mxu0 %v436_v0  ;;  %432 = vmatpush3.bf16.msra.mxu1 %v436_v0  ;;  %v441_v4 = vld [vmem:[%s596_s0 + $0x20] sm:$0xff]   ;;  %v443_v7 = vld [vmem:[%s596_s0 + $0x28] sm:$0xff]   ;;  %v445_v9 = vld [vmem:[%s596_s0 + $0x30] sm:$0xff]  }
   0x4   :  { %406 = vmatprep.subr.bf16.mxu0 %v437_v1  ;;  %429 = vmatprep.subr.bf16.mxu1 %v437_v1  ;;  %v439_v5 = vld [vmem:[%s595_s1] sm:$0xff]   ;;  %v446_v10 = vld [vmem:[%s596_s0 + $0x18] sm:$0xff]  }
   0x5   :  { %412 = vmatprep.mubr.msk.bf16.mxu0 %vm139_vm0, %v440_v3  ;;  %420 = vmatprep.mubr.msk.bf16.mxu1 %vm139_vm0, %v441_v4  ;;  %v447_v11 = vld [vmem:[%s596_s0 + $0x38] sm:$0xff]   ;;  %v391_v12 = vld [vmem:[%s597_s2] ss:$0 sm:$0xff] }
   0x7   :  { %407 = vmatpush3.bf16.msra.mxu0 %v437_v1  ;;  %433 = vmatpush3.bf16.msra.mxu1 %v437_v1 }
   0x8   :  { %408 = vmatprep.subr.bf16.mxu0 %v438_v2  ;;  %430 = vmatprep.subr.bf16.mxu1 %v438_v2 }
   0xb   :  { %409 = vmatpush3.bf16.msra.mxu0 %v438_v2  ;;  %434 = vmatpush3.bf16.msra.mxu1 %v438_v2 }
   0xc   :  { %410 = vmatprep.subr.bf16.mxu0 %v439_v5  ;;  %431 = vmatprep.subr.bf16.mxu1 %v439_v5 }
   0xf   :  { %411 = vmatpush3.bf16.msra.mxu0 %v439_v5  ;;  %435 = vmatpush3.bf16.msra.mxu1 %v439_v5 }
  0x12   :  { %413 = vmatmul.mubr.msk.bf16.vlgmr.msra.gmra.mxu0 %vm139_vm0, %v442_v6  ;;  %421 = vmatmul.mubr.msk.bf16.vlgmr.msra.gmra.mxu1 %vm139_vm0, %v443_v7 }
  0x13   :  { %416 = vmatprep.mubr.msk.bf16.mxu0 %vm139_vm0, %v444_v8  ;;  %424 = vmatprep.mubr.msk.bf16.mxu1 %vm139_vm0, %v445_v9 }
  0x1a   :  { %417 = vmatmul.mubr.msk.bf16.gmra.mxu0 %vm139_vm0, %v446_v10  ;;  %425 = vmatmul.mubr.msk.bf16.gmra.mxu1 %vm139_vm0, %v447_v11 }
  0xd2   :  { %v414_v13 = vpop.f32.mrf.mxu0  ;;  %v422_v14 = vpop.f32.mrf.mxu1 }
  0xd3   :  { %v321_v15 = vadd.f32 %v414_v13, %v391_v12  ;;  %v329_v16 = vadd.f32 %v422_v14, %v391_v12 }
  0xd4   :  { %v198_v17 = vpop.f32.mrf.mxu0  ;;  %v230_v18 = vpop.f32.mrf.mxu1 }
  0xd5   :  { %448 = vtanh.f32 %v321_v15  ;;  %v319_v19 = vadd.f32 %v391_v12, %v198_v17  ;;  %v327_v20 = vadd.f32 %v391_v12, %v230_v18 }
  0xd6   :  { %450 = vtanh.f32 %v329_v16  ;;  %v415_v21 = vpop.f32.mrf.mxu0  ;;  %v423_v22 = vpop.f32.mrf.mxu1 }
  0xd7   :  { %452 = vtanh.f32 %v319_v19  ;;  %v322_v23 = vadd.f32 %v415_v21, %v391_v12  ;;  %v330_v24 = vadd.f32 %v423_v22, %v391_v12 }
  0xd8   :  { %454 = vtanh.f32 %v327_v20  ;;  %v201_v25 = vpop.f32.mrf.mxu0  ;;  %v233_v26 = vpop.f32.mrf.mxu1 }
  0xd9   :  { %456 = vtanh.f32 %v322_v23  ;;  %v320_v27 = vadd.f32 %v391_v12, %v201_v25  ;;  %v328_v28 = vadd.f32 %v391_v12, %v233_v26 }
  0xda   :  { %458 = vtanh.f32 %v330_v24  ;;  %v418_v29 = vpop.f32.mrf.mxu0  ;;  %v426_v30 = vpop.f32.mrf.mxu1 }
  0xdb   :  { %460 = vtanh.f32 %v320_v27  ;;  %v325_v31 = vadd.f32 %v418_v29, %v391_v12  ;;  %v333_v32 = vadd.f32 %v426_v30, %v391_v12 }
  0xdc   :  { %462 = vtanh.f32 %v328_v28  ;;  %v214_v33 = vpop.f32.mrf.mxu0  ;;  %v246_v34 = vpop.f32.mrf.mxu1 }
  0xdd   :  { %464 = vtanh.f32 %v325_v31  ;;  %v323_v35 = vadd.f32 %v391_v12, %v214_v33  ;;  %v331_v36 = vadd.f32 %v391_v12, %v246_v34 }
  0xde   :  { %466 = vtanh.f32 %v333_v32  ;;  %v419_v37 = vpop.f32.mrf.mxu0  ;;  %v427_v38 = vpop.f32.mrf.mxu1 }
  0xdf   :  { %468 = vtanh.f32 %v323_v35  ;;  %v326_v39 = vadd.f32 %v419_v37, %v391_v12  ;;  %v334_v40 = vadd.f32 %v427_v38, %v391_v12 }
  0xe0   :  { %470 = vtanh.f32 %v331_v36  ;;  %v217_v41 = vpop.f32.mrf.mxu0  ;;  %v249_v42 = vpop.f32.mrf.mxu1 }
  0xe1   :  { %472 = vtanh.f32 %v326_v39  ;;  %v324_v43 = vadd.f32 %v391_v12, %v217_v41  ;;  %v332_v44 = vadd.f32 %v391_v12, %v249_v42 }
  0xe2   :  { %v449_v45 = vpop.eup %448  ;;  %474 = vtanh.f32 %v334_v40 }
  0xe3   :  { %v451_v46 = vpop.eup %450  ;;  %353 = vst [vmem:[%s598_s3 + $0x10] sm:$0xff] %v449_v45  ;;  %476 = vtanh.f32 %v324_v43 }
  0xe4   :  { %v453_v47 = vpop.eup %452  ;;  %361 = vst [vmem:[%s598_s3 + $0x50] sm:$0xff] %v451_v46  ;;  %478 = vtanh.f32 %v332_v44 }
  0xe5   :  { %v455_v48 = vpop.eup %454  ;;  %351 = vst [vmem:[%s598_s3] sm:$0xff] %v453_v47 }
  0xe6   :  { %v457_v49 = vpop.eup %456  ;;  %359 = vst [vmem:[%s598_s3 + $0x40] sm:$0xff] %v455_v48 }
  0xe7   :  { %v459_v50 = vpop.eup %458  ;;  %354 = vst [vmem:[%s598_s3 + $0x18] sm:$0xff] %v457_v49 }
  0xe8   :  { %v461_v51 = vpop.eup %460  ;;  %362 = vst [vmem:[%s598_s3 + $0x58] sm:$0xff] %v459_v50 }
  0xe9   :  { %v463_v52 = vpop.eup %462  ;;  %352 = vst [vmem:[%s598_s3 + $0x8] sm:$0xff] %v461_v51 }
  0xea   :  { %v465_v53 = vpop.eup %464  ;;  %360 = vst [vmem:[%s598_s3 + $0x48] sm:$0xff] %v463_v52 }
  0xeb   :  { %v467_v54 = vpop.eup %466  ;;  %357 = vst [vmem:[%s598_s3 + $0x30] sm:$0xff] %v465_v53 }
  0xec   :  { %v469_v55 = vpop.eup %468  ;;  %365 = vst [vmem:[%s598_s3 + $0x70] sm:$0xff] %v467_v54 }
  0xed   :  { %v471_v56 = vpop.eup %470  ;;  %355 = vst [vmem:[%s598_s3 + $0x20] sm:$0xff] %v469_v55 }
  0xee   :  { %v473_v57 = vpop.eup %472  ;;  %363 = vst [vmem:[%s598_s3 + $0x60] sm:$0xff] %v471_v56 }
  0xef   :  { %v475_v58 = vpop.eup %474  ;;  %358 = vst [vmem:[%s598_s3 + $0x38] sm:$0xff] %v473_v57 }
  0xf0   :  { %v477_v59 = vpop.eup %476  ;;  %366 = vst [vmem:[%s598_s3 + $0x78] sm:$0xff] %v475_v58 }
  0xf1   :  { %v479_v60 = vpop.eup %478  ;;  %356 = vst [vmem:[%s598_s3 + $0x28] sm:$0xff] %v477_v59 }
  0xf2   :  { %364 = vst [vmem:[%s598_s3 + $0x68] sm:$0xff] %v479_v60 }

</bundles_post_ra>
